<compile_context>
chip_gen: v7x
topology: tpu7x:2x2x1
jax: 0.10.0
libtpu: 0.0.40
codegen_flags: <defaults>
</compile_context>

<pallas_src>
import jax
import jax.numpy as jnp
from jax.experimental import pallas as pl
from jax.experimental.pallas import tpu as pltpu


_SELU_SCALE = 1.0507009873554804934193349852946
_SELU_ALPHA = 1.6732632423543772848170429916717


def _round_up(v, m):
    return (v + m - 1) // m * m


def _selu(x):
    x = x.astype(jnp.float32)
    return _SELU_SCALE * jnp.where(
        x > 0, x, _SELU_ALPHA * (jnp.exp(jnp.minimum(x, 0.0)) - 1.0))


def _single_buffer_supported():
    """Does this jax expose BlockSpec(pipeline_mode=pl.Buffered(1))?"""
    try:
        pl.BlockSpec((8, 128), lambda i: (0, 0), pipeline_mode=pl.Buffered(1))
        return True
    except TypeError:
        return False


def _make_kernel(tile_n, l_resident):
    def kernel(x_ref, l_ref, w_ref, b_ref, pt_ref, fcw_ref, fcb_ref,  # inputs
               out_ref,                                               # output
               ta_ref, tb_ref, hacc_ref, h1_ref, pool_ref):           # scratch
        layer = pl.program_id(0)          # 0: conv1, 1: conv2
        k = pl.program_id(1)              # Chebyshev order
        i = pl.program_id(2)              # node row tile
        n_k = pl.num_programs(1)
        n_i = pl.num_programs(2)

        r0 = pl.multiple_of(i * tile_n, tile_n)
        rows = pl.ds(r0, tile_n)

        # One-time init: garbage-proof the pooled accumulator / output tile.
        @pl.when(jnp.logical_and(layer == 0, jnp.logical_and(k == 0, i == 0)))
        def _init():
            pool_ref[...] = jnp.zeros_like(pool_ref)
            out_ref[...] = jnp.zeros_like(out_ref)

        # Row panel of the scaled Laplacian (bf16).
        if l_resident:
            l_blk = l_ref[rows, :]        # resident: slice the full operator
        else:
            l_blk = l_ref[...]            # streamed [tile_n, NP] panel

        even = (k % 2) == 0               # T_k slot: A if k is even, B if odd

        def weight_gemm(t_k_blk):
            # Fused per-order weight GEMM: hacc += T_k @ W[layer, k] (f32 acc).
            contrib = jnp.dot(t_k_blk, w_ref[...],
                              preferred_element_type=jnp.float32)

            @pl.when(k == 0)
            def _acc_init():
                hacc_ref[rows, :] = contrib + b_ref[...]

            @pl.when(k > 0)
            def _acc():
                hacc_ref[rows, :] = hacc_ref[rows, :] + contrib

        def cheb_step(dst_ref, src_ref):
            # dst holds T_{k-2} (this row block) and receives T_k;
            # src holds the full T_{k-1}.
            @pl.when(k == 0)
            def _t0():
                @pl.when(layer == 0)
                def _from_x():
                    dst_ref[rows, :] = x_ref[...].astype(dst_ref.dtype)

                @pl.when(layer == 1)
                def _from_h1():
                    dst_ref[rows, :] = h1_ref[rows, :].astype(dst_ref.dtype)

            @pl.when(k == 1)
            def _t1():
                prod = jnp.dot(l_blk, src_ref[...],
                               preferred_element_type=jnp.float32)
                dst_ref[rows, :] = prod.astype(dst_ref.dtype)

            @pl.when(k >= 2)
            def _tk():
                t_km2 = dst_ref[rows, :].astype(jnp.float32)
                prod = jnp.dot(l_blk, src_ref[...],
                               preferred_element_type=jnp.float32)
                dst_ref[rows, :] = (2.0 * prod - t_km2).astype(dst_ref.dtype)

            # Fresh T_k forwards straight into the weight GEMM (no jnp.where
            # over both ring buffers).
            weight_gemm(dst_ref[rows, :])

        @pl.when(even)
        def _even():
            cheb_step(ta_ref, tb_ref)

        @pl.when(jnp.logical_not(even))
        def _odd():
            cheb_step(tb_ref, ta_ref)

        last_k = k == n_k - 1

        # conv1 epilogue: SELU in f32 (AlphaDropout == identity at eval);
        # activations stay on-chip as the input of conv2.
        @pl.when(jnp.logical_and(last_k, layer == 0))
        def _ep_l0():
            h1_ref[rows, :] = _selu(hacc_ref[rows, :]).astype(h1_ref.dtype)

        # conv2 epilogue: SELU + fused global_add_pool (H2 never hits HBM).
        @pl.when(jnp.logical_and(last_k, layer == 1))
        def _ep_l1():
            act = _selu(hacc_ref[rows, :])                 # f32 [tile_n, CW]
            p_blk = pt_ref[...]                            # f32 [tile_n, GP]
            pool_ref[...] = pool_ref[...] + jax.lax.dot_general(
                p_blk, act, (((0,), (0,)), ((), ())),
                preferred_element_type=jnp.float32)

        # Final fused Linear on the very last grid step.
        @pl.when(jnp.logical_and(jnp.logical_and(layer == 1, last_k),
                                 i == n_i - 1))
        def _final():
            out_ref[...] = (jnp.dot(pool_ref[...], fcw_ref[...],
                                    preferred_element_type=jnp.float32)
                            + fcb_ref[...])

    return kernel


def gcn_model_forward(x, l_hat, w1, b1, w2, b2, batch, num_graphs,
                      fc_w, fc_b, *, tile_n=None, state_dtype=jnp.bfloat16):
    """Fused GCNModel forward. Returns [num_graphs, out_channels] float32."""
    N, c_in = x.shape
    K, _, hid = w1.shape
    out_c = fc_w.shape[1]
    G = int(num_graphs)

    # Lane-padded widths (>=128) and 8-aligned graph dim.
    CW = _round_up(max(c_in, hid), 128)
    OW = _round_up(out_c, 128)
    GP = _round_up(max(G, 8), 8)

    f32 = jnp.float32
    sd = state_dtype
    sb = jnp.dtype(sd).itemsize

    # ---- generation-gated VMEM budget ------------------------------------ #
    try:
        vmem_cap = int(pltpu.get_tpu_info().vmem_capacity_bytes)
    except Exception:
        vmem_cap = 64 * 1024 * 1024
    # Leave compiler internal-scratch headroom: 8 MiB on 64 MiB parts (v7x),
    # 16 MiB on 128 MiB parts (v5e/v6e).
    headroom = max(8 * 1024 * 1024, vmem_cap // 8)
    budget = vmem_cap - headroom

    single_buf_ok = _single_buffer_supported()
    const_bufs = 1 if single_buf_ok else 2     # bufs per constant-index operand

    # conv1->conv2 hand-off kept in f32 on big-VMEM parts for accuracy.
    h1_f32 = vmem_cap >= 100 * 1024 * 1024
    h1_bytes = 4 if h1_f32 else sb

    def fixed_vmem(tile, np_):
        return (2 * np_ * CW * sb                     # Chebyshev ring buffers
                + np_ * CW * 4                        # f32 accumulator
                + np_ * CW * h1_bytes                 # conv1->conv2 hand-off
                + GP * CW * 4                         # pooled accumulator
                + 2 * tile * CW * sb                  # streamed x tile
                + 2 * tile * GP * 4                   # streamed P^T tile
                + 2 * (CW * CW * sb + CW * 4)         # W_k / bias (2 bufs)
                + const_bufs * (CW * OW * 4 + OW * 4)  # fc weight / bias
                + 2 * GP * OW * 4)                    # output tile

    # ---- choose tile_n / residency (buffer-count aware) ------------------ #
    if tile_n is None:
        choice = None
        # Prefer the VMEM-resident operator with the largest row tile.
        for cand in (1024, 512, 256, 128):
            t = min(cand, _round_up(N, 128))
            np_ = _round_up(N, t)
            if const_bufs * np_ * np_ * sb + fixed_vmem(t, np_) <= budget:
                choice = (t, np_, True)
                break
        if choice is None:
            # Streamed row panels: size the panel so double-buffered DMA fits.
            for cand in (512, 256, 128):
                t = min(cand, _round_up(N, 128))
                np_ = _round_up(N, t)
                if 2 * t * np_ * sb + fixed_vmem(t, np_) <= budget:
                    choice = (t, np_, False)
                    break
        if choice is None:
            # TODO(synk): spill ring buffers to HBM for extremely large graphs.
            t = min(128, _round_up(N, 128))
            choice = (t, _round_up(N, t), False)
        tile_n, NP, l_resident = choice
    else:
        NP = _round_up(N, tile_n)
        l_resident = (const_bufs * NP * NP * sb
                      + fixed_vmem(tile_n, NP)) <= budget
    R = NP // tile_n

    # ---- padded operands (bf16 tensors, f32 biases / pooling / fc) ------- #
    x_p = jnp.zeros((NP, CW), sd).at[:N, :c_in].set(x.astype(sd))
    l_p = jnp.zeros((NP, NP), sd).at[:N, :N].set(l_hat.astype(sd))
    w_all = jnp.zeros((2, K, CW, CW), sd)
    w_all = w_all.at[0, :, :c_in, :hid].set(w1.astype(sd))
    w_all = w_all.at[1, :, :hid, :hid].set(w2.astype(sd))
    b_all = jnp.zeros((2, 1, CW), f32)
    b_all = b_all.at[0, 0, :hid].set(b1.astype(f32))
    b_all = b_all.at[1, 0, :hid].set(b2.astype(f32))
    # Pooling matrix stored transposed: P^T[node, graph] (zero for pad nodes).
    pt = jnp.zeros((NP, GP), f32).at[jnp.arange(N), batch].set(1.0)
    fcw_p = jnp.zeros((CW, OW), f32).at[:hid, :out_c].set(fc_w.astype(f32))
    fcb_p = jnp.zeros((1, OW), f32).at[0, :out_c].set(fc_b.astype(f32))

    def const_spec(shape, index_map):
        # Constant-index-map operand: one VMEM buffer when supported.
        if single_buf_ok:
            return pl.BlockSpec(shape, index_map,
                                pipeline_mode=pl.Buffered(1))
        return pl.BlockSpec(shape, index_map)

    if l_resident:
        l_spec = const_spec((NP, NP), lambda l, k, i: (0, 0))
        l_bytes = const_bufs * NP * NP * sb
    else:
        l_spec = pl.BlockSpec((tile_n, NP), lambda l, k, i: (i, 0))
        l_bytes = 2 * tile_n * NP * sb

    vmem_est = l_bytes + fixed_vmem(tile_n, NP)
    vmem_limit = int(min(budget,
                         max(32 * 1024 * 1024, vmem_est + 8 * 1024 * 1024)))

    kernel = _make_kernel(tile_n, l_resident)

    grid_spec = pltpu.PrefetchScalarGridSpec(
        num_scalar_prefetch=0,
        grid=(2, K, R),                    # (layer, cheb order, row tile)
        in_specs=[
            pl.BlockSpec((tile_n, CW), lambda l, k, i: (i, 0)),           # x
            l_spec,                                                       # L
            pl.BlockSpec((None, None, CW, CW),
                         lambda l, k, i: (l, k, 0, 0)),                   # W
            pl.BlockSpec((None, 1, CW), lambda l, k, i: (l, 0, 0)),       # b
            pl.BlockSpec((tile_n, GP), lambda l, k, i: (i, 0)),           # P^T
            const_spec((CW, OW), lambda l, k, i: (0, 0)),                 # fc W
            const_spec((1, OW), lambda l, k, i: (0, 0)),                  # fc b
        ],
        out_specs=pl.BlockSpec((GP, OW), lambda l, k, i: (0, 0)),
        scratch_shapes=[
            pltpu.VMEM((NP, CW), sd),                        # Cheb ring A
            pltpu.VMEM((NP, CW), sd),                        # Cheb ring B
            pltpu.VMEM((NP, CW), jnp.float32),               # f32 accumulator
            pltpu.VMEM((NP, CW), jnp.float32 if h1_f32 else sd),  # SELU(conv1)
            pltpu.VMEM((GP, CW), jnp.float32),               # pooled sum
        ],
    )

    out = pl.pallas_call(
        kernel,
        out_shape=jax.ShapeDtypeStruct((GP, OW), jnp.float32),
        grid_spec=grid_spec,
        compiler_params=pltpu.CompilerParams(
            # All axes carry sequential state (recurrence / accumulators).
            dimension_semantics=("arbitrary", "arbitrary", "arbitrary"),
            vmem_limit_bytes=vmem_limit,
        ),
    )(x_p, l_p, w_all, b_all, pt, fcw_p, fcb_p)

    return out[:G, :out_c]


# ----------------------------- f32 reference ------------------------------ #

def _cheb_conv_ref(x, l_hat, w, b):
    K = w.shape[0]
    t_prev = x
    out = t_prev @ w[0]
    t_cur = l_hat @ x
    if K > 1:
        out = out + t_cur @ w[1]
    for kk in range(2, K):
        t_next = 2.0 * (l_hat @ t_cur) - t_prev
        out = out + t_next @ w[kk]
        t_prev, t_cur = t_cur, t_next
    return out + b[None, :]


def _gcn_ref(x, l_hat, w1, b1, w2, b2, pool, fc_w, fc_b):
    h = _selu(_cheb_conv_ref(x, l_hat, w1, b1))   # AlphaDropout: identity
    h = _selu(_cheb_conv_ref(h, l_hat, w2, b2))   # AlphaDropout: identity
    return pool @ h @ fc_w + fc_b[None, :]


# --------------------------------- demo ----------------------------------- #

if __name__ == "__main__":
    key = jax.random.PRNGKey(0)
    N, C_IN, HID, OUT, K, G = 96, 8, 32, 4, 5, 2
    npg = N // G

    k_feat, k_adj, kw1, kb1, kw2, kb2, kwf, kbf = jax.random.split(key, 8)

    x = jax.random.normal(k_feat, (N, C_IN), jnp.float32)

    # Random undirected block-diagonal graph (G disjoint graphs) plus a ring
    # inside each graph so no node is isolated.
    a = (jax.random.uniform(k_adj, (N, N)) < 0.08).astype(jnp.float32)
    a = jnp.triu(a, 1)
    a = a + a.T
    block = jnp.zeros((N, N), jnp.float32)
    for g in range(G):
        s = g * npg
        block = block.at[s:s + npg, s:s + npg].set(1.0)
    a = a * block
    idx = jnp.arange(N)
    ring_to = (idx % npg + 1) % npg + (idx // npg) * npg
    a = a.at[idx, ring_to].set(1.0)
    a = a.at[ring_to, idx].set(1.0)
    a = a.at[idx, idx].set(0.0)

    deg = a.sum(axis=1)
    deg = jnp.where(deg > 0, deg, 1.0)
    # Dense ChebConv('rw', lambda_max=2) operator, [target, source], with the
    # PyG 'rw' (row / target-degree) normalization:
    #   L_hat[t, s] = -A[t, s] / deg[t]   ( == -(D^{-1} A) )
    l_hat = -(a / deg[:, None])

    batch = idx // npg                        # node -> graph id

    def glorot(kk, shape):
        lim = (6.0 / (shape[-2] + shape[-1])) ** 0.5
        return jax.random.uniform(kk, shape, jnp.float32, -lim, lim)

    w1 = glorot(kw1, (K, C_IN, HID))
    b1 = 0.1 * jax.random.normal(kb1, (HID,), jnp.float32)
    w2 = glorot(kw2, (K, HID, HID))
    b2 = 0.1 * jax.random.normal(kb2, (HID,), jnp.float32)
    fc_w = glorot(kwf, (HID, OUT))
    fc_b = 0.1 * jax.random.normal(kbf, (OUT,), jnp.float32)

    out = gcn_model_forward(x, l_hat, w1, b1, w2, b2, batch, G, fc_w, fc_b)
    out = jax.block_until_ready(out)

    # f32 reference (PyTorch eval-mode semantics).
    pool = jnp.zeros((G, N), jnp.float32).at[batch, jnp.arange(N)].set(1.0)
    ref = _gcn_ref(x, l_hat, w1, b1, w2, b2, pool, fc_w, fc_b)

    rel_err = float(jnp.max(jnp.abs(out - ref)) /
                    (jnp.max(jnp.abs(ref)) + 1e-6))
    if rel_err > 0.08:   # bf16 operand storage, f32 accumulation
        raise SystemExit(f"numerical mismatch: rel_err={rel_err:.4f}")
    print("KERNEL_OK")
</pallas_src>

<mosaic_0001>
module attributes {stable_mosaic.version = 11 : i64} {
  func.func @kernel(%arg0: i32, %arg1: i32, %arg2: i32, %arg3: memref<128x128xbf16, #tpu.memory_space<vmem>>, %arg4: memref<128x128xbf16, #tpu.memory_space<vmem>>, %arg5: memref<1x1x128x128xbf16, #tpu.memory_space<vmem>>, %arg6: memref<1x1x128xf32, #tpu.memory_space<vmem>>, %arg7: memref<128x8xf32, #tpu.memory_space<vmem>>, %arg8: memref<128x128xf32, #tpu.memory_space<vmem>>, %arg9: memref<1x128xf32, #tpu.memory_space<vmem>>, %arg10: memref<8x128xf32, #tpu.memory_space<vmem>>, %arg11: memref<128x128xbf16, #tpu.memory_space<vmem>>, %arg12: memref<128x128xbf16, #tpu.memory_space<vmem>>, %arg13: memref<128x128xf32, #tpu.memory_space<vmem>>, %arg14: memref<128x128xbf16, #tpu.memory_space<vmem>>, %arg15: memref<8x128xf32, #tpu.memory_space<vmem>>) attributes {dimension_semantics = [#tpu.dimension_semantics<arbitrary>, #tpu.dimension_semantics<arbitrary>, #tpu.dimension_semantics<arbitrary>], iteration_bounds = array<i64: 2, 5, 1>, scalar_prefetch = 0 : i64, scratch_operands = 5 : i64, tpu.core_type = #tpu.core_type<tc>, window_params = [{transform_indices = @transform_0, window_bounds = array<i64: 128, 128>}, {pipeline_mode = #tpu.pipeline_mode<synchronous>, transform_indices = @transform_1, window_bounds = array<i64: 128, 128>}, {transform_indices = @transform_2, window_bounds = array<i64: 1, 1, 128, 128>}, {transform_indices = @transform_3, window_bounds = array<i64: 1, 1, 128>}, {transform_indices = @transform_4, window_bounds = array<i64: 128, 8>}, {pipeline_mode = #tpu.pipeline_mode<synchronous>, transform_indices = @transform_5, window_bounds = array<i64: 128, 128>}, {pipeline_mode = #tpu.pipeline_mode<synchronous>, transform_indices = @transform_6, window_bounds = array<i64: 1, 128>}, {pipeline_mode = #tpu.pipeline_mode<synchronous>, transform_indices = @transform_7, window_bounds = array<i64: 8, 128>}]} {
    %c128_i32 = arith.constant 128 : i32
    %0 = arith.muli %arg2, %c128_i32 : i32
    %1 = tpu.assume_multiple %0, 128 : i32
    %c0_i32 = arith.constant 0 : i32
    %2 = arith.cmpi eq, %arg0, %c0_i32 : i32
    %c0_i32_0 = arith.constant 0 : i32
    %3 = arith.cmpi eq, %arg1, %c0_i32_0 : i32
    %c0_i32_1 = arith.constant 0 : i32
    %4 = arith.cmpi eq, %arg2, %c0_i32_1 : i32
    %5 = arith.andi %3, %4 : i1
    %6 = arith.andi %2, %5 : i1
    %7 = arith.extui %6 : i1 to i32
    %c0_i32_2 = arith.constant 0 : i32
    %8 = arith.cmpi ne, %7, %c0_i32_2 : i32
    scf.if %8 {
      %cst = arith.constant 0.000000e+00 : f32
      %42 = vector.broadcast %cst : f32 to vector<8x128xf32>
      %c0_17 = arith.constant 0 : index
      %c0_18 = arith.constant 0 : index
      %43 = vector.load %arg15[%c0_17, %c0_18] : memref<8x128xf32, #tpu.memory_space<vmem>>, vector<8x128xf32>
      tpu.vector_store %arg15[%c0_17, %c0_18], %42 {strides = array<i32>} : memref<8x128xf32, #tpu.memory_space<vmem>>, vector<8x128xf32>,
      %cst_19 = arith.constant 0.000000e+00 : f32
      %44 = vector.broadcast %cst_19 : f32 to vector<8x128xf32>
      %c0_20 = arith.constant 0 : index
      %c0_21 = arith.constant 0 : index
      %45 = vector.load %arg10[%c0_20, %c0_21] : memref<8x128xf32, #tpu.memory_space<vmem>>, vector<8x128xf32>
      tpu.vector_store %arg10[%c0_20, %c0_21], %44 {strides = array<i32>} : memref<8x128xf32, #tpu.memory_space<vmem>>, vector<8x128xf32>,
    } else {
    }
    %9 = arith.index_cast %1 : i32 to index
    %c0 = arith.constant 0 : index
    %10 = vector.load %arg4[%9, %c0] : memref<128x128xbf16, #tpu.memory_space<vmem>>, vector<128x128xbf16>
    %c2_i32 = arith.constant 2 : i32
    %c0_i32_3 = arith.constant 0 : i32
    %11 = arith.cmpi eq, %c2_i32, %c0_i32_3 : i32
    %c1_i32 = arith.constant 1 : i32
    %12 = arith.select %11, %c1_i32, %c2_i32 : i32
    %13 = arith.remsi %arg1, %12 : i32
    %c0_i32_4 = arith.constant 0 : i32
    %14 = arith.cmpi ne, %13, %c0_i32_4 : i32
    %c0_i32_5 = arith.constant 0 : i32
    %15 = arith.cmpi slt, %13, %c0_i32_5 : i32
    %c0_i32_6 = arith.constant 0 : i32
    %16 = arith.cmpi slt, %12, %c0_i32_6 : i32
    %17 = arith.xori %15, %16 : i1
    %18 = arith.andi %17, %14 : i1
    %19 = arith.addi %13, %12 : i32
    %20 = arith.select %18, %19, %13 : i32
    %c0_i32_7 = arith.constant 0 : i32
    %21 = arith.cmpi eq, %20, %c0_i32_7 : i32
    %22 = arith.extui %21 : i1 to i32
    %c0_i32_8 = arith.constant 0 : i32
    %23 = arith.cmpi ne, %22, %c0_i32_8 : i32
    scf.if %23 {
      %c0_i32_17 = arith.constant 0 : i32
      %42 = arith.cmpi eq, %arg1, %c0_i32_17 : i32
      %43 = arith.extui %42 : i1 to i32
      %c0_i32_18 = arith.constant 0 : i32
      %44 = arith.cmpi ne, %43, %c0_i32_18 : i32
      scf.if %44 {
        %c0_i32_32 = arith.constant 0 : i32
        %62 = arith.cmpi eq, %arg0, %c0_i32_32 : i32
        %63 = arith.extui %62 : i1 to i32
        %c0_i32_33 = arith.constant 0 : i32
        %64 = arith.cmpi ne, %63, %c0_i32_33 : i32
        scf.if %64 {
          %c0_36 = arith.constant 0 : index
          %c0_37 = arith.constant 0 : index
          %68 = vector.load %arg3[%c0_36, %c0_37] : memref<128x128xbf16, #tpu.memory_space<vmem>>, vector<128x128xbf16>
          %69 = arith.index_cast %1 : i32 to index
          %c0_38 = arith.constant 0 : index
          %70 = vector.load %arg11[%69, %c0_38] : memref<128x128xbf16, #tpu.memory_space<vmem>>, vector<128x128xbf16>
          tpu.vector_store %arg11[%69, %c0_38], %68 {strides = array<i32>} : memref<128x128xbf16, #tpu.memory_space<vmem>>, vector<128x128xbf16>,
        } else {
        }
        %c1_i32_34 = arith.constant 1 : i32
        %65 = arith.cmpi eq, %arg0, %c1_i32_34 : i32
        %66 = arith.extui %65 : i1 to i32
        %c0_i32_35 = arith.constant 0 : i32
        %67 = arith.cmpi ne, %66, %c0_i32_35 : i32
        scf.if %67 {
          %68 = arith.index_cast %1 : i32 to index
          %c0_36 = arith.constant 0 : index
          %69 = vector.load %arg14[%68, %c0_36] : memref<128x128xbf16, #tpu.memory_space<vmem>>, vector<128x128xbf16>
          %70 = arith.index_cast %1 : i32 to index
          %c0_37 = arith.constant 0 : index
          %71 = vector.load %arg11[%70, %c0_37] : memref<128x128xbf16, #tpu.memory_space<vmem>>, vector<128x128xbf16>
          tpu.vector_store %arg11[%70, %c0_37], %69 {strides = array<i32>} : memref<128x128xbf16, #tpu.memory_space<vmem>>, vector<128x128xbf16>,
        } else {
        }
      } else {
      }
      %c1_i32_19 = arith.constant 1 : i32
      %45 = arith.cmpi eq, %arg1, %c1_i32_19 : i32
      %46 = arith.extui %45 : i1 to i32
      %c0_i32_20 = arith.constant 0 : i32
      %47 = arith.cmpi ne, %46, %c0_i32_20 : i32
      scf.if %47 {
        %c0_32 = arith.constant 0 : index
        %c0_33 = arith.constant 0 : index
        %62 = vector.load %arg12[%c0_32, %c0_33] : memref<128x128xbf16, #tpu.memory_space<vmem>>, vector<128x128xbf16>
        %cst_34 = arith.constant dense<0.000000e+00> : vector<128x128xf32>
        %63 = tpu.matmul %10, %62, %cst_34 {dimension_numbers = #tpu.dot_dimension_numbers<[1], [0], [0], [1], [0, 0, 1, 1], [], []>} : vector<128x128xbf16>, vector<128x128xbf16>, vector<128x128xf32> -> vector<128x128xf32>
        %64 = arith.truncf %63 : vector<128x128xf32> to vector<128x128xbf16>
        %65 = arith.index_cast %1 : i32 to index
        %c0_35 = arith.constant 0 : index
        %66 = vector.load %arg11[%65, %c0_35] : memref<128x128xbf16, #tpu.memory_space<vmem>>, vector<128x128xbf16>
        tpu.vector_store %arg11[%65, %c0_35], %64 {strides = array<i32>} : memref<128x128xbf16, #tpu.memory_space<vmem>>, vector<128x128xbf16>,
      } else {
      }
      %c2_i32_21 = arith.constant 2 : i32
      %48 = arith.cmpi sge, %arg1, %c2_i32_21 : i32
      %49 = arith.extui %48 : i1 to i32
      %c0_i32_22 = arith.constant 0 : i32
      %50 = arith.cmpi ne, %49, %c0_i32_22 : i32
      scf.if %50 {
        %62 = arith.index_cast %1 : i32 to index
        %c0_32 = arith.constant 0 : index
        %63 = vector.load %arg11[%62, %c0_32] : memref<128x128xbf16, #tpu.memory_space<vmem>>, vector<128x128xbf16>
        %64 = arith.extf %63 : vector<128x128xbf16> to vector<128x128xf32>
        %c0_33 = arith.constant 0 : index
        %c0_34 = arith.constant 0 : index
        %65 = vector.load %arg12[%c0_33, %c0_34] : memref<128x128xbf16, #tpu.memory_space<vmem>>, vector<128x128xbf16>
        %cst_35 = arith.constant dense<0.000000e+00> : vector<128x128xf32>
        %66 = tpu.matmul %10, %65, %cst_35 {dimension_numbers = #tpu.dot_dimension_numbers<[1], [0], [0], [1], [0, 0, 1, 1], [], []>} : vector<128x128xbf16>, vector<128x128xbf16>, vector<128x128xf32> -> vector<128x128xf32>
        %cst_36 = arith.constant 2.000000e+00 : f32
        %67 = vector.broadcast %cst_36 : f32 to vector<128x128xf32>
        %68 = arith.mulf %67, %66 : vector<128x128xf32>
        %69 = arith.subf %68, %64 : vector<128x128xf32>
        %70 = arith.truncf %69 : vector<128x128xf32> to vector<128x128xbf16>
        %71 = arith.index_cast %1 : i32 to index
        %c0_37 = arith.constant 0 : index
        %72 = vector.load %arg11[%71, %c0_37] : memref<128x128xbf16, #tpu.memory_space<vmem>>, vector<128x128xbf16>
        tpu.vector_store %arg11[%71, %c0_37], %70 {strides = array<i32>} : memref<128x128xbf16, #tpu.memory_space<vmem>>, vector<128x128xbf16>,
      } else {
      }
      %51 = arith.index_cast %1 : i32 to index
      %c0_23 = arith.constant 0 : index
      %52 = vector.load %arg11[%51, %c0_23] : memref<128x128xbf16, #tpu.memory_space<vmem>>, vector<128x128xbf16>
      %c0_24 = arith.constant 0 : index
      %c0_25 = arith.constant 0 : index
      %c0_26 = arith.constant 0 : index
      %c0_27 = arith.constant 0 : index
      %53 = vector.load %arg5[%c0_24, %c0_25, %c0_26, %c0_27] : memref<1x1x128x128xbf16, #tpu.memory_space<vmem>>, vector<1x1x128x128xbf16>
      %54 = vector.shape_cast %53 : vector<1x1x128x128xbf16> to vector<128x128xbf16>
      %cst = arith.constant dense<0.000000e+00> : vector<128x128xf32>
      %55 = tpu.matmul %52, %54, %cst {dimension_numbers = #tpu.dot_dimension_numbers<[1], [0], [0], [1], [0, 0, 1, 1], [], []>} : vector<128x128xbf16>, vector<128x128xbf16>, vector<128x128xf32> -> vector<128x128xf32>
      %c0_i32_28 = arith.constant 0 : i32
      %56 = arith.cmpi eq, %arg1, %c0_i32_28 : i32
      %57 = arith.extui %56 : i1 to i32
      %c0_i32_29 = arith.constant 0 : i32
      %58 = arith.cmpi ne, %57, %c0_i32_29 : i32
      scf.if %58 {
        %c0_32 = arith.constant 0 : index
        %c0_33 = arith.constant 0 : index
        %c0_34 = arith.constant 0 : index
        %62 = vector.load %arg6[%c0_32, %c0_33, %c0_34] : memref<1x1x128xf32, #tpu.memory_space<vmem>>, vector<1x1x128xf32>
        %63 = vector.shape_cast %62 : vector<1x1x128xf32> to vector<1x128xf32>
        %64 = vector.broadcast %63 : vector<1x128xf32> to vector<128x128xf32>
        %65 = arith.addf %55, %64 : vector<128x128xf32>
        %66 = arith.index_cast %1 : i32 to index
        %c0_35 = arith.constant 0 : index
        %67 = vector.load %arg13[%66, %c0_35] : memref<128x128xf32, #tpu.memory_space<vmem>>, vector<128x128xf32>
        tpu.vector_store %arg13[%66, %c0_35], %65 {strides = array<i32>} : memref<128x128xf32, #tpu.memory_space<vmem>>, vector<128x128xf32>,
      } else {
      }
      %c0_i32_30 = arith.constant 0 : i32
      %59 = arith.cmpi sgt, %arg1, %c0_i32_30 : i32
      %60 = arith.extui %59 : i1 to i32
      %c0_i32_31 = arith.constant 0 : i32
      %61 = arith.cmpi ne, %60, %c0_i32_31 : i32
      scf.if %61 {
        %62 = arith.index_cast %1 : i32 to index
        %c0_32 = arith.constant 0 : index
        %63 = vector.load %arg13[%62, %c0_32] : memref<128x128xf32, #tpu.memory_space<vmem>>, vector<128x128xf32>
        %64 = arith.addf %63, %55 : vector<128x128xf32>
        %65 = arith.index_cast %1 : i32 to index
        %c0_33 = arith.constant 0 : index
        %66 = vector.load %arg13[%65, %c0_33] : memref<128x128xf32, #tpu.memory_space<vmem>>, vector<128x128xf32>
        tpu.vector_store %arg13[%65, %c0_33], %64 {strides = array<i32>} : memref<128x128xf32, #tpu.memory_space<vmem>>, vector<128x128xf32>,
      } else {
      }
    } else {
    }
    %true = arith.constant true
    %24 = arith.xori %21, %true : i1
    %25 = arith.extui %24 : i1 to i32
    %c0_i32_9 = arith.constant 0 : i32
    %26 = arith.cmpi ne, %25, %c0_i32_9 : i32
    scf.if %26 {
      %c0_i32_17 = arith.constant 0 : i32
      %42 = arith.cmpi eq, %arg1, %c0_i32_17 : i32
      %43 = arith.extui %42 : i1 to i32
      %c0_i32_18 = arith.constant 0 : i32
      %44 = arith.cmpi ne, %43, %c0_i32_18 : i32
      scf.if %44 {
        %c0_i32_32 = arith.constant 0 : i32
        %62 = arith.cmpi eq, %arg0, %c0_i32_32 : i32
        %63 = arith.extui %62 : i1 to i32
        %c0_i32_33 = arith.constant 0 : i32
        %64 = arith.cmpi ne, %63, %c0_i32_33 : i32
        scf.if %64 {
          %c0_36 = arith.constant 0 : index
          %c0_37 = arith.constant 0 : index
          %68 = vector.load %arg3[%c0_36, %c0_37] : memref<128x128xbf16, #tpu.memory_space<vmem>>, vector<128x128xbf16>
          %69 = arith.index_cast %1 : i32 to index
          %c0_38 = arith.constant 0 : index
          %70 = vector.load %arg12[%69, %c0_38] : memref<128x128xbf16, #tpu.memory_space<vmem>>, vector<128x128xbf16>
          tpu.vector_store %arg12[%69, %c0_38], %68 {strides = array<i32>} : memref<128x128xbf16, #tpu.memory_space<vmem>>, vector<128x128xbf16>,
        } else {
        }
        %c1_i32_34 = arith.constant 1 : i32
        %65 = arith.cmpi eq, %arg0, %c1_i32_34 : i32
        %66 = arith.extui %65 : i1 to i32
        %c0_i32_35 = arith.constant 0 : i32
        %67 = arith.cmpi ne, %66, %c0_i32_35 : i32
        scf.if %67 {
          %68 = arith.index_cast %1 : i32 to index
          %c0_36 = arith.constant 0 : index
          %69 = vector.load %arg14[%68, %c0_36] : memref<128x128xbf16, #tpu.memory_space<vmem>>, vector<128x128xbf16>
          %70 = arith.index_cast %1 : i32 to index
          %c0_37 = arith.constant 0 : index
          %71 = vector.load %arg12[%70, %c0_37] : memref<128x128xbf16, #tpu.memory_space<vmem>>, vector<128x128xbf16>
          tpu.vector_store %arg12[%70, %c0_37], %69 {strides = array<i32>} : memref<128x128xbf16, #tpu.memory_space<vmem>>, vector<128x128xbf16>,
        } else {
        }
      } else {
      }
      %c1_i32_19 = arith.constant 1 : i32
      %45 = arith.cmpi eq, %arg1, %c1_i32_19 : i32
      %46 = arith.extui %45 : i1 to i32
      %c0_i32_20 = arith.constant 0 : i32
      %47 = arith.cmpi ne, %46, %c0_i32_20 : i32
      scf.if %47 {
        %c0_32 = arith.constant 0 : index
        %c0_33 = arith.constant 0 : index
        %62 = vector.load %arg11[%c0_32, %c0_33] : memref<128x128xbf16, #tpu.memory_space<vmem>>, vector<128x128xbf16>
        %cst_34 = arith.constant dense<0.000000e+00> : vector<128x128xf32>
        %63 = tpu.matmul %10, %62, %cst_34 {dimension_numbers = #tpu.dot_dimension_numbers<[1], [0], [0], [1], [0, 0, 1, 1], [], []>} : vector<128x128xbf16>, vector<128x128xbf16>, vector<128x128xf32> -> vector<128x128xf32>
        %64 = arith.truncf %63 : vector<128x128xf32> to vector<128x128xbf16>
        %65 = arith.index_cast %1 : i32 to index
        %c0_35 = arith.constant 0 : index
        %66 = vector.load %arg12[%65, %c0_35] : memref<128x128xbf16, #tpu.memory_space<vmem>>, vector<128x128xbf16>
        tpu.vector_store %arg12[%65, %c0_35], %64 {strides = array<i32>} : memref<128x128xbf16, #tpu.memory_space<vmem>>, vector<128x128xbf16>,
      } else {
      }
      %c2_i32_21 = arith.constant 2 : i32
      %48 = arith.cmpi sge, %arg1, %c2_i32_21 : i32
      %49 = arith.extui %48 : i1 to i32
      %c0_i32_22 = arith.constant 0 : i32
      %50 = arith.cmpi ne, %49, %c0_i32_22 : i32
      scf.if %50 {
        %62 = arith.index_cast %1 : i32 to index
        %c0_32 = arith.constant 0 : index
        %63 = vector.load %arg12[%62, %c0_32] : memref<128x128xbf16, #tpu.memory_space<vmem>>, vector<128x128xbf16>
        %64 = arith.extf %63 : vector<128x128xbf16> to vector<128x128xf32>
        %c0_33 = arith.constant 0 : index
        %c0_34 = arith.constant 0 : index
        %65 = vector.load %arg11[%c0_33, %c0_34] : memref<128x128xbf16, #tpu.memory_space<vmem>>, vector<128x128xbf16>
        %cst_35 = arith.constant dense<0.000000e+00> : vector<128x128xf32>
        %66 = tpu.matmul %10, %65, %cst_35 {dimension_numbers = #tpu.dot_dimension_numbers<[1], [0], [0], [1], [0, 0, 1, 1], [], []>} : vector<128x128xbf16>, vector<128x128xbf16>, vector<128x128xf32> -> vector<128x128xf32>
        %cst_36 = arith.constant 2.000000e+00 : f32
        %67 = vector.broadcast %cst_36 : f32 to vector<128x128xf32>
        %68 = arith.mulf %67, %66 : vector<128x128xf32>
        %69 = arith.subf %68, %64 : vector<128x128xf32>
        %70 = arith.truncf %69 : vector<128x128xf32> to vector<128x128xbf16>
        %71 = arith.index_cast %1 : i32 to index
        %c0_37 = arith.constant 0 : index
        %72 = vector.load %arg12[%71, %c0_37] : memref<128x128xbf16, #tpu.memory_space<vmem>>, vector<128x128xbf16>
        tpu.vector_store %arg12[%71, %c0_37], %70 {strides = array<i32>} : memref<128x128xbf16, #tpu.memory_space<vmem>>, vector<128x128xbf16>,
      } else {
      }
      %51 = arith.index_cast %1 : i32 to index
      %c0_23 = arith.constant 0 : index
      %52 = vector.load %arg12[%51, %c0_23] : memref<128x128xbf16, #tpu.memory_space<vmem>>, vector<128x128xbf16>
      %c0_24 = arith.constant 0 : index
      %c0_25 = arith.constant 0 : index
      %c0_26 = arith.constant 0 : index
      %c0_27 = arith.constant 0 : index
      %53 = vector.load %arg5[%c0_24, %c0_25, %c0_26, %c0_27] : memref<1x1x128x128xbf16, #tpu.memory_space<vmem>>, vector<1x1x128x128xbf16>
      %54 = vector.shape_cast %53 : vector<1x1x128x128xbf16> to vector<128x128xbf16>
      %cst = arith.constant dense<0.000000e+00> : vector<128x128xf32>
      %55 = tpu.matmul %52, %54, %cst {dimension_numbers = #tpu.dot_dimension_numbers<[1], [0], [0], [1], [0, 0, 1, 1], [], []>} : vector<128x128xbf16>, vector<128x128xbf16>, vector<128x128xf32> -> vector<128x128xf32>
      %c0_i32_28 = arith.constant 0 : i32
      %56 = arith.cmpi eq, %arg1, %c0_i32_28 : i32
      %57 = arith.extui %56 : i1 to i32
      %c0_i32_29 = arith.constant 0 : i32
      %58 = arith.cmpi ne, %57, %c0_i32_29 : i32
      scf.if %58 {
        %c0_32 = arith.constant 0 : index
        %c0_33 = arith.constant 0 : index
        %c0_34 = arith.constant 0 : index
        %62 = vector.load %arg6[%c0_32, %c0_33, %c0_34] : memref<1x1x128xf32, #tpu.memory_space<vmem>>, vector<1x1x128xf32>
        %63 = vector.shape_cast %62 : vector<1x1x128xf32> to vector<1x128xf32>
        %64 = vector.broadcast %63 : vector<1x128xf32> to vector<128x128xf32>
        %65 = arith.addf %55, %64 : vector<128x128xf32>
        %66 = arith.index_cast %1 : i32 to index
        %c0_35 = arith.constant 0 : index
        %67 = vector.load %arg13[%66, %c0_35] : memref<128x128xf32, #tpu.memory_space<vmem>>, vector<128x128xf32>
        tpu.vector_store %arg13[%66, %c0_35], %65 {strides = array<i32>} : memref<128x128xf32, #tpu.memory_space<vmem>>, vector<128x128xf32>,
      } else {
      }
      %c0_i32_30 = arith.constant 0 : i32
      %59 = arith.cmpi sgt, %arg1, %c0_i32_30 : i32
      %60 = arith.extui %59 : i1 to i32
      %c0_i32_31 = arith.constant 0 : i32
      %61 = arith.cmpi ne, %60, %c0_i32_31 : i32
      scf.if %61 {
        %62 = arith.index_cast %1 : i32 to index
        %c0_32 = arith.constant 0 : index
        %63 = vector.load %arg13[%62, %c0_32] : memref<128x128xf32, #tpu.memory_space<vmem>>, vector<128x128xf32>
        %64 = arith.addf %63, %55 : vector<128x128xf32>
        %65 = arith.index_cast %1 : i32 to index
        %c0_33 = arith.constant 0 : index
        %66 = vector.load %arg13[%65, %c0_33] : memref<128x128xf32, #tpu.memory_space<vmem>>, vector<128x128xf32>
        tpu.vector_store %arg13[%65, %c0_33], %64 {strides = array<i32>} : memref<128x128xf32, #tpu.memory_space<vmem>>, vector<128x128xf32>,
      } else {
      }
    } else {
    }
    %c4_i32 = arith.constant 4 : i32
    %27 = arith.cmpi eq, %arg1, %c4_i32 : i32
    %c0_i32_10 = arith.constant 0 : i32
    %28 = arith.cmpi eq, %arg0, %c0_i32_10 : i32
    %29 = arith.andi %27, %28 : i1
    %30 = arith.extui %29 : i1 to i32
    %c0_i32_11 = arith.constant 0 : i32
    %31 = arith.cmpi ne, %30, %c0_i32_11 : i32
    scf.if %31 {
      %42 = arith.index_cast %1 : i32 to index
      %c0_17 = arith.constant 0 : index
      %43 = vector.load %arg13[%42, %c0_17] : memref<128x128xf32, #tpu.memory_space<vmem>>, vector<128x128xf32>
      %cst = arith.constant 0.000000e+00 : f32
      %44 = vector.broadcast %cst : f32 to vector<128x128xf32>
      %45 = arith.cmpf ogt, %43, %44 : vector<128x128xf32>
      %cst_18 = arith.constant 0.000000e+00 : f32
      %46 = vector.broadcast %cst_18 : f32 to vector<128x128xf32>
      %47 = arith.minimumf %43, %46 : vector<128x128xf32>
      %48 = math.exp %47 : vector<128x128xf32>
      %cst_19 = arith.constant 1.000000e+00 : f32
      %49 = vector.broadcast %cst_19 : f32 to vector<128x128xf32>
      %50 = arith.subf %48, %49 : vector<128x128xf32>
      %cst_20 = arith.constant 1.67326319 : f32
      %51 = vector.broadcast %cst_20 : f32 to vector<128x128xf32>
      %52 = arith.mulf %51, %50 : vector<128x128xf32>
      %53 = arith.select %45, %43, %52 : vector<128x128xi1>, vector<128x128xf32>
      %cst_21 = arith.constant 1.05070102 : f32
      %54 = vector.broadcast %cst_21 : f32 to vector<128x128xf32>
      %55 = arith.mulf %54, %53 : vector<128x128xf32>
      %56 = arith.truncf %55 : vector<128x128xf32> to vector<128x128xbf16>
      %57 = arith.index_cast %1 : i32 to index
      %c0_22 = arith.constant 0 : index
      %58 = vector.load %arg14[%57, %c0_22] : memref<128x128xbf16, #tpu.memory_space<vmem>>, vector<128x128xbf16>
      tpu.vector_store %arg14[%57, %c0_22], %56 {strides = array<i32>} : memref<128x128xbf16, #tpu.memory_space<vmem>>, vector<128x128xbf16>,
    } else {
    }
    %c1_i32_12 = arith.constant 1 : i32
    %32 = arith.cmpi eq, %arg0, %c1_i32_12 : i32
    %33 = arith.andi %27, %32 : i1
    %34 = arith.extui %33 : i1 to i32
    %c0_i32_13 = arith.constant 0 : i32
    %35 = arith.cmpi ne, %34, %c0_i32_13 : i32
    scf.if %35 {
      %42 = arith.index_cast %1 : i32 to index
      %c0_17 = arith.constant 0 : index
      %43 = vector.load %arg13[%42, %c0_17] : memref<128x128xf32, #tpu.memory_space<vmem>>, vector<128x128xf32>
      %cst = arith.constant 0.000000e+00 : f32
      %44 = vector.broadcast %cst : f32 to vector<128x128xf32>
      %45 = arith.cmpf ogt, %43, %44 : vector<128x128xf32>
      %cst_18 = arith.constant 0.000000e+00 : f32
      %46 = vector.broadcast %cst_18 : f32 to vector<128x128xf32>
      %47 = arith.minimumf %43, %46 : vector<128x128xf32>
      %48 = math.exp %47 : vector<128x128xf32>
      %cst_19 = arith.constant 1.000000e+00 : f32
      %49 = vector.broadcast %cst_19 : f32 to vector<128x128xf32>
      %50 = arith.subf %48, %49 : vector<128x128xf32>
      %cst_20 = arith.constant 1.67326319 : f32
      %51 = vector.broadcast %cst_20 : f32 to vector<128x128xf32>
      %52 = arith.mulf %51, %50 : vector<128x128xf32>
      %53 = arith.select %45, %43, %52 : vector<128x128xi1>, vector<128x128xf32>
      %cst_21 = arith.constant 1.05070102 : f32
      %54 = vector.broadcast %cst_21 : f32 to vector<128x128xf32>
      %55 = arith.mulf %54, %53 : vector<128x128xf32>
      %c0_22 = arith.constant 0 : index
      %c0_23 = arith.constant 0 : index
      %56 = vector.load %arg7[%c0_22, %c0_23] : memref<128x8xf32, #tpu.memory_space<vmem>>, vector<128x8xf32>
      %c0_24 = arith.constant 0 : index
      %c0_25 = arith.constant 0 : index
      %57 = vector.load %arg15[%c0_24, %c0_25] : memref<8x128xf32, #tpu.memory_space<vmem>>, vector<8x128xf32>
      %cst_26 = arith.constant dense<0.000000e+00> : vector<8x128xf32>
      %58 = tpu.matmul %56, %55, %cst_26 {dimension_numbers = #tpu.dot_dimension_numbers<[0], [0], [1], [1], [0, 1, 1, 1], [], []>} : vector<128x8xf32>, vector<128x128xf32>, vector<8x128xf32> -> vector<8x128xf32>
      %59 = arith.addf %57, %58 : vector<8x128xf32>
      %c0_27 = arith.constant 0 : index
      %c0_28 = arith.constant 0 : index
      %60 = vector.load %arg15[%c0_27, %c0_28] : memref<8x128xf32, #tpu.memory_space<vmem>>, vector<8x128xf32>
      tpu.vector_store %arg15[%c0_27, %c0_28], %59 {strides = array<i32>} : memref<8x128xf32, #tpu.memory_space<vmem>>, vector<8x128xf32>,
    } else {
    }
    %c1_i32_14 = arith.constant 1 : i32
    %36 = arith.cmpi eq, %arg0, %c1_i32_14 : i32
    %37 = arith.andi %36, %27 : i1
    %c0_i32_15 = arith.constant 0 : i32
    %38 = arith.cmpi eq, %arg2, %c0_i32_15 : i32
    %39 = arith.andi %37, %38 : i1
    %40 = arith.extui %39 : i1 to i32
    %c0_i32_16 = arith.constant 0 : i32
    %41 = arith.cmpi ne, %40, %c0_i32_16 : i32
    scf.if %41 {
      %c0_17 = arith.constant 0 : index
      %c0_18 = arith.constant 0 : index
      %42 = vector.load %arg15[%c0_17, %c0_18] : memref<8x128xf32, #tpu.memory_space<vmem>>, vector<8x128xf32>
      %c0_19 = arith.constant 0 : index
      %c0_20 = arith.constant 0 : index
      %43 = vector.load %arg8[%c0_19, %c0_20] : memref<128x128xf32, #tpu.memory_space<vmem>>, vector<128x128xf32>
      %cst = arith.constant dense<0.000000e+00> : vector<8x128xf32>
      %44 = tpu.matmul %42, %43, %cst {dimension_numbers = #tpu.dot_dimension_numbers<[1], [0], [0], [1], [0, 0, 1, 1], [], []>} : vector<8x128xf32>, vector<128x128xf32>, vector<8x128xf32> -> vector<8x128xf32>
      %c0_21 = arith.constant 0 : index
      %c0_22 = arith.constant 0 : index
      %45 = vector.load %arg9[%c0_21, %c0_22] : memref<1x128xf32, #tpu.memory_space<vmem>>, vector<1x128xf32>
      %46 = vector.broadcast %45 : vector<1x128xf32> to vector<8x128xf32>
      %47 = arith.addf %44, %46 : vector<8x128xf32>
      %c0_23 = arith.constant 0 : index
      %c0_24 = arith.constant 0 : index
      %48 = vector.load %arg10[%c0_23, %c0_24] : memref<8x128xf32, #tpu.memory_space<vmem>>, vector<8x128xf32>
      tpu.vector_store %arg10[%c0_23, %c0_24], %47 {strides = array<i32>} : memref<8x128xf32, #tpu.memory_space<vmem>>, vector<8x128xf32>,
    } else {
    }
    return
  }
  func.func @transform_0(%arg0: i32, %arg1: i32, %arg2: i32) -> (i32, i32) {
    %c0_i32 = arith.constant 0 : i32
    %c0_i32_0 = arith.constant 0 : i32
    return %arg2, %c0_i32 : i32, i32
  }
  func.func @transform_1(%arg0: i32, %arg1: i32, %arg2: i32) -> (i32, i32) {
    %c0_i32 = arith.constant 0 : i32
    %c0_i32_0 = arith.constant 0 : i32
    %c0_i32_1 = arith.constant 0 : i32
    return %c0_i32, %c0_i32_0 : i32, i32
  }
  func.func @transform_2(%arg0: i32, %arg1: i32, %arg2: i32) -> (i32, i32, i32, i32) {
    %c0_i32 = arith.constant 0 : i32
    %c0_i32_0 = arith.constant 0 : i32
    %c0_i32_1 = arith.constant 0 : i32
    return %arg0, %arg1, %c0_i32, %c0_i32_0 : i32, i32, i32, i32
  }
  func.func @transform_3(%arg0: i32, %arg1: i32, %arg2: i32) -> (i32, i32, i32) {
    %c0_i32 = arith.constant 0 : i32
    %c0_i32_0 = arith.constant 0 : i32
    %c0_i32_1 = arith.constant 0 : i32
    return %arg0, %c0_i32, %c0_i32_0 : i32, i32, i32
  }
  func.func @transform_4(%arg0: i32, %arg1: i32, %arg2: i32) -> (i32, i32) {
    %c0_i32 = arith.constant 0 : i32
    %c0_i32_0 = arith.constant 0 : i32
    return %arg2, %c0_i32 : i32, i32
  }
  func.func @transform_5(%arg0: i32, %arg1: i32, %arg2: i32) -> (i32, i32) {
    %c0_i32 = arith.constant 0 : i32
    %c0_i32_0 = arith.constant 0 : i32
    %c0_i32_1 = arith.constant 0 : i32
    return %c0_i32, %c0_i32_0 : i32, i32
  }
  func.func @transform_6(%arg0: i32, %arg1: i32, %arg2: i32) -> (i32, i32) {
    %c0_i32 = arith.constant 0 : i32
    %c0_i32_0 = arith.constant 0 : i32
    %c0_i32_1 = arith.constant 0 : i32
    return %c0_i32, %c0_i32_0 : i32, i32
  }
  func.func @transform_7(%arg0: i32, %arg1: i32, %arg2: i32) -> (i32, i32) {
    %c0_i32 = arith.constant 0 : i32
    %c0_i32_0 = arith.constant 0 : i32
    %c0_i32_1 = arith.constant 0 : i32
    return %c0_i32, %c0_i32_0 : i32, i32
  }
}

</mosaic_0001>

<bundles_post_ra>
// kernel: tpu_custom_call.1
= control target key start
LH: loop header
LB: loop body
LE: loop exit
PB: predicated region body
PF: predicated region fallthrough
CT: control target
= control target key end

     0   :  { %s4643_s0 = inlined_call_operand.hbm [shape: bf16[128,128], index: 0, kind: input, shape index: {}]   ;;  %s4644_s1 = inlined_call_operand.hbm [shape: bf16[128,128], index: 1, kind: input, shape index: {}]   ;;  %s4645_s2 = inlined_call_operand.hbm [shape: bf16[2,5,128,128], index: 2, kind: input, shape index: {}]   ;;  %s4646_s3 = inlined_call_operand.vmem [shape: f32[2,1,128], index: 3, kind: input, shape index: {}]   ;;  %s4647_s4 = inlined_call_operand.vmem [shape: f32[128,8], index: 4, kind: input, shape index: {}]   ;;  %s4648_s5 = inlined_call_operand.vmem [shape: f32[128,128], index: 5, kind: input, shape index: {}]   ;;  %s4649_s6 = inlined_call_operand.vmem [shape: f32[1,128], index: 6, kind: input, shape index: {}]   ;;  %s4650_s7 = inlined_call_operand.hbm [shape: f32[8,128], index: 7, kind: output, shape index: {}]  }
   0x1   :  { %4658 = sst [smem:[#allocation20_spill]] %s4643_s0 }
   0x2   :  { %4659 = sst [smem:[#allocation21_spill]] %s4644_s1 }
   0x3   :  { %4660 = sst [smem:[#allocation22_spill]] %s4649_s6 }
   0x4   :  { %4661 = sst [smem:[#allocation23_spill]] %s4650_s7 }
   0x5   :  { %12 = vsyncpa [#allocation8], 0 }
   0x6   :  { %13 = vsyncpa [#allocation11], 0 }
   0x7   :  { %14 = vsyncpa [#allocation9], 0  ;;  %s3831_s24 = smov 0   ;;  %s3833_s25 = smov 0  }
   0x8   :  { %s3835_s26 = smov 0   ;;  %s3837_s27 = smov 0  }
   0x9   :  { %s3839_s28 = smov 0   ;;  %s3841_s29 = smov 0  }
   0xa   :  { %s3843_s30 = smov 0   ;;  %s3845_s8 = smov 0  }
   0xb LB: > { %4662 = sst [smem:[#allocation18_spill]] %s3768_s29  ;;  %s3870_s9 = sadd.s32 4294967295, %s3776_s8   ;;  %s3776_s8 = sphi %s3845_s8, %s20_s8   ;;  %s3772_s30 = sphi %s3843_s30, %s4688_s30   ;;  %s3768_s29 = sphi %s3841_s29, %s4687_s29   ;;  %s3764_s28 = sphi %s3839_s28, %s4686_s28   ;;  %s3760_s27 = sphi %s3837_s27, %s4681_s27   ;;  %s3756_s26 = sphi %s3835_s26, %s4685_s26   ;;  %s3752_s25 = sphi %s3833_s25, %s4684_s25   ;;  %s3748_s24 = sphi %s3831_s24, %s4683_s24  }
   0xc   : > { %p102_p0 = scmp.ne.s32.totalorder %s3756_s26, %s3752_s25  ;;  %p103_p1 = scmp.eq.s32.totalorder %s3776_s8, 0 }
   0xd   : > { %p108_p2 = scmp.ne.s32.totalorder %s3752_s25, %s3748_s24  ;;  %p4651_p3 = scmp.eq.s32.totalorder %s3870_s9, 0 }
   0xe   : > { %p104_p4 = por %p103_p1, %p102_p0  ;;  %p2708_p5 = scmp.ge.s32.totalorder %s3776_s8, 1 }
   0xf   : > { %p3881_p6 = por %p4651_p3, %p108_p2  ;;  %p234_p7 = scmp.lt.s32.totalorder %s3776_s8, 11 }
  0x10   : > { %s3778_s13 = smov [#allocation7]   ;;  %p3409_p10 = scmp.lt.s32.totalorder %s3776_s8, 10 }
  0x11   : > { %s4663_s11 = scalar_select %p3881_p6, 1, 0 }
  0x12   : > { %p3886_p8 = pnand %p2708_p5, %p234_p7  ;;  %s249_s14 = sshll.u32 %s3778_s13, 4  ;;  %s3890_s14 = int_to_ptr.vmem [resolvable:$true] %s249_s14 }
  0x13   : > { %p3901_p12 = pnand %p3409_p10, %p104_p4  ;;  %s3779_s17 = smov [#allocation10]  }
  0x14   : > { %p3396_p9 = pneg %p3886_p8  ;;  %s262_s18 = sshll.u32 %s3779_s17, 4  ;;  %s3905_s18 = int_to_ptr.vmem [resolvable:$true] %s262_s18 }
  0x15   : > { %s4667_s0 = sld [smem:[#allocation20_spill]] }
  0x16   : > { %p3897_p11 = pnand %p3396_p9, %p4651_p3 }
  0x18   : > { %p3588_p0 = pneg %p3897_p11 }
  0x1b   : > { %s3586_s21 = scalar_lea.hbm %s4667_s0, 1024 }
  0x1c   : > { %p3587_p13 = scmp.ne.s32.totalorder %s4667_s0, %s3586_s21  ;;  %p3593_p4 = scmp.lt.u32.totalorder %s3586_s21, %s4667_s0 }
  0x1e   : > { %p3589_p1 = pnand %p3588_p0, %p3587_p13 }
  0x20   : > { %p3590_p2 = pneg %p3589_p1 }
  0x22   : > { %p3595_p5 = pnand %p3593_p4, %p3590_p2 }
  0x24   : > { %3598 = shalt.err (!%p3595_p5)
}
  0x25   : > { %s3599_s17 = scalar_lea.vmem %s3890_s14, 1024  ;;  %p3607_p3 = scmp.lt.s32.totalorder %s3890_s14, %s3890_s14 }
  0x26   : > { %p3600_p7 = scmp.ne.s32.totalorder %s3890_s14, %s3599_s17  ;;  %p3608_p13 = scmp.lt.s32.totalorder %s3599_s17, %s3599_s17 }
  0x28   : > { %p3602_p9 = pnand %p3600_p7, %p3588_p0  ;;  %p3609_p1 = por %p3608_p13, %p3607_p3 }
  0x2a   : > { %p3603_p10 = pneg %p3602_p9 }
  0x2c   : > { %p3610_p6 = pnand %p3609_p1, %p3603_p10 }
  0x2e   : > { %3613 = shalt.err (!%p3610_p6)
}
  0x2f   : > { %s4654_s19 = smov 64   ;;  %s4655_s20 = smov 4  }
  0x30   : > { %3399 = dma.hbm_to_vmem [thread:$0]  (!%p3897_p11), %s4667_s0, 1024, %s3890_s14, [#allocation8], %s4654_s19, %s4654_s19, %s4655_s20  }
  0x31   : > { %s4668_s1 = sld [smem:[#allocation21_spill]] }
  0x37   : > { %s3614_s13 = scalar_lea.hbm %s4668_s1, 1024 }
  0x38   : > { %p3615_p3 = scmp.ne.s32.totalorder %s4668_s1, %s3614_s13  ;;  %p3621_p4 = scmp.lt.u32.totalorder %s3614_s13, %s4668_s1 }
  0x3a   : > { %p3617_p6 = pnand %p3615_p3, %p3588_p0 }
  0x3c   : > { %p3618_p2 = pneg %p3617_p6 }
  0x3e   : > { %p3623_p5 = pnand %p3621_p4, %p3618_p2 }
  0x40   : > { %3626 = shalt.err (!%p3623_p5)
}
  0x41   : > { %s3627_s14 = scalar_lea.vmem %s3905_s18, 1024  ;;  %p3635_p13 = scmp.lt.s32.totalorder %s3905_s18, %s3905_s18 }
  0x42   : > { %p3628_p7 = scmp.ne.s32.totalorder %s3905_s18, %s3627_s14  ;;  %p3636_p1 = scmp.lt.s32.totalorder %s3627_s14, %s3627_s14 }
  0x44   : > { %p3630_p9 = pnand %p3628_p7, %p3588_p0  ;;  %p3637_p3 = por %p3636_p1, %p3635_p13 }
  0x46   : > { %p3631_p10 = pneg %p3630_p9 }
  0x48   : > { %p3638_p6 = pnand %p3637_p3, %p3631_p10 }
  0x4a   : > { %3641 = shalt.err (!%p3638_p6)
}
  0x4b   : > { %3402 = dma.hbm_to_vmem [thread:$0]  (!%p3897_p11), %s4668_s1, 1024, %s3905_s18, [#allocation11], %s4654_s19, %s4654_s19, %s4655_s20  }
  0x4c   : > { %s35_s10 = sadd.s32 1, %s3768_s29  ;;  %s39_s15 = sadd.s32 1, %s3772_s30 }
  0x4d   : > { %p37_p0 = scmp.ge.s32.totalorder %s35_s10, 5  ;;  %s291_s21 = sand.u32 1, %s3776_s8  }
  0x4e   : > { %s293_s22 = sand.u32 1, %s3756_s26   ;;  %s2714_s13 = sshll.u32 %s3768_s29, 4 }
  0x4f   : > { %s4690_s10 = smov (%p37_p0, %s35_s10), 0  ;;  %s4692_s15 = smov (!%p37_p0, %s39_s15), %s3772_s30 }
  0x50   : > { %4669 = sst [smem:[#allocation19_spill]] %s4690_s10  ;;  %s91_s23 = ssub.s32 %s3768_s29, %s4690_s10 }
  0x51   : > { %p41_p2 = scmp.ge.s32.totalorder %s4692_s15, 2  ;;  %s2713_s24 = sshll.u32 %s293_s22, 6 }
  0x52   : > { %s3381_s18 = smul.u32 80, %s3772_s30  ;;  %s295_s17 = scalar_lea.vmem [#allocation12], %s2713_s24 }
  0x53   : > { %s4694_s15 = smov (%p41_p2, %s4692_s15), 0  ;;  %s304_s14 = sshll.u32 %s295_s17, 4  ;;  %s3980_s14 = int_to_ptr.vmem [resolvable:$true] %s304_s14 }
  0x54   : > { %s90_s6 = ssub.s32 %s3772_s30, %s4694_s15  ;;  %s301_s19 = sadd.s32 %s3381_s18, %s2714_s13 }
  0x55   : > { %s92_s7 = sor.u32 %s91_s23, %s90_s6  ;;  %s2715_s20 = sshll.u32 %s301_s19, 6 }
  0x56   : > { %p93_p11 = scmp.eq.s32.totalorder %s92_s7, 0  ;;  %s3985_s22 = scalar_lea.hbm %s4645_s2, %s2715_s20 }
  0x57   : > { %s4670_s10 = sadd.s32 1, %s3756_s26  ;;  %s3992_s24 = scalar_lea.sflag [#allocation8], %s291_s21 }
  0x58   : > { %s3990_s29 = scalar_select %p93_p11, %s3756_s26, %s4670_s10  }
  0x59   : > { %s3642_s17 = scalar_lea.hbm %s3985_s22, 1024  ;;  %p3644_p5 = pneg %p3901_p12 }
  0x5a   : > { %p3643_p4 = scmp.ne.s32.totalorder %s3985_s22, %s3642_s17  ;;  %s3647_s19 = scalar_lea.hbm %s4645_s2, 10240 }
  0x5b   : > { %p3648_p10 = scmp.lt.u32.totalorder %s3985_s22, %s4645_s2  ;;  %p3649_p13 = scmp.lt.u32.totalorder %s3647_s19, %s3642_s17 }
  0x5c   : > { %p3645_p7 = pnand %p3644_p5, %p3643_p4  ;;  %p3651_p3 = scmp.lt.u32.totalorder %s3642_s17, %s3985_s22 }
  0x5d   : > { %p3650_p1 = por %p3649_p13, %p3648_p10 }
  0x5e   : > { %p3646_p9 = pneg %p3645_p7 }
  0x5f   : > { %p3652_p6 = por %p3651_p3, %p3650_p1 }
  0x61   : > { %p3653_p0 = pnand %p3652_p6, %p3646_p9 }
  0x63   : > { %3656 = shalt.err (!%p3653_p0)
}
  0x64   : > { %s3657_s10 = scalar_lea.vmem %s3980_s14, 1024  ;;  %s3782_s21 = smov [#allocation12]  }
  0x65   : > { %p3658_p2 = scmp.ne.s32.totalorder %s3980_s14, %s3657_s10  ;;  %s3662_s13 = sshll.u32 %s3782_s21, 4  ;;  %s3663_s13 = int_to_ptr.vmem [resolvable:$false] %s3662_s13 }
  0x66   : > { %s3664_s18 = scalar_lea.vmem %s3663_s13, 2048  ;;  %p3665_p7 = scmp.lt.s32.totalorder %s3980_s14, %s3663_s13 }
  0x67   : > { %p3660_p11 = pnand %p3658_p2, %p3644_p5  ;;  %p3666_p10 = scmp.lt.s32.totalorder %s3664_s18, %s3657_s10 }
  0x69   : > { %p3661_p4 = pneg %p3660_p11  ;;  %p3667_p13 = por %p3666_p10, %p3665_p7 }
  0x6b   : > { %p3668_p1 = pnand %p3667_p13, %p3661_p4 }
  0x6d   : > { %3671 = shalt.err (!%p3668_p1)
}
  0x6e   : > { %s4671_s6 = smov 4   ;;  %s4672_s7 = smov 64  }
  0x6f   : > { %3406 = dma.hbm_to_vmem [thread:$0]  (!%p3901_p12), %s3985_s22, 1024, %s3980_s14, %s3992_s24, %s4672_s7, %s4672_s7, %s4671_s6  }
  0x70   : > { %322 = sbr.rel (%p3886_p8) target bundleno = 2484 (0x9b4), region = 48  ;;  %p4673_p5 = scmp.eq.s32.totalorder (!%p3886_p8), %s3870_s9, 0 }
  0x77   : > { %3731 = dma.done.wait (%p4673_p5), [#allocation8], 1024   ;;  %p4674_p9 = pmov %p4673_p5 }
  0x78   : > { %p4675_p3 = pmov %p4673_p5 }
  0x79   : > { %3733 = vsyncadd (%p4674_p9), [#allocation8], 4294966272 }
  0x7a   : > { %3735 = dma.done.wait (%p4675_p3), [#allocation11], 1024   ;;  %p4676_p6 = pmov %p4675_p3 }
  0x7b   : > { %s332_s16 = sand.u32 1, %s3870_s9   ;;  %s334_s14 = sand.u32 1, %s3752_s25  }
  0x7c   : > { %3737 = vsyncadd (%p4676_p6), [#allocation11], 4294966272  ;;  %s2719_s22 = sshll.u32 %s334_s14, 6  ;;  %s333_s12 = scalar_lea.sflag [#allocation8], %s332_s16 }
  0x7d   : > { %s4035_s24 = scalar_lea.vmem [#allocation12], %s2719_s22  ;;  %p4677_p8 = scmp.ne.s32.totalorder %s4663_s11, 0 }
  0x7f   : > { %3739 = dma.done.wait (%p4677_p8), %s333_s12, 1024  }
  0x80   : > { %3741 = vsyncadd (%p4677_p8), %s333_s12, 4294966272  ;;  %p371_p12 = scmp.lt.s32.totalorder %s3764_s28, 1  ;;  %p382_p0 = scmp.eq.s32.totalorder %s3764_s28, 0 }
  0x81   : > { %p383_p2 = scmp.eq.s32.totalorder %s3760_s27, 0 }
  0x82   : > { %s372_s17 = scalar_select %p371_p12, %s3764_s28, 1 }
  0x83   : > { %p387_p11 = pnand %p383_p2, %p382_p0 }
  0x84   : > { %s4050_s19 = scalar_lea.vmem %s4646_s3, %s372_s17  ;;  %v3783_v0 = vmov (!%p387_p11), 0.0  }
  0x85   : > { %390 = sbr.rel (%p387_p11) target bundleno = 140 (0x8c), region = 64  ;;  %391 = vst [vmem:[#allocation6] sm:$0xff] (!%p387_p11), %v3783_v0  ;;  %392 = vst [vmem:[#allocation13] sm:$0xff] (!%p387_p11), %v3783_v0 }
  0x8c PF: > { %v4052_v1 = vld [vmem:[#allocation10] sm:$0xf]  ;;  %v4054_v2 = vld [vmem:[#allocation10 + $0x4] sm:$0xf]  ;;  %v4056_v3 = vld [vmem:[#allocation10 + $0x8] sm:$0xf] }
  0x8d   : > { %v4058_v4 = vld [vmem:[#allocation10 + $0xc] sm:$0xf]  ;;  %v4060_v5 = vld [vmem:[#allocation10 + $0x10] sm:$0xf]  ;;  %v4062_v6 = vld [vmem:[#allocation10 + $0x14] sm:$0xf] }
  0x8e   : > { %v4064_v7 = vld [vmem:[#allocation10 + $0x18] sm:$0xf]  ;;  %v4066_v8 = vld [vmem:[#allocation10 + $0x1c] sm:$0xf]  ;;  %v4068_v9 = vld [vmem:[#allocation10 + $0x20] sm:$0xf] }
  0x8f   : > { %v4070_v10 = vld [vmem:[#allocation10 + $0x24] sm:$0xf]  ;;  %v4072_v11 = vld [vmem:[#allocation10 + $0x28] sm:$0xf]  ;;  %v4074_v12 = vld [vmem:[#allocation10 + $0x2c] sm:$0xf] }
  0x90   : > { %v4076_v13 = vld [vmem:[#allocation10 + $0x30] sm:$0xf]  ;;  %v4078_v14 = vld [vmem:[#allocation10 + $0x34] sm:$0xf]  ;;  %v4080_v15 = vld [vmem:[#allocation10 + $0x38] sm:$0xf] }
  0x91   : > { %v4082_v16 = vld [vmem:[#allocation10 + $0x3c] sm:$0xf]  ;;  %p413_p4 = scmp.lt.s32.totalorder %s3760_s27, 0  ;;  %s414_s11 = ssub.s32 0, %s3760_s27 }
  0x92   : > { %s2721_s20 = smin.u32 %s3760_s27, %s414_s11 }
  0x93   : > { %s416_s23 = sand.u32 1, %s2721_s20  }
  0x94   : > { %s417_s10 = ssub.s32 0, %s416_s23 }
  0x95   : > { %s4696_s10 = smov (!%p413_p4, %s417_s10), %s416_s23 }
  0x96   : > { %p2723_p7 = scmp.lt.s32.totalorder %s4696_s10, 0  ;;  %s423_s21 = sadd.s32 2, %s4696_s10 }
  0x98   : > { %s4698_s21 = smov (!%p2723_p7, %s423_s21), %s4696_s10 }
  0x99   : > { %p2724_p10 = scmp.ne.s32.totalorder %s4698_s21, 0 }
  0x9a   : > { %p2725_p13 = scmp.ne.s32.totalorder (!%p2724_p10), %s3760_s27, 0 }
  0x9b   : > { %428 = sbr.rel (%p2724_p10) target bundleno = 982 (0x3d6), region = 68 }
  0xa2   : > { %431 = sbr.rel (%p2725_p13) target bundleno = 185 (0xb9), region = 72  ;;  %p2726_p1 = scmp.ne.s32.totalorder (!%p2725_p13), %s3764_s28, 0 }
  0xa9   : > { %434 = sbr.rel (%p2726_p1) target bundleno = 176 (0xb0), region = 76  ;;  %v3490_v17 = vld [vmem:[#allocation7] sm:$0xff] (!%p2726_p1)   ;;  %v3491_v18 = vld [vmem:[#allocation7 + $0x8] sm:$0xff] (!%p2726_p1)   ;;  %v3492_v19 = vld [vmem:[#allocation7 + $0x10] sm:$0xff] (!%p2726_p1)  }
  0xaa   : > { %503 = vst [vmem:[#allocation2] sm:$0xff] (!%p2726_p1), %v3490_v17  ;;  %504 = vst [vmem:[#allocation2 + $0x8] sm:$0xff] (!%p2726_p1), %v3491_v18  ;;  %v3493_v20 = vld [vmem:[#allocation7 + $0x18] sm:$0xff] (!%p2726_p1)   ;;  %v3494_v21 = vld [vmem:[#allocation7 + $0x20] sm:$0xff] (!%p2726_p1)  }
  0xab   : > { %505 = vst [vmem:[#allocation2 + $0x10] sm:$0xff] (!%p2726_p1), %v3492_v19  ;;  %506 = vst [vmem:[#allocation2 + $0x18] sm:$0xff] (!%p2726_p1), %v3493_v20  ;;  %v3495_v22 = vld [vmem:[#allocation7 + $0x28] sm:$0xff] (!%p2726_p1)   ;;  %v3496_v23 = vld [vmem:[#allocation7 + $0x30] sm:$0xff] (!%p2726_p1)  }
  0xac   : > { %507 = vst [vmem:[#allocation2 + $0x20] sm:$0xff] (!%p2726_p1), %v3494_v21  ;;  %508 = vst [vmem:[#allocation2 + $0x28] sm:$0xff] (!%p2726_p1), %v3495_v22  ;;  %v3497_v24 = vld [vmem:[#allocation7 + $0x38] sm:$0xff] (!%p2726_p1)  }
  0xad   : > { %509 = vst [vmem:[#allocation2 + $0x30] sm:$0xff] (!%p2726_p1), %v3496_v23  ;;  %510 = vst [vmem:[#allocation2 + $0x38] sm:$0xff] (!%p2726_p1), %v3497_v24 }
  0xb0 PF: > { %p2735_p5 = scmp.ne.s32.totalorder %s3764_s28, 1 }
  0xb1   : > { %v519_v25 = vld [vmem:[#allocation5] sm:$0xff] (!%p2735_p5)  ;;  %v520_v26 = vld [vmem:[#allocation5 + $0x8] sm:$0xff] (!%p2735_p5)  ;;  %v521_v27 = vld [vmem:[#allocation5 + $0x10] sm:$0xff] (!%p2735_p5) }
  0xb2   : > { %514 = sbr.rel (%p2735_p5) target bundleno = 185 (0xb9), region = 80  ;;  %529 = vst [vmem:[#allocation2] sm:$0xff] (!%p2735_p5), %v519_v25  ;;  %530 = vst [vmem:[#allocation2 + $0x8] sm:$0xff] (!%p2735_p5), %v520_v26  ;;  %v522_v28 = vld [vmem:[#allocation5 + $0x18] sm:$0xff] (!%p2735_p5)  ;;  %v523_v29 = vld [vmem:[#allocation5 + $0x20] sm:$0xff] (!%p2735_p5) }
  0xb3   : > { %531 = vst [vmem:[#allocation2 + $0x10] sm:$0xff] (!%p2735_p5), %v521_v27  ;;  %v524_v30 = vld [vmem:[#allocation5 + $0x28] sm:$0xff] (!%p2735_p5)  ;;  %532 = vst [vmem:[#allocation2 + $0x18] sm:$0xff] (!%p2735_p5), %v522_v28  ;;  %v525_v31 = vld [vmem:[#allocation5 + $0x30] sm:$0xff] (!%p2735_p5) }
  0xb4   : > { %533 = vst [vmem:[#allocation2 + $0x20] sm:$0xff] (!%p2735_p5), %v523_v29  ;;  %534 = vst [vmem:[#allocation2 + $0x28] sm:$0xff] (!%p2735_p5), %v524_v30  ;;  %v526_v32 = vld [vmem:[#allocation5 + $0x38] sm:$0xff] (!%p2735_p5) }
  0xb5   : > { %535 = vst [vmem:[#allocation2 + $0x30] sm:$0xff] (!%p2735_p5), %v525_v31  ;;  %536 = vst [vmem:[#allocation2 + $0x38] sm:$0xff] (!%p2735_p5), %v526_v32 }
  0xb9 PF: > { %p2736_p9 = scmp.ne.s32.totalorder %s3760_s27, 1 }
  0xba   : > { %v541_v33 = vld [vmem:[#allocation3] sm:$0xff] (!%p2736_p9)  ;;  %v542_v34 = vld [vmem:[#allocation3 + $0x8] sm:$0xff] (!%p2736_p9)  ;;  %v2737_v35 = vcombine.low (!%p2736_p9), %v4052_v1, %v4054_v2  ;;  %v2741_v36 = vcombine.low (!%p2736_p9), %v4068_v9, %v4070_v10  ;;  %v543_v37 = vld [vmem:[#allocation3 + $0x10] sm:$0xff] (!%p2736_p9)  ;;  %v2738_v43 = vcombine.low (!%p2736_p9), %v4056_v3, %v4058_v4  ;;  %v2742_v44 = vcombine.low (!%p2736_p9), %v4072_v11, %v4074_v12 }
  0xbb   : > { %540 = sbr.rel (%p2736_p9) target bundleno = 445 (0x1bd), region = 84  ;;  %2975 = vmatprep.subr.bf16.mxu0 (!%p2736_p9), %v541_v33  ;;  %3285 = vmatprep.subr.bf16.mxu1 (!%p2736_p9), %v541_v33  ;;  %v544_v38 = vld [vmem:[#allocation3 + $0x18] sm:$0xff] (!%p2736_p9)  ;;  %v545_v39 = vld [vmem:[#allocation3 + $0x20] sm:$0xff] (!%p2736_p9)  ;;  %v546_v40 = vld [vmem:[#allocation3 + $0x28] sm:$0xff] (!%p2736_p9)  ;;  %v2739_v45 = vcombine.low (!%p2736_p9), %v4060_v5, %v4062_v6  ;;  %v2743_v46 = vcombine.low (!%p2736_p9), %v4076_v13, %v4078_v14  ;;  %v2740_v47 = vcombine.low (!%p2736_p9), %v4064_v7, %v4066_v8 }
  0xbc   : > { %2976 = vmatpush3.bf16.msra.mxu0 (!%p2736_p9), %v541_v33  ;;  %3293 = vmatpush3.bf16.msra.mxu1 (!%p2736_p9), %v541_v33  ;;  %v547_v41 = vld [vmem:[#allocation3 + $0x30] sm:$0xff] (!%p2736_p9)  ;;  %v548_v42 = vld [vmem:[#allocation3 + $0x38] sm:$0xff] (!%p2736_p9)  ;;  %v2744_v48 = vcombine.low (!%p2736_p9), %v4080_v15, %v4082_v16 }
  0xbd   : > { %2977 = vmatprep.subr.bf16.mxu0 (!%p2736_p9), %v542_v34  ;;  %3286 = vmatprep.subr.bf16.mxu1 (!%p2736_p9), %v542_v34 }
  0xbe   : > { %2991 = vmatprep.mubr.bf16.mxu0 (!%p2736_p9), %v2737_v35  ;;  %2999 = vmatprep.mubr.bf16.mxu1 (!%p2736_p9), %v2741_v36 }
  0xc0   : > { %2978 = vmatpush3.bf16.msra.mxu0 (!%p2736_p9), %v542_v34  ;;  %3294 = vmatpush3.bf16.msra.mxu1 (!%p2736_p9), %v542_v34 }
  0xc1   : > { %2979 = vmatprep.subr.bf16.mxu0 (!%p2736_p9), %v543_v37  ;;  %3287 = vmatprep.subr.bf16.mxu1 (!%p2736_p9), %v543_v37 }
  0xc4   : > { %2980 = vmatpush3.bf16.msra.mxu0 %v543_v37  ;;  %3295 = vmatpush3.bf16.msra.mxu1 %v543_v37 }
  0xc5   : > { %2981 = vmatprep.subr.bf16.mxu0 %v544_v38  ;;  %3288 = vmatprep.subr.bf16.mxu1 %v544_v38 }
  0xc8   : > { %2982 = vmatpush3.bf16.msra.mxu0 %v544_v38  ;;  %3296 = vmatpush3.bf16.msra.mxu1 %v544_v38 }
  0xc9   : > { %2983 = vmatprep.subr.bf16.mxu0 %v545_v39  ;;  %3289 = vmatprep.subr.bf16.mxu1 %v545_v39 }
  0xcc   : > { %2984 = vmatpush3.bf16.msra.mxu0 %v545_v39  ;;  %3297 = vmatpush3.bf16.msra.mxu1 %v545_v39 }
  0xcd   : > { %2985 = vmatprep.subr.bf16.mxu0 %v546_v40  ;;  %3290 = vmatprep.subr.bf16.mxu1 %v546_v40 }
  0xd0   : > { %2986 = vmatpush3.bf16.msra.mxu0 %v546_v40  ;;  %3298 = vmatpush3.bf16.msra.mxu1 %v546_v40 }
  0xd1   : > { %2987 = vmatprep.subr.bf16.mxu0 %v547_v41  ;;  %3291 = vmatprep.subr.bf16.mxu1 %v547_v41 }
  0xd4   : > { %2988 = vmatpush3.bf16.msra.mxu0 %v547_v41  ;;  %3299 = vmatpush3.bf16.msra.mxu1 %v547_v41 }
  0xd5   : > { %2989 = vmatprep.subr.bf16.mxu0 %v548_v42  ;;  %3292 = vmatprep.subr.bf16.mxu1 %v548_v42 }
  0xd8   : > { %2990 = vmatpush3.bf16.msra.mxu0 %v548_v42  ;;  %3300 = vmatpush3.bf16.msra.mxu1 %v548_v42 }
  0xdb   : > { %2992 = vmatmul.mubr.bf16.vlgmr.msra.gmra.mrb[0].mxu0 %v2738_v43  ;;  %3000 = vmatmul.mubr.bf16.vlgmr.msra.gmra.mrb[0].mxu1 %v2742_v44 }
  0xdc   : > { %2995 = vmatprep.mubr.bf16.mxu0 %v2739_v45  ;;  %3003 = vmatprep.mubr.bf16.mxu1 %v2743_v46 }
  0xe3   : > { %2996 = vmatmul.mubr.bf16.gmra.mrb[4].mxu0 %v2740_v47  ;;  %3004 = vmatmul.mubr.bf16.gmra.mrb[4].mxu1 %v2744_v48 }
 0x1ae   : > { %v2993_v49 = vpop.f32.mrb[0].mxu0  ;;  %v3001_v50 = vpop.f32.mrb[0].mxu1 }
 0x1af   : > { %v631_v51 = vpop.f32.mrb[1].mxu0  ;;  %v663_v52 = vpop.f32.mrb[1].mxu1 }
 0x1b0   : > { %v2994_v53 = vpop.f32.mrb[2].mxu0  ;;  %v3002_v54 = vpop.f32.mrb[2].mxu1 }
 0x1b1   : > { %v695_v55 = vpack.c.bf16 %v2994_v53, %v2993_v49  ;;  %v699_v56 = vpack.c.bf16 %v3002_v54, %v3001_v50  ;;  %v634_v57 = vpop.f32.mrb[3].mxu0  ;;  %v666_v58 = vpop.f32.mrb[3].mxu1 }
 0x1b2   : > { %v694_v59 = vpack.c.bf16 %v634_v57, %v631_v51  ;;  %v698_v60 = vpack.c.bf16 %v666_v58, %v663_v52 }
 0x1b3   : > { %707 = vst [vmem:[#allocation2 + $0x8] sm:$0xff] %v695_v55  ;;  %711 = vst [vmem:[#allocation2 + $0x28] sm:$0xff] %v699_v56 }
 0x1b4   : > { %706 = vst [vmem:[#allocation2] sm:$0xff] %v694_v59  ;;  %710 = vst [vmem:[#allocation2 + $0x20] sm:$0xff] %v698_v60 }
 0x1b6   : > { %v2997_v61 = vpop.f32.mrb[4].mxu0  ;;  %v3005_v62 = vpop.f32.mrb[4].mxu1 }
 0x1b7   : > { %v647_v63 = vpop.f32.mrb[5].mxu0  ;;  %v679_v0 = vpop.f32.mrb[5].mxu1 }
 0x1b8   : > { %v2998_v17 = vpop.f32.mrb[6].mxu0  ;;  %v3006_v18 = vpop.f32.mrb[6].mxu1 }
 0x1b9   : > { %v697_v19 = vpack.c.bf16 %v2998_v17, %v2997_v61  ;;  %v701_v20 = vpack.c.bf16 %v3006_v18, %v3005_v62  ;;  %v650_v21 = vpop.f32.mrb[7].mxu0  ;;  %v682_v22 = vpop.f32.mrb[7].mxu1 }
 0x1ba   : > { %v696_v23 = vpack.c.bf16 %v650_v21, %v647_v63  ;;  %v700_v24 = vpack.c.bf16 %v682_v22, %v679_v0 }
 0x1bb   : > { %709 = vst [vmem:[#allocation2 + $0x18] sm:$0xff] %v697_v19  ;;  %713 = vst [vmem:[#allocation2 + $0x38] sm:$0xff] %v701_v20 }
 0x1bc   : > { %708 = vst [vmem:[#allocation2 + $0x10] sm:$0xff] %v696_v23  ;;  %712 = vst [vmem:[#allocation2 + $0x30] sm:$0xff] %v700_v24 }
 0x1bd PF: > { %p2745_p3 = scmp.lt.s32.totalorder %s3760_s27, 2 }
 0x1be   : > { %v746_v25 = vld [vmem:[#allocation3] sm:$0xff] (!%p2745_p3)  ;;  %v747_v26 = vld [vmem:[#allocation3 + $0x8] sm:$0xff] (!%p2745_p3)  ;;  %v2746_v27 = vcombine.low (!%p2745_p3), %v4052_v1, %v4054_v2  ;;  %v2750_v28 = vcombine.low (!%p2745_p3), %v4068_v9, %v4070_v10  ;;  %v748_v29 = vld [vmem:[#allocation3 + $0x10] sm:$0xff] (!%p2745_p3)  ;;  %v2747_v35 = vcombine.low (!%p2745_p3), %v4056_v3, %v4058_v4  ;;  %v2751_v36 = vcombine.low (!%p2745_p3), %v4072_v11, %v4074_v12 }
 0x1bf   : > { %717 = sbr.rel (%p2745_p3) target bundleno = 709 (0x2c5), region = 88  ;;  %3007 = vmatprep.subr.bf16.mxu0 (!%p2745_p3), %v746_v25  ;;  %3301 = vmatprep.subr.bf16.mxu1 (!%p2745_p3), %v746_v25  ;;  %v749_v30 = vld [vmem:[#allocation3 + $0x18] sm:$0xff] (!%p2745_p3)  ;;  %v750_v31 = vld [vmem:[#allocation3 + $0x20] sm:$0xff] (!%p2745_p3)  ;;  %v751_v32 = vld [vmem:[#allocation3 + $0x28] sm:$0xff] (!%p2745_p3)  ;;  %v2748_v37 = vcombine.low (!%p2745_p3), %v4060_v5, %v4062_v6  ;;  %v2752_v38 = vcombine.low (!%p2745_p3), %v4076_v13, %v4078_v14  ;;  %v2749_v39 = vcombine.low (!%p2745_p3), %v4064_v7, %v4066_v8 }
 0x1c0   : > { %3008 = vmatpush3.bf16.msra.mxu0 (!%p2745_p3), %v746_v25  ;;  %3309 = vmatpush3.bf16.msra.mxu1 (!%p2745_p3), %v746_v25  ;;  %v752_v33 = vld [vmem:[#allocation3 + $0x30] sm:$0xff] (!%p2745_p3)  ;;  %v753_v34 = vld [vmem:[#allocation3 + $0x38] sm:$0xff] (!%p2745_p3)  ;;  %v2753_v40 = vcombine.low (!%p2745_p3), %v4080_v15, %v4082_v16  ;;  %v723_v41 = vld [vmem:[#allocation2 + $0x8] sm:$0xff] (!%p2745_p3) }
 0x1c1   : > { %3009 = vmatprep.subr.bf16.mxu0 (!%p2745_p3), %v747_v26  ;;  %3302 = vmatprep.subr.bf16.mxu1 (!%p2745_p3), %v747_v26  ;;  %v727_v42 = vld [vmem:[#allocation2 + $0x28] sm:$0xff] (!%p2745_p3)  ;;  %v722_v43 = vld [vmem:[#allocation2] sm:$0xff] (!%p2745_p3)  ;;  %v732_v45 = vunpack.c.l.bf16 (!%p2745_p3), %v723_v41  ;;  %v733_v55 = vunpack.c.h.bf16 (!%p2745_p3), %v723_v41 }
 0x1c2   : > { %3023 = vmatprep.mubr.bf16.mxu0 (!%p2745_p3), %v2746_v27  ;;  %3031 = vmatprep.mubr.bf16.mxu1 (!%p2745_p3), %v2750_v28  ;;  %v726_v44 = vld [vmem:[#allocation2 + $0x20] sm:$0xff] (!%p2745_p3)  ;;  %v740_v47 = vunpack.c.l.bf16 (!%p2745_p3), %v727_v42  ;;  %v730_v49 = vunpack.c.l.bf16 (!%p2745_p3), %v722_v43  ;;  %v741_v56 = vunpack.c.h.bf16 (!%p2745_p3), %v727_v42  ;;  %v731_v61 = vunpack.c.h.bf16 (!%p2745_p3), %v722_v43  ;;  %v725_v21 = vld [vmem:[#allocation2 + $0x18] sm:$0xff] (!%p2745_p3) }
 0x1c3   : > { %v738_v50 = vunpack.c.l.bf16 (!%p2745_p3), %v726_v44  ;;  %v739_v62 = vunpack.c.h.bf16 (!%p2745_p3), %v726_v44  ;;  %v729_v22 = vld [vmem:[#allocation2 + $0x38] sm:$0xff] (!%p2745_p3)  ;;  %v724_v27 = vld [vmem:[#allocation2 + $0x10] sm:$0xff] (!%p2745_p3) }
 0x1c4   : > { %3010 = vmatpush3.bf16.msra.mxu0 (!%p2745_p3), %v747_v26  ;;  %3310 = vmatpush3.bf16.msra.mxu1 (!%p2745_p3), %v747_v26  ;;  %v728_v28 = vld [vmem:[#allocation2 + $0x30] sm:$0xff] (!%p2745_p3)  ;;  %v734_v41 = vunpack.c.l.bf16 (!%p2745_p3), %v724_v27 }
 0x1c5   : > { %3011 = vmatprep.subr.bf16.mxu0 (!%p2745_p3), %v748_v29  ;;  %3303 = vmatprep.subr.bf16.mxu1 (!%p2745_p3), %v748_v29  ;;  %v742_v42 = vunpack.c.l.bf16 (!%p2745_p3), %v728_v28 }
 0x1c8   : > { %3012 = vmatpush3.bf16.msra.mxu0 %v748_v29  ;;  %3311 = vmatpush3.bf16.msra.mxu1 %v748_v29 }
 0x1c9   : > { %3013 = vmatprep.subr.bf16.mxu0 %v749_v30  ;;  %3304 = vmatprep.subr.bf16.mxu1 %v749_v30 }
 0x1cc   : > { %3014 = vmatpush3.bf16.msra.mxu0 %v749_v30  ;;  %3312 = vmatpush3.bf16.msra.mxu1 %v749_v30 }
 0x1cd   : > { %3015 = vmatprep.subr.bf16.mxu0 %v750_v31  ;;  %3305 = vmatprep.subr.bf16.mxu1 %v750_v31 }
 0x1d0   : > { %3016 = vmatpush3.bf16.msra.mxu0 %v750_v31  ;;  %3313 = vmatpush3.bf16.msra.mxu1 %v750_v31 }
 0x1d1   : > { %3017 = vmatprep.subr.bf16.mxu0 %v751_v32  ;;  %3306 = vmatprep.subr.bf16.mxu1 %v751_v32 }
 0x1d4   : > { %3018 = vmatpush3.bf16.msra.mxu0 %v751_v32  ;;  %3314 = vmatpush3.bf16.msra.mxu1 %v751_v32 }
 0x1d5   : > { %3019 = vmatprep.subr.bf16.mxu0 %v752_v33  ;;  %3307 = vmatprep.subr.bf16.mxu1 %v752_v33 }
 0x1d8   : > { %3020 = vmatpush3.bf16.msra.mxu0 %v752_v33  ;;  %3315 = vmatpush3.bf16.msra.mxu1 %v752_v33 }
 0x1d9   : > { %3021 = vmatprep.subr.bf16.mxu0 %v753_v34  ;;  %3308 = vmatprep.subr.bf16.mxu1 %v753_v34 }
 0x1dc   : > { %3022 = vmatpush3.bf16.msra.mxu0 %v753_v34  ;;  %3316 = vmatpush3.bf16.msra.mxu1 %v753_v34 }
 0x1df   : > { %3024 = vmatmul.mubr.bf16.vlgmr.msra.gmra.mrb[0].mxu0 %v2747_v35  ;;  %3032 = vmatmul.mubr.bf16.vlgmr.msra.gmra.mrb[0].mxu1 %v2751_v36  ;;  %v736_v35 = vunpack.c.l.bf16 %v725_v21  ;;  %v744_v36 = vunpack.c.l.bf16 %v729_v22 }
 0x1e0   : > { %3027 = vmatprep.mubr.bf16.mxu0 %v2748_v37  ;;  %3035 = vmatprep.mubr.bf16.mxu1 %v2752_v38 }
 0x1e7   : > { %3028 = vmatmul.mubr.bf16.gmra.mrb[4].mxu0 %v2749_v39  ;;  %3036 = vmatmul.mubr.bf16.gmra.mrb[4].mxu1 %v2753_v40 }
 0x2b2   : > { %v3025_v46 = vpop.f32.mrb[0].mxu0  ;;  %v3033_v48 = vpop.f32.mrb[0].mxu1 }
 0x2b3   : > { %v901_v51 = vmul.f32 2.0, %v3025_v46  ;;  %v909_v52 = vmul.f32 2.0, %v3033_v48  ;;  %v836_v53 = vpop.f32.mrb[1].mxu0  ;;  %v868_v54 = vpop.f32.mrb[1].mxu1  ;;  %v745_v48 = vunpack.c.h.bf16 %v729_v22 }
 0x2b4   : > { %v899_v57 = vmul.f32 2.0, %v836_v53  ;;  %v907_v58 = vmul.f32 2.0, %v868_v54  ;;  %v3026_v59 = vpop.f32.mrb[2].mxu0  ;;  %v3034_v60 = vpop.f32.mrb[2].mxu1  ;;  %v735_v53 = vunpack.c.h.bf16 %v724_v27  ;;  %v743_v54 = vunpack.c.h.bf16 %v728_v28 }
 0x2b5   : > { %v902_v63 = vmul.f32 2.0, %v3026_v59  ;;  %v910_v0 = vmul.f32 2.0, %v3034_v60  ;;  %v839_v17 = vpop.f32.mrb[3].mxu0  ;;  %v871_v18 = vpop.f32.mrb[3].mxu1  ;;  %v917_v23 = vsub.f32 %v901_v51, %v732_v45  ;;  %v925_v24 = vsub.f32 %v909_v52, %v740_v47 }
 0x2b6   : > { %v900_v19 = vmul.f32 2.0, %v839_v17  ;;  %v908_v20 = vmul.f32 2.0, %v871_v18  ;;  %v915_v29 = vsub.f32 %v899_v57, %v730_v49  ;;  %v923_v30 = vsub.f32 %v907_v58, %v738_v50 }
 0x2b7   : > { %v918_v25 = vsub.f32 %v902_v63, %v733_v55  ;;  %v926_v26 = vsub.f32 %v910_v0, %v741_v56  ;;  %v737_v47 = vunpack.c.h.bf16 %v725_v21 }
 0x2b8   : > { %v916_v31 = vsub.f32 %v900_v19, %v731_v61  ;;  %v924_v32 = vsub.f32 %v908_v20, %v739_v62 }
 0x2b9   : > { %v932_v33 = vpack.c.bf16 %v918_v25, %v917_v23  ;;  %v936_v34 = vpack.c.bf16 %v926_v26, %v925_v24 }
 0x2ba   : > { %v931_v37 = vpack.c.bf16 %v916_v31, %v915_v29  ;;  %v935_v38 = vpack.c.bf16 %v924_v32, %v923_v30  ;;  %v3029_v39 = vpop.f32.mrb[4].mxu0  ;;  %v3037_v40 = vpop.f32.mrb[4].mxu1 }
 0x2bb   : > { %940 = vst [vmem:[#allocation2 + $0x8] sm:$0xff] %v932_v33  ;;  %944 = vst [vmem:[#allocation2 + $0x28] sm:$0xff] %v936_v34  ;;  %v905_v43 = vmul.f32 2.0, %v3029_v39  ;;  %v913_v44 = vmul.f32 2.0, %v3037_v40  ;;  %v852_v45 = vpop.f32.mrb[5].mxu0  ;;  %v884_v46 = vpop.f32.mrb[5].mxu1 }
 0x2bc   : > { %939 = vst [vmem:[#allocation2] sm:$0xff] %v931_v37  ;;  %943 = vst [vmem:[#allocation2 + $0x20] sm:$0xff] %v935_v38  ;;  %v903_v49 = vmul.f32 2.0, %v852_v45  ;;  %v911_v50 = vmul.f32 2.0, %v884_v46  ;;  %v3030_v51 = vpop.f32.mrb[6].mxu0  ;;  %v3038_v52 = vpop.f32.mrb[6].mxu1 }
 0x2bd   : > { %v906_v55 = vmul.f32 2.0, %v3030_v51  ;;  %v914_v56 = vmul.f32 2.0, %v3038_v52  ;;  %v855_v57 = vpop.f32.mrb[7].mxu0  ;;  %v887_v58 = vpop.f32.mrb[7].mxu1  ;;  %v921_v61 = vsub.f32 %v905_v43, %v736_v35  ;;  %v929_v62 = vsub.f32 %v913_v44, %v744_v36 }
 0x2be   : > { %v904_v59 = vmul.f32 2.0, %v855_v57  ;;  %v912_v60 = vmul.f32 2.0, %v887_v58  ;;  %v919_v17 = vsub.f32 %v903_v49, %v734_v41  ;;  %v927_v18 = vsub.f32 %v911_v50, %v742_v42 }
 0x2bf   : > { %v922_v63 = vsub.f32 %v906_v55, %v737_v47  ;;  %v930_v0 = vsub.f32 %v914_v56, %v745_v48 }
 0x2c0   : > { %v920_v19 = vsub.f32 %v904_v59, %v735_v53  ;;  %v928_v20 = vsub.f32 %v912_v60, %v743_v54 }
 0x2c1   : > { %v934_v21 = vpack.c.bf16 %v922_v63, %v921_v61  ;;  %v938_v22 = vpack.c.bf16 %v930_v0, %v929_v62 }
 0x2c2   : > { %v933_v23 = vpack.c.bf16 %v920_v19, %v919_v17  ;;  %v937_v24 = vpack.c.bf16 %v928_v20, %v927_v18 }
 0x2c3   : > { %942 = vst [vmem:[#allocation2 + $0x18] sm:$0xff] %v934_v21  ;;  %946 = vst [vmem:[#allocation2 + $0x38] sm:$0xff] %v938_v22 }
 0x2c4   : > { %941 = vst [vmem:[#allocation2 + $0x10] sm:$0xff] %v933_v23  ;;  %945 = vst [vmem:[#allocation2 + $0x30] sm:$0xff] %v937_v24 }
 0x2c5 PF: > { %v3498_v25 = vld [vmem:[%s4035_s24] sm:$0xff]   ;;  %v3499_v26 = vld [vmem:[%s4035_s24 + $0x8] sm:$0xff]   ;;  %v3500_v27 = vld [vmem:[%s4035_s24 + $0x10] sm:$0xff]  }
 0x2c6   : > { %3039 = vmatprep.subr.bf16.mxu0 %v3498_v25  ;;  %3317 = vmatprep.subr.bf16.mxu1 %v3498_v25  ;;  %v3501_v28 = vld [vmem:[%s4035_s24 + $0x18] sm:$0xff]   ;;  %v3502_v31 = vld [vmem:[%s4035_s24 + $0x20] sm:$0xff]   ;;  %v3503_v32 = vld [vmem:[%s4035_s24 + $0x28] sm:$0xff]  }
 0x2c7   : > { %3040 = vmatpush3.bf16.msra.mxu0 %v3498_v25  ;;  %3325 = vmatpush3.bf16.msra.mxu1 %v3498_v25  ;;  %v951_v29 = vld [vmem:[#allocation2] sm:$0xff]  ;;  %v3504_v33 = vld [vmem:[%s4035_s24 + $0x30] sm:$0xff]   ;;  %v952_v35 = vld [vmem:[#allocation2 + $0x8] sm:$0xff] }
 0x2c8   : > { %3041 = vmatprep.subr.bf16.mxu0 %v3499_v26  ;;  %3318 = vmatprep.subr.bf16.mxu1 %v3499_v26  ;;  %v955_v30 = vld [vmem:[#allocation2 + $0x20] sm:$0xff]  ;;  %v956_v36 = vld [vmem:[#allocation2 + $0x28] sm:$0xff] }
 0x2c9   : > { %3055 = vmatprep.mubr.bf16.mxu0 %v951_v29  ;;  %3063 = vmatprep.mubr.bf16.mxu1 %v955_v30  ;;  %v3505_v34 = vld [vmem:[%s4035_s24 + $0x38] sm:$0xff]  }
 0x2ca   : > { %v954_v39 = vld [vmem:[#allocation2 + $0x18] sm:$0xff]  ;;  %v2763_v57 = vld [vmem:[%s4050_s19] ss:$0 sm:$0xff] (!%p2725_p13) }
 0x2cb   : > { %3042 = vmatpush3.bf16.msra.mxu0 %v3499_v26  ;;  %3326 = vmatpush3.bf16.msra.mxu1 %v3499_v26  ;;  %v953_v37 = vld [vmem:[#allocation2 + $0x10] sm:$0xff]  ;;  %v958_v40 = vld [vmem:[#allocation2 + $0x38] sm:$0xff] }
 0x2cc   : > { %3043 = vmatprep.subr.bf16.mxu0 %v3500_v27  ;;  %3319 = vmatprep.subr.bf16.mxu1 %v3500_v27  ;;  %v957_v38 = vld [vmem:[#allocation2 + $0x30] sm:$0xff] }
 0x2cf   : > { %3044 = vmatpush3.bf16.msra.mxu0 %v3500_v27  ;;  %3327 = vmatpush3.bf16.msra.mxu1 %v3500_v27 }
 0x2d0   : > { %3045 = vmatprep.subr.bf16.mxu0 %v3501_v28  ;;  %3320 = vmatprep.subr.bf16.mxu1 %v3501_v28 }
 0x2d3   : > { %3046 = vmatpush3.bf16.msra.mxu0 %v3501_v28  ;;  %3328 = vmatpush3.bf16.msra.mxu1 %v3501_v28 }
 0x2d4   : > { %3047 = vmatprep.subr.bf16.mxu0 %v3502_v31  ;;  %3321 = vmatprep.subr.bf16.mxu1 %v3502_v31 }
 0x2d7   : > { %3048 = vmatpush3.bf16.msra.mxu0 %v3502_v31  ;;  %3329 = vmatpush3.bf16.msra.mxu1 %v3502_v31 }
 0x2d8   : > { %3049 = vmatprep.subr.bf16.mxu0 %v3503_v32  ;;  %3322 = vmatprep.subr.bf16.mxu1 %v3503_v32 }
 0x2db   : > { %3050 = vmatpush3.bf16.msra.mxu0 %v3503_v32  ;;  %3330 = vmatpush3.bf16.msra.mxu1 %v3503_v32 }
 0x2dc   : > { %3051 = vmatprep.subr.bf16.mxu0 %v3504_v33  ;;  %3323 = vmatprep.subr.bf16.mxu1 %v3504_v33 }
 0x2df   : > { %3052 = vmatpush3.bf16.msra.mxu0 %v3504_v33  ;;  %3331 = vmatpush3.bf16.msra.mxu1 %v3504_v33 }
 0x2e0   : > { %3053 = vmatprep.subr.bf16.mxu0 %v3505_v34  ;;  %3324 = vmatprep.subr.bf16.mxu1 %v3505_v34 }
 0x2e3   : > { %3054 = vmatpush3.bf16.msra.mxu0 %v3505_v34  ;;  %3332 = vmatpush3.bf16.msra.mxu1 %v3505_v34 }
 0x2e6   : > { %3056 = vmatmul.mubr.bf16.vlgmr.msra.gmra.mrb[0].mxu0 %v952_v35  ;;  %3064 = vmatmul.mubr.bf16.vlgmr.msra.gmra.mrb[0].mxu1 %v956_v36 }
 0x2e7   : > { %3059 = vmatprep.mubr.bf16.mxu0 %v953_v37  ;;  %3067 = vmatprep.mubr.bf16.mxu1 %v957_v38 }
 0x2ee   : > { %3060 = vmatmul.mubr.bf16.gmra.mrb[4].mxu0 %v954_v39  ;;  %3068 = vmatmul.mubr.bf16.gmra.mrb[4].mxu1 %v958_v40 }
 0x3b9   : > { %v3057_v41 = vpop.f32.mrb[0].mxu0  ;;  %v4137_v42 = vpop.f32.mrb[0].mxu1 }
 0x3ba   : > { %v1057_v43 = vpop.f32.mrb[1].mxu0  ;;  %v4139_v44 = vpop.f32.mrb[1].mxu1  ;;  %v1132_v60 = vadd.f32 (!%p2725_p13), %v3057_v41, %v2763_v57  ;;  %v1140_v20 = vadd.f32 (!%p2725_p13), %v4137_v42, %v2763_v57 }
 0x3bb   : > { %v3058_v45 = vpop.f32.mrb[2].mxu0  ;;  %v4141_v46 = vpop.f32.mrb[2].mxu1  ;;  %v1130_v58 = vadd.f32 (!%p2725_p13), %v2763_v57, %v1057_v43  ;;  %v1138_v18 = vadd.f32 (!%p2725_p13), %v2763_v57, %v4139_v44 }
 0x3bc   : > { %v1060_v47 = vpop.f32.mrb[3].mxu0  ;;  %v4143_v48 = vpop.f32.mrb[3].mxu1  ;;  %v1133_v61 = vadd.f32 (!%p2725_p13), %v3058_v45, %v2763_v57  ;;  %1149 = vst [vmem:[#allocation4 + $0x10] sm:$0xff] (!%p2725_p13), %v1132_v60  ;;  %v1141_v21 = vadd.f32 (!%p2725_p13), %v4141_v46, %v2763_v57  ;;  %1157 = vst [vmem:[#allocation4 + $0x50] sm:$0xff] (!%p2725_p13), %v1140_v20 }
 0x3bd   : > { %v1131_v59 = vadd.f32 (!%p2725_p13), %v2763_v57, %v1060_v47  ;;  %1147 = vst [vmem:[#allocation4] sm:$0xff] (!%p2725_p13), %v1130_v58  ;;  %v1139_v19 = vadd.f32 (!%p2725_p13), %v2763_v57, %v4143_v48  ;;  %1155 = vst [vmem:[#allocation4 + $0x40] sm:$0xff] (!%p2725_p13), %v1138_v18 }
 0x3be   : > { %1122 = sbr.rel (%p2725_p13) target bundleno = 968 (0x3c8), region = 92  ;;  %1150 = vst [vmem:[#allocation4 + $0x18] sm:$0xff] (!%p2725_p13), %v1133_v61  ;;  %1158 = vst [vmem:[#allocation4 + $0x58] sm:$0xff] (!%p2725_p13), %v1141_v21 }
 0x3bf   : > { %1148 = vst [vmem:[#allocation4 + $0x8] sm:$0xff] (!%p2725_p13), %v1131_v59  ;;  %1156 = vst [vmem:[#allocation4 + $0x48] sm:$0xff] (!%p2725_p13), %v1139_v19 }
 0x3c1   : > { %v4145_v49 = vpop.f32.mrb[4].mxu0  ;;  %v4147_v50 = vpop.f32.mrb[4].mxu1 }
 0x3c2   : > { %v1073_v51 = vpop.f32.mrb[5].mxu0  ;;  %v4149_v52 = vpop.f32.mrb[5].mxu1  ;;  %v1136_v0 = vadd.f32 (!%p2725_p13), %v4145_v49, %v2763_v57  ;;  %v1144_v24 = vadd.f32 (!%p2725_p13), %v4147_v50, %v2763_v57 }
 0x3c3   : > { %v3062_v53 = vpop.f32.mrb[6].mxu0  ;;  %v4151_v54 = vpop.f32.mrb[6].mxu1  ;;  %v1134_v62 = vadd.f32 (!%p2725_p13), %v2763_v57, %v1073_v51  ;;  %v1142_v22 = vadd.f32 (!%p2725_p13), %v2763_v57, %v4149_v52 }
 0x3c4   : > { %v1076_v55 = vpop.f32.mrb[7].mxu0  ;;  %v4153_v56 = vpop.f32.mrb[7].mxu1  ;;  %v1137_v17 = vadd.f32 (!%p2725_p13), %v3062_v53, %v2763_v57  ;;  %1153 = vst [vmem:[#allocation4 + $0x30] sm:$0xff] (!%p2725_p13), %v1136_v0  ;;  %v1145_v25 = vadd.f32 (!%p2725_p13), %v4151_v54, %v2763_v57  ;;  %1161 = vst [vmem:[#allocation4 + $0x70] sm:$0xff] (!%p2725_p13), %v1144_v24 }
 0x3c5   : > { %v1135_v63 = vadd.f32 %v2763_v57, %v1076_v55  ;;  %1151 = vst [vmem:[#allocation4 + $0x20] sm:$0xff] %v1134_v62  ;;  %v1143_v23 = vadd.f32 %v2763_v57, %v4153_v56  ;;  %1159 = vst [vmem:[#allocation4 + $0x60] sm:$0xff] %v1142_v22 }
 0x3c6   : > { %1154 = vst [vmem:[#allocation4 + $0x38] sm:$0xff] %v1137_v17  ;;  %1162 = vst [vmem:[#allocation4 + $0x78] sm:$0xff] %v1145_v25 }
 0x3c7   : > { %1152 = vst [vmem:[#allocation4 + $0x28] sm:$0xff] %v1135_v63  ;;  %1160 = vst [vmem:[#allocation4 + $0x68] sm:$0xff] %v1143_v23 }
 0x3c8 PF: > { %p2764_p6 = scmp.le.s32.totalorder %s3760_s27, 0 }
 0x3c9   : > { %v1168_v26 = vld [vmem:[#allocation4] sm:$0xff] (!%p2764_p6)  ;;  %v1169_v27 = vld [vmem:[#allocation4 + $0x8] sm:$0xff] (!%p2764_p6)  ;;  %v1170_v28 = vld [vmem:[#allocation4 + $0x10] sm:$0xff] (!%p2764_p6) }
 0x3ca   : > { %1166 = sbr.rel (%p2764_p6) target bundleno = 982 (0x3d6), region = 96  ;;  %v1184_v29 = vadd.f32 (!%p2764_p6), %v1168_v26, %v1057_v43  ;;  %v1185_v30 = vadd.f32 (!%p2764_p6), %v1169_v27, %v1060_v47  ;;  %v1186_v31 = vadd.f32 (!%p2764_p6), %v3057_v41, %v1170_v28  ;;  %v1171_v32 = vld [vmem:[#allocation4 + $0x18] sm:$0xff] (!%p2764_p6)  ;;  %v1176_v40 = vld [vmem:[#allocation4 + $0x40] sm:$0xff] (!%p2764_p6)  ;;  %v1177_v43 = vld [vmem:[#allocation4 + $0x48] sm:$0xff] (!%p2764_p6) }
 0x3cb   : > { %v1187_v35 = vadd.f32 (!%p2764_p6), %v3058_v45, %v1171_v32  ;;  %v1192_v59 = vadd.f32 (!%p2764_p6), %v1176_v40, %v4139_v44  ;;  %v1178_v47 = vld [vmem:[#allocation4 + $0x50] sm:$0xff] (!%p2764_p6)  ;;  %v1179_v41 = vld [vmem:[#allocation4 + $0x58] sm:$0xff] (!%p2764_p6)  ;;  %v1193_v45 = vadd.f32 (!%p2764_p6), %v1177_v43, %v4143_v48 }
 0x3cc   : > { %1200 = vst [vmem:[#allocation4] sm:$0xff] (!%p2764_p6), %v1184_v29  ;;  %1201 = vst [vmem:[#allocation4 + $0x8] sm:$0xff] (!%p2764_p6), %v1185_v30 }
 0x3cd   : > { %v1175_v39 = vld [vmem:[#allocation4 + $0x38] sm:$0xff] (!%p2764_p6)  ;;  %1202 = vst [vmem:[#allocation4 + $0x10] sm:$0xff] (!%p2764_p6), %v1186_v31  ;;  %1203 = vst [vmem:[#allocation4 + $0x18] sm:$0xff] (!%p2764_p6), %v1187_v35 }
 0x3ce   : > { %v1173_v34 = vld [vmem:[#allocation4 + $0x28] sm:$0xff] (!%p2764_p6)  ;;  %v1174_v38 = vld [vmem:[#allocation4 + $0x30] sm:$0xff] (!%p2764_p6)  ;;  %v1191_v58 = vadd.f32 (!%p2764_p6), %v3062_v53, %v1175_v39  ;;  %1208 = vst [vmem:[#allocation4 + $0x40] sm:$0xff] (!%p2764_p6), %v1192_v59  ;;  %v1183_v63 = vld [vmem:[#allocation4 + $0x78] sm:$0xff] (!%p2764_p6) }
 0x3cf   : > { %v1172_v33 = vld [vmem:[#allocation4 + $0x20] sm:$0xff] (!%p2764_p6)  ;;  %v1189_v37 = vadd.f32 (!%p2764_p6), %v1173_v34, %v1076_v55  ;;  %v1190_v57 = vadd.f32 (!%p2764_p6), %v4145_v49, %v1174_v38  ;;  %v1195_v55 = vadd.f32 (!%p2764_p6), %v4141_v46, %v1179_v41  ;;  %v1181_v61 = vld [vmem:[#allocation4 + $0x68] sm:$0xff] (!%p2764_p6)  ;;  %v1182_v62 = vld [vmem:[#allocation4 + $0x70] sm:$0xff] (!%p2764_p6)  ;;  %1209 = vst [vmem:[#allocation4 + $0x48] sm:$0xff] (!%p2764_p6), %v1193_v45 }
 0x3d0   : > { %v1188_v36 = vadd.f32 (!%p2764_p6), %v1172_v33, %v1073_v51  ;;  %v1194_v51 = vadd.f32 (!%p2764_p6), %v4137_v42, %v1178_v47  ;;  %v1180_v60 = vld [vmem:[#allocation4 + $0x60] sm:$0xff] (!%p2764_p6)  ;;  %1207 = vst [vmem:[#allocation4 + $0x38] sm:$0xff] (!%p2764_p6), %v1191_v58  ;;  %v1197_v49 = vadd.f32 (!%p2764_p6), %v1181_v61, %v4153_v56  ;;  %v1198_v53 = vadd.f32 (!%p2764_p6), %v4147_v50, %v1182_v62 }
 0x3d1   : > { %1205 = vst [vmem:[#allocation4 + $0x28] sm:$0xff] %v1189_v37  ;;  %1206 = vst [vmem:[#allocation4 + $0x30] sm:$0xff] %v1190_v57  ;;  %v1196_v44 = vadd.f32 %v1180_v60, %v4149_v52  ;;  %v1199_v42 = vadd.f32 %v4151_v54, %v1183_v63 }
 0x3d2   : > { %1204 = vst [vmem:[#allocation4 + $0x20] sm:$0xff] %v1188_v36  ;;  %1210 = vst [vmem:[#allocation4 + $0x50] sm:$0xff] %v1194_v51 }
 0x3d3   : > { %1211 = vst [vmem:[#allocation4 + $0x58] sm:$0xff] %v1195_v55  ;;  %1212 = vst [vmem:[#allocation4 + $0x60] sm:$0xff] %v1196_v44 }
 0x3d4   : > { %1213 = vst [vmem:[#allocation4 + $0x68] sm:$0xff] %v1197_v49  ;;  %1214 = vst [vmem:[#allocation4 + $0x70] sm:$0xff] %v1198_v53 }
 0x3d5   : > { %1215 = vst [vmem:[#allocation4 + $0x78] sm:$0xff] %v1199_v42 }
 0x3d6 PF: > { %p2765_p8 = scmp.eq.s32.totalorder %s4698_s21, 0 }
 0x3d7   : > { %p2766_p12 = scmp.ne.s32.totalorder (!%p2765_p8), %s3760_s27, 0 }
 0x3d8   : > { %1219 = sbr.rel (%p2765_p8) target bundleno = 1810 (0x712), region = 100 }
 0x3df   : > { %1222 = sbr.rel (%p2766_p12) target bundleno = 1014 (0x3f6), region = 104  ;;  %p2767_p2 = scmp.ne.s32.totalorder (!%p2766_p12), %s3764_s28, 0 }
 0x3e6   : > { %1225 = sbr.rel (%p2767_p2) target bundleno = 1005 (0x3ed), region = 108  ;;  %v3506_v46 = vld [vmem:[#allocation7] sm:$0xff] (!%p2767_p2)   ;;  %v3507_v48 = vld [vmem:[#allocation7 + $0x8] sm:$0xff] (!%p2767_p2)   ;;  %v3508_v50 = vld [vmem:[#allocation7 + $0x10] sm:$0xff] (!%p2767_p2)  }
 0x3e7   : > { %1294 = vst [vmem:[#allocation3] sm:$0xff] (!%p2767_p2), %v3506_v46  ;;  %1295 = vst [vmem:[#allocation3 + $0x8] sm:$0xff] (!%p2767_p2), %v3507_v48  ;;  %v3509_v52 = vld [vmem:[#allocation7 + $0x18] sm:$0xff] (!%p2767_p2)   ;;  %v3510_v54 = vld [vmem:[#allocation7 + $0x20] sm:$0xff] (!%p2767_p2)  }
 0x3e8   : > { %1296 = vst [vmem:[#allocation3 + $0x10] sm:$0xff] (!%p2767_p2), %v3508_v50  ;;  %1297 = vst [vmem:[#allocation3 + $0x18] sm:$0xff] (!%p2767_p2), %v3509_v52  ;;  %v3511_v56 = vld [vmem:[#allocation7 + $0x28] sm:$0xff] (!%p2767_p2)   ;;  %v3512_v0 = vld [vmem:[#allocation7 + $0x30] sm:$0xff] (!%p2767_p2)  }
 0x3e9   : > { %1298 = vst [vmem:[#allocation3 + $0x20] sm:$0xff] (!%p2767_p2), %v3510_v54  ;;  %1299 = vst [vmem:[#allocation3 + $0x28] sm:$0xff] (!%p2767_p2), %v3511_v56  ;;  %v3513_v17 = vld [vmem:[#allocation7 + $0x38] sm:$0xff] (!%p2767_p2)  }
 0x3ea   : > { %1300 = vst [vmem:[#allocation3 + $0x30] sm:$0xff] (!%p2767_p2), %v3512_v0  ;;  %1301 = vst [vmem:[#allocation3 + $0x38] sm:$0xff] (!%p2767_p2), %v3513_v17 }
 0x3ed PF: > { %p2776_p11 = scmp.ne.s32.totalorder %s3764_s28, 1 }
 0x3ee   : > { %v1310_v18 = vld [vmem:[#allocation5] sm:$0xff] (!%p2776_p11)  ;;  %v1311_v19 = vld [vmem:[#allocation5 + $0x8] sm:$0xff] (!%p2776_p11)  ;;  %v1312_v20 = vld [vmem:[#allocation5 + $0x10] sm:$0xff] (!%p2776_p11) }
 0x3ef   : > { %1305 = sbr.rel (%p2776_p11) target bundleno = 1014 (0x3f6), region = 112  ;;  %1320 = vst [vmem:[#allocation3] sm:$0xff] (!%p2776_p11), %v1310_v18  ;;  %1321 = vst [vmem:[#allocation3 + $0x8] sm:$0xff] (!%p2776_p11), %v1311_v19  ;;  %v1313_v21 = vld [vmem:[#allocation5 + $0x18] sm:$0xff] (!%p2776_p11)  ;;  %v1314_v22 = vld [vmem:[#allocation5 + $0x20] sm:$0xff] (!%p2776_p11) }
 0x3f0   : > { %1322 = vst [vmem:[#allocation3 + $0x10] sm:$0xff] (!%p2776_p11), %v1312_v20  ;;  %v1315_v23 = vld [vmem:[#allocation5 + $0x28] sm:$0xff] (!%p2776_p11)  ;;  %1323 = vst [vmem:[#allocation3 + $0x18] sm:$0xff] (!%p2776_p11), %v1313_v21  ;;  %v1316_v24 = vld [vmem:[#allocation5 + $0x30] sm:$0xff] (!%p2776_p11) }
 0x3f1   : > { %1324 = vst [vmem:[#allocation3 + $0x20] sm:$0xff] (!%p2776_p11), %v1314_v22  ;;  %1325 = vst [vmem:[#allocation3 + $0x28] sm:$0xff] (!%p2776_p11), %v1315_v23  ;;  %v1317_v25 = vld [vmem:[#allocation5 + $0x38] sm:$0xff] (!%p2776_p11) }
 0x3f2   : > { %1326 = vst [vmem:[#allocation3 + $0x30] sm:$0xff] (!%p2776_p11), %v1316_v24  ;;  %1327 = vst [vmem:[#allocation3 + $0x38] sm:$0xff] (!%p2776_p11), %v1317_v25 }
 0x3f6 PF: > { %p2777_p4 = scmp.ne.s32.totalorder %s3760_s27, 1 }
 0x3f7   : > { %v1332_v26 = vld [vmem:[#allocation2] sm:$0xff] (!%p2777_p4)  ;;  %v1333_v27 = vld [vmem:[#allocation2 + $0x8] sm:$0xff] (!%p2777_p4)  ;;  %v2778_v28 = vcombine.low (!%p2777_p4), %v4052_v1, %v4054_v2  ;;  %v2782_v29 = vcombine.low (!%p2777_p4), %v4068_v9, %v4070_v10  ;;  %v1334_v30 = vld [vmem:[#allocation2 + $0x10] sm:$0xff] (!%p2777_p4)  ;;  %v2779_v36 = vcombine.low (!%p2777_p4), %v4056_v3, %v4058_v4  ;;  %v2783_v37 = vcombine.low (!%p2777_p4), %v4072_v11, %v4074_v12 }
 0x3f8   : > { %1331 = sbr.rel (%p2777_p4) target bundleno = 1274 (0x4fa), region = 116  ;;  %3071 = vmatprep.subr.bf16.mxu0 (!%p2777_p4), %v1332_v26  ;;  %3333 = vmatprep.subr.bf16.mxu1 (!%p2777_p4), %v1332_v26  ;;  %v1335_v31 = vld [vmem:[#allocation2 + $0x18] sm:$0xff] (!%p2777_p4)  ;;  %v1336_v32 = vld [vmem:[#allocation2 + $0x20] sm:$0xff] (!%p2777_p4)  ;;  %v1337_v33 = vld [vmem:[#allocation2 + $0x28] sm:$0xff] (!%p2777_p4)  ;;  %v2780_v38 = vcombine.low (!%p2777_p4), %v4060_v5, %v4062_v6  ;;  %v2784_v39 = vcombine.low (!%p2777_p4), %v4076_v13, %v4078_v14  ;;  %v2781_v40 = vcombine.low (!%p2777_p4), %v4064_v7, %v4066_v8 }
 0x3f9   : > { %3072 = vmatpush3.bf16.msra.mxu0 (!%p2777_p4), %v1332_v26  ;;  %3341 = vmatpush3.bf16.msra.mxu1 (!%p2777_p4), %v1332_v26  ;;  %v1338_v34 = vld [vmem:[#allocation2 + $0x30] sm:$0xff] (!%p2777_p4)  ;;  %v1339_v35 = vld [vmem:[#allocation2 + $0x38] sm:$0xff] (!%p2777_p4)  ;;  %v2785_v57 = vcombine.low (!%p2777_p4), %v4080_v15, %v4082_v16 }
 0x3fa   : > { %3073 = vmatprep.subr.bf16.mxu0 (!%p2777_p4), %v1333_v27  ;;  %3334 = vmatprep.subr.bf16.mxu1 (!%p2777_p4), %v1333_v27 }
 0x3fb   : > { %3087 = vmatprep.mubr.bf16.mxu0 (!%p2777_p4), %v2778_v28  ;;  %3095 = vmatprep.mubr.bf16.mxu1 (!%p2777_p4), %v2782_v29 }
 0x3fd   : > { %3074 = vmatpush3.bf16.msra.mxu0 (!%p2777_p4), %v1333_v27  ;;  %3342 = vmatpush3.bf16.msra.mxu1 (!%p2777_p4), %v1333_v27 }
 0x3fe   : > { %3075 = vmatprep.subr.bf16.mxu0 (!%p2777_p4), %v1334_v30  ;;  %3335 = vmatprep.subr.bf16.mxu1 (!%p2777_p4), %v1334_v30 }
 0x401   : > { %3076 = vmatpush3.bf16.msra.mxu0 %v1334_v30  ;;  %3343 = vmatpush3.bf16.msra.mxu1 %v1334_v30 }
 0x402   : > { %3077 = vmatprep.subr.bf16.mxu0 %v1335_v31  ;;  %3336 = vmatprep.subr.bf16.mxu1 %v1335_v31 }
 0x405   : > { %3078 = vmatpush3.bf16.msra.mxu0 %v1335_v31  ;;  %3344 = vmatpush3.bf16.msra.mxu1 %v1335_v31 }
 0x406   : > { %3079 = vmatprep.subr.bf16.mxu0 %v1336_v32  ;;  %3337 = vmatprep.subr.bf16.mxu1 %v1336_v32 }
 0x409   : > { %3080 = vmatpush3.bf16.msra.mxu0 %v1336_v32  ;;  %3345 = vmatpush3.bf16.msra.mxu1 %v1336_v32 }
 0x40a   : > { %3081 = vmatprep.subr.bf16.mxu0 %v1337_v33  ;;  %3338 = vmatprep.subr.bf16.mxu1 %v1337_v33 }
 0x40d   : > { %3082 = vmatpush3.bf16.msra.mxu0 %v1337_v33  ;;  %3346 = vmatpush3.bf16.msra.mxu1 %v1337_v33 }
 0x40e   : > { %3083 = vmatprep.subr.bf16.mxu0 %v1338_v34  ;;  %3339 = vmatprep.subr.bf16.mxu1 %v1338_v34 }
 0x411   : > { %3084 = vmatpush3.bf16.msra.mxu0 %v1338_v34  ;;  %3347 = vmatpush3.bf16.msra.mxu1 %v1338_v34 }
 0x412   : > { %3085 = vmatprep.subr.bf16.mxu0 %v1339_v35  ;;  %3340 = vmatprep.subr.bf16.mxu1 %v1339_v35 }
 0x415   : > { %3086 = vmatpush3.bf16.msra.mxu0 %v1339_v35  ;;  %3348 = vmatpush3.bf16.msra.mxu1 %v1339_v35 }
 0x418   : > { %3088 = vmatmul.mubr.bf16.vlgmr.msra.gmra.mrb[0].mxu0 %v2779_v36  ;;  %3096 = vmatmul.mubr.bf16.vlgmr.msra.gmra.mrb[0].mxu1 %v2783_v37 }
 0x419   : > { %3091 = vmatprep.mubr.bf16.mxu0 %v2780_v38  ;;  %3099 = vmatprep.mubr.bf16.mxu1 %v2784_v39 }
 0x420   : > { %3092 = vmatmul.mubr.bf16.gmra.mrb[4].mxu0 %v2781_v40  ;;  %3100 = vmatmul.mubr.bf16.gmra.mrb[4].mxu1 %v2785_v57 }
 0x4eb   : > { %v3089_v58 = vpop.f32.mrb[0].mxu0  ;;  %v3097_v59 = vpop.f32.mrb[0].mxu1 }
 0x4ec   : > { %v1422_v43 = vpop.f32.mrb[1].mxu0  ;;  %v1454_v47 = vpop.f32.mrb[1].mxu1 }
 0x4ed   : > { %v3090_v41 = vpop.f32.mrb[2].mxu0  ;;  %v3098_v45 = vpop.f32.mrb[2].mxu1 }
 0x4ee   : > { %v1486_v51 = vpack.c.bf16 %v3090_v41, %v3089_v58  ;;  %v1490_v55 = vpack.c.bf16 %v3098_v45, %v3097_v59  ;;  %v1425_v60 = vpop.f32.mrb[3].mxu0  ;;  %v1457_v61 = vpop.f32.mrb[3].mxu1 }
 0x4ef   : > { %v1485_v62 = vpack.c.bf16 %v1425_v60, %v1422_v43  ;;  %v1489_v44 = vpack.c.bf16 %v1457_v61, %v1454_v47 }
 0x4f0   : > { %1498 = vst [vmem:[#allocation3 + $0x8] sm:$0xff] %v1486_v51  ;;  %1502 = vst [vmem:[#allocation3 + $0x28] sm:$0xff] %v1490_v55 }
 0x4f1   : > { %1497 = vst [vmem:[#allocation3] sm:$0xff] %v1485_v62  ;;  %1501 = vst [vmem:[#allocation3 + $0x20] sm:$0xff] %v1489_v44 }
 0x4f3   : > { %v3093_v49 = vpop.f32.mrb[4].mxu0  ;;  %v3101_v53 = vpop.f32.mrb[4].mxu1 }
 0x4f4   : > { %v1438_v63 = vpop.f32.mrb[5].mxu0  ;;  %v1470_v42 = vpop.f32.mrb[5].mxu1 }
 0x4f5   : > { %v3094_v46 = vpop.f32.mrb[6].mxu0  ;;  %v3102_v48 = vpop.f32.mrb[6].mxu1 }
 0x4f6   : > { %v1488_v50 = vpack.c.bf16 %v3094_v46, %v3093_v49  ;;  %v1492_v52 = vpack.c.bf16 %v3102_v48, %v3101_v53  ;;  %v1441_v54 = vpop.f32.mrb[7].mxu0  ;;  %v1473_v56 = vpop.f32.mrb[7].mxu1 }
 0x4f7   : > { %v1487_v0 = vpack.c.bf16 %v1441_v54, %v1438_v63  ;;  %v1491_v17 = vpack.c.bf16 %v1473_v56, %v1470_v42 }
 0x4f8   : > { %1500 = vst [vmem:[#allocation3 + $0x18] sm:$0xff] %v1488_v50  ;;  %1504 = vst [vmem:[#allocation3 + $0x38] sm:$0xff] %v1492_v52 }
 0x4f9   : > { %1499 = vst [vmem:[#allocation3 + $0x10] sm:$0xff] %v1487_v0  ;;  %1503 = vst [vmem:[#allocation3 + $0x30] sm:$0xff] %v1491_v17 }
 0x4fa PF: > { %p2786_p7 = scmp.lt.s32.totalorder %s3760_s27, 2 }
 0x4fb   : > { %v1537_v18 = vld [vmem:[#allocation2] sm:$0xff] (!%p2786_p7)  ;;  %v1538_v19 = vld [vmem:[#allocation2 + $0x8] sm:$0xff] (!%p2786_p7)  ;;  %v2787_v20 = vcombine.low (!%p2786_p7), %v4052_v1, %v4054_v2  ;;  %v2791_v21 = vcombine.low (!%p2786_p7), %v4068_v9, %v4070_v10  ;;  %v1539_v22 = vld [vmem:[#allocation2 + $0x10] sm:$0xff] (!%p2786_p7)  ;;  %v2788_v24 = vcombine.low (!%p2786_p7), %v4056_v3, %v4058_v4  ;;  %v2792_v25 = vcombine.low (!%p2786_p7), %v4072_v11, %v4074_v12 }
 0x4fc   : > { %1508 = sbr.rel (%p2786_p7) target bundleno = 1538 (0x602), region = 120  ;;  %3103 = vmatprep.subr.bf16.mxu0 (!%p2786_p7), %v1537_v18  ;;  %3349 = vmatprep.subr.bf16.mxu1 (!%p2786_p7), %v1537_v18  ;;  %v1540_v23 = vld [vmem:[#allocation2 + $0x18] sm:$0xff] (!%p2786_p7)  ;;  %v1541_v1 = vld [vmem:[#allocation2 + $0x20] sm:$0xff] (!%p2786_p7)  ;;  %v1542_v2 = vld [vmem:[#allocation2 + $0x28] sm:$0xff] (!%p2786_p7)  ;;  %v2789_v26 = vcombine.low (!%p2786_p7), %v4060_v5, %v4062_v6  ;;  %v2793_v27 = vcombine.low (!%p2786_p7), %v4076_v13, %v4078_v14  ;;  %v2790_v28 = vcombine.low (!%p2786_p7), %v4064_v7, %v4066_v8 }
 0x4fd   : > { %3104 = vmatpush3.bf16.msra.mxu0 (!%p2786_p7), %v1537_v18  ;;  %3357 = vmatpush3.bf16.msra.mxu1 (!%p2786_p7), %v1537_v18  ;;  %v1543_v9 = vld [vmem:[#allocation2 + $0x30] sm:$0xff] (!%p2786_p7)  ;;  %v1544_v10 = vld [vmem:[#allocation2 + $0x38] sm:$0xff] (!%p2786_p7)  ;;  %v2794_v3 = vcombine.low (!%p2786_p7), %v4080_v15, %v4082_v16  ;;  %v1514_v4 = vld [vmem:[#allocation3 + $0x8] sm:$0xff] (!%p2786_p7) }
 0x4fe   : > { %3105 = vmatprep.subr.bf16.mxu0 (!%p2786_p7), %v1538_v19  ;;  %3350 = vmatprep.subr.bf16.mxu1 (!%p2786_p7), %v1538_v19  ;;  %v1518_v11 = vld [vmem:[#allocation3 + $0x28] sm:$0xff] (!%p2786_p7)  ;;  %v1513_v12 = vld [vmem:[#allocation3] sm:$0xff] (!%p2786_p7)  ;;  %v1523_v5 = vunpack.c.l.bf16 (!%p2786_p7), %v1514_v4  ;;  %v1524_v7 = vunpack.c.h.bf16 (!%p2786_p7), %v1514_v4 }
 0x4ff   : > { %3119 = vmatprep.mubr.bf16.mxu0 (!%p2786_p7), %v2787_v20  ;;  %3127 = vmatprep.mubr.bf16.mxu1 (!%p2786_p7), %v2791_v21  ;;  %v1517_v29 = vld [vmem:[#allocation3 + $0x20] sm:$0xff] (!%p2786_p7)  ;;  %v1531_v30 = vunpack.c.l.bf16 (!%p2786_p7), %v1518_v11  ;;  %v1521_v14 = vunpack.c.l.bf16 (!%p2786_p7), %v1513_v12  ;;  %v1532_v8 = vunpack.c.h.bf16 (!%p2786_p7), %v1518_v11  ;;  %v1522_v38 = vunpack.c.h.bf16 (!%p2786_p7), %v1513_v12  ;;  %v1516_v41 = vld [vmem:[#allocation3 + $0x18] sm:$0xff] (!%p2786_p7) }
 0x500   : > { %v1529_v31 = vunpack.c.l.bf16 (!%p2786_p7), %v1517_v29  ;;  %v1530_v39 = vunpack.c.h.bf16 (!%p2786_p7), %v1517_v29  ;;  %v1520_v45 = vld [vmem:[#allocation3 + $0x38] sm:$0xff] (!%p2786_p7)  ;;  %v1515_v62 = vld [vmem:[#allocation3 + $0x10] sm:$0xff] (!%p2786_p7)  ;;  %v1527_v50 = vunpack.c.l.bf16 (!%p2786_p7), %v1516_v41 }
 0x501   : > { %3106 = vmatpush3.bf16.msra.mxu0 (!%p2786_p7), %v1538_v19  ;;  %3358 = vmatpush3.bf16.msra.mxu1 (!%p2786_p7), %v1538_v19  ;;  %v1519_v44 = vld [vmem:[#allocation3 + $0x30] sm:$0xff] (!%p2786_p7)  ;;  %v1535_v52 = vunpack.c.l.bf16 (!%p2786_p7), %v1520_v45  ;;  %v1525_v18 = vunpack.c.l.bf16 (!%p2786_p7), %v1515_v62 }
 0x502   : > { %3107 = vmatprep.subr.bf16.mxu0 (!%p2786_p7), %v1539_v22  ;;  %3351 = vmatprep.subr.bf16.mxu1 (!%p2786_p7), %v1539_v22  ;;  %v1533_v19 = vunpack.c.l.bf16 (!%p2786_p7), %v1519_v44 }
 0x505   : > { %3108 = vmatpush3.bf16.msra.mxu0 %v1539_v22  ;;  %3359 = vmatpush3.bf16.msra.mxu1 %v1539_v22 }
 0x506   : > { %3109 = vmatprep.subr.bf16.mxu0 %v1540_v23  ;;  %3352 = vmatprep.subr.bf16.mxu1 %v1540_v23 }
 0x509   : > { %3110 = vmatpush3.bf16.msra.mxu0 %v1540_v23  ;;  %3360 = vmatpush3.bf16.msra.mxu1 %v1540_v23 }
 0x50a   : > { %3111 = vmatprep.subr.bf16.mxu0 %v1541_v1  ;;  %3353 = vmatprep.subr.bf16.mxu1 %v1541_v1 }
 0x50d   : > { %3112 = vmatpush3.bf16.msra.mxu0 %v1541_v1  ;;  %3361 = vmatpush3.bf16.msra.mxu1 %v1541_v1  ;;  %v1528_v1 = vunpack.c.h.bf16 %v1516_v41 }
 0x50e   : > { %3113 = vmatprep.subr.bf16.mxu0 %v1542_v2  ;;  %3354 = vmatprep.subr.bf16.mxu1 %v1542_v2 }
 0x511   : > { %3114 = vmatpush3.bf16.msra.mxu0 %v1542_v2  ;;  %3362 = vmatpush3.bf16.msra.mxu1 %v1542_v2  ;;  %v1536_v2 = vunpack.c.h.bf16 %v1520_v45 }
 0x512   : > { %3115 = vmatprep.subr.bf16.mxu0 %v1543_v9  ;;  %3355 = vmatprep.subr.bf16.mxu1 %v1543_v9 }
 0x515   : > { %3116 = vmatpush3.bf16.msra.mxu0 %v1543_v9  ;;  %3363 = vmatpush3.bf16.msra.mxu1 %v1543_v9 }
 0x516   : > { %3117 = vmatprep.subr.bf16.mxu0 %v1544_v10  ;;  %3356 = vmatprep.subr.bf16.mxu1 %v1544_v10 }
 0x519   : > { %3118 = vmatpush3.bf16.msra.mxu0 %v1544_v10  ;;  %3364 = vmatpush3.bf16.msra.mxu1 %v1544_v10 }
 0x51c   : > { %3120 = vmatmul.mubr.bf16.vlgmr.msra.gmra.mrb[0].mxu0 %v2788_v24  ;;  %3128 = vmatmul.mubr.bf16.vlgmr.msra.gmra.mrb[0].mxu1 %v2792_v25 }
 0x51d   : > { %3123 = vmatprep.mubr.bf16.mxu0 %v2789_v26  ;;  %3131 = vmatprep.mubr.bf16.mxu1 %v2793_v27  ;;  %v1526_v26 = vunpack.c.h.bf16 %v1515_v62  ;;  %v1534_v27 = vunpack.c.h.bf16 %v1519_v44 }
 0x524   : > { %3124 = vmatmul.mubr.bf16.gmra.mrb[4].mxu0 %v2790_v28  ;;  %3132 = vmatmul.mubr.bf16.gmra.mrb[4].mxu1 %v2794_v3 }
 0x5ef   : > { %v3121_v6 = vpop.f32.mrb[0].mxu0  ;;  %v3129_v13 = vpop.f32.mrb[0].mxu1 }
 0x5f0   : > { %v1692_v32 = vmul.f32 2.0, %v3121_v6  ;;  %v1700_v33 = vmul.f32 2.0, %v3129_v13  ;;  %v1627_v34 = vpop.f32.mrb[1].mxu0  ;;  %v1659_v35 = vpop.f32.mrb[1].mxu1 }
 0x5f1   : > { %v1690_v36 = vmul.f32 2.0, %v1627_v34  ;;  %v1698_v15 = vmul.f32 2.0, %v1659_v35  ;;  %v3122_v16 = vpop.f32.mrb[2].mxu0  ;;  %v3130_v37 = vpop.f32.mrb[2].mxu1 }
 0x5f2   : > { %v1693_v40 = vmul.f32 2.0, %v3122_v16  ;;  %v1701_v57 = vmul.f32 2.0, %v3130_v37  ;;  %v1630_v58 = vpop.f32.mrb[3].mxu0  ;;  %v1662_v59 = vpop.f32.mrb[3].mxu1  ;;  %v1708_v51 = vsub.f32 %v1692_v32, %v1523_v5  ;;  %v1716_v55 = vsub.f32 %v1700_v33, %v1531_v30 }
 0x5f3   : > { %v1691_v43 = vmul.f32 2.0, %v1630_v58  ;;  %v1699_v47 = vmul.f32 2.0, %v1662_v59  ;;  %v1706_v49 = vsub.f32 %v1690_v36, %v1521_v14  ;;  %v1714_v53 = vsub.f32 %v1698_v15, %v1529_v31 }
 0x5f4   : > { %v1709_v60 = vsub.f32 %v1693_v40, %v1524_v7  ;;  %v1717_v61 = vsub.f32 %v1701_v57, %v1532_v8 }
 0x5f5   : > { %v1707_v63 = vsub.f32 %v1691_v43, %v1522_v38  ;;  %v1715_v42 = vsub.f32 %v1699_v47, %v1530_v39 }
 0x5f6   : > { %v1723_v46 = vpack.c.bf16 %v1709_v60, %v1708_v51  ;;  %v1727_v48 = vpack.c.bf16 %v1717_v61, %v1716_v55 }
 0x5f7   : > { %v1722_v54 = vpack.c.bf16 %v1707_v63, %v1706_v49  ;;  %v1726_v56 = vpack.c.bf16 %v1715_v42, %v1714_v53  ;;  %v3125_v0 = vpop.f32.mrb[4].mxu0  ;;  %v3133_v17 = vpop.f32.mrb[4].mxu1 }
 0x5f8   : > { %1731 = vst [vmem:[#allocation3 + $0x8] sm:$0xff] %v1723_v46  ;;  %1735 = vst [vmem:[#allocation3 + $0x28] sm:$0xff] %v1727_v48  ;;  %v1696_v20 = vmul.f32 2.0, %v3125_v0  ;;  %v1704_v21 = vmul.f32 2.0, %v3133_v17  ;;  %v1643_v22 = vpop.f32.mrb[5].mxu0  ;;  %v1675_v23 = vpop.f32.mrb[5].mxu1 }
 0x5f9   : > { %1730 = vst [vmem:[#allocation3] sm:$0xff] %v1722_v54  ;;  %1734 = vst [vmem:[#allocation3 + $0x20] sm:$0xff] %v1726_v56  ;;  %v1694_v9 = vmul.f32 2.0, %v1643_v22  ;;  %v1702_v10 = vmul.f32 2.0, %v1675_v23  ;;  %v3126_v24 = vpop.f32.mrb[6].mxu0  ;;  %v3134_v25 = vpop.f32.mrb[6].mxu1 }
 0x5fa   : > { %v1697_v28 = vmul.f32 2.0, %v3126_v24  ;;  %v1705_v3 = vmul.f32 2.0, %v3134_v25  ;;  %v1646_v4 = vpop.f32.mrb[7].mxu0  ;;  %v1678_v11 = vpop.f32.mrb[7].mxu1  ;;  %v1712_v5 = vsub.f32 %v1696_v20, %v1527_v50  ;;  %v1720_v6 = vsub.f32 %v1704_v21, %v1535_v52 }
 0x5fb   : > { %v1695_v12 = vmul.f32 2.0, %v1646_v4  ;;  %v1703_v29 = vmul.f32 2.0, %v1678_v11  ;;  %v1710_v14 = vsub.f32 %v1694_v9, %v1525_v18  ;;  %v1718_v31 = vsub.f32 %v1702_v10, %v1533_v19 }
 0x5fc   : > { %v1713_v30 = vsub.f32 %v1697_v28, %v1528_v1  ;;  %v1721_v13 = vsub.f32 %v1705_v3, %v1536_v2 }
 0x5fd   : > { %v1711_v32 = vsub.f32 %v1695_v12, %v1526_v26  ;;  %v1719_v33 = vsub.f32 %v1703_v29, %v1534_v27 }
 0x5fe   : > { %v1725_v34 = vpack.c.bf16 %v1713_v30, %v1712_v5  ;;  %v1729_v35 = vpack.c.bf16 %v1721_v13, %v1720_v6 }
 0x5ff   : > { %v1724_v7 = vpack.c.bf16 %v1711_v32, %v1710_v14  ;;  %v1728_v8 = vpack.c.bf16 %v1719_v33, %v1718_v31 }
 0x600   : > { %1733 = vst [vmem:[#allocation3 + $0x18] sm:$0xff] %v1725_v34  ;;  %1737 = vst [vmem:[#allocation3 + $0x38] sm:$0xff] %v1729_v35 }
 0x601   : > { %1732 = vst [vmem:[#allocation3 + $0x10] sm:$0xff] %v1724_v7  ;;  %1736 = vst [vmem:[#allocation3 + $0x30] sm:$0xff] %v1728_v8 }
 0x602 PF: > { %v3514_v36 = vld [vmem:[%s4035_s24] sm:$0xff]   ;;  %v3515_v15 = vld [vmem:[%s4035_s24 + $0x8] sm:$0xff]   ;;  %v3516_v16 = vld [vmem:[%s4035_s24 + $0x10] sm:$0xff]  }
 0x603   : > { %3135 = vmatprep.subr.bf16.mxu0 %v3514_v36  ;;  %3365 = vmatprep.subr.bf16.mxu1 %v3514_v36  ;;  %v3517_v37 = vld [vmem:[%s4035_s24 + $0x18] sm:$0xff]   ;;  %v3518_v40 = vld [vmem:[%s4035_s24 + $0x20] sm:$0xff]   ;;  %v3519_v57 = vld [vmem:[%s4035_s24 + $0x28] sm:$0xff]  }
 0x604   : > { %3136 = vmatpush3.bf16.msra.mxu0 %v3514_v36  ;;  %3373 = vmatpush3.bf16.msra.mxu1 %v3514_v36  ;;  %v1742_v38 = vld [vmem:[#allocation3] sm:$0xff]  ;;  %v3520_v58 = vld [vmem:[%s4035_s24 + $0x30] sm:$0xff]   ;;  %v1743_v43 = vld [vmem:[#allocation3 + $0x8] sm:$0xff] }
 0x605   : > { %3137 = vmatprep.subr.bf16.mxu0 %v3515_v15  ;;  %3366 = vmatprep.subr.bf16.mxu1 %v3515_v15  ;;  %v1746_v39 = vld [vmem:[#allocation3 + $0x20] sm:$0xff]  ;;  %v1747_v47 = vld [vmem:[#allocation3 + $0x28] sm:$0xff] }
 0x606   : > { %3151 = vmatprep.mubr.bf16.mxu0 %v1742_v38  ;;  %3159 = vmatprep.mubr.bf16.mxu1 %v1746_v39  ;;  %v3521_v59 = vld [vmem:[%s4035_s24 + $0x38] sm:$0xff]  }
 0x607   : > { %v1745_v51 = vld [vmem:[#allocation3 + $0x18] sm:$0xff]  ;;  %v2804_v18 = vld [vmem:[%s4050_s19] ss:$0 sm:$0xff] (!%p2766_p12) }
 0x608   : > { %3138 = vmatpush3.bf16.msra.mxu0 %v3515_v15  ;;  %3374 = vmatpush3.bf16.msra.mxu1 %v3515_v15  ;;  %v1744_v41 = vld [vmem:[#allocation3 + $0x10] sm:$0xff]  ;;  %v1749_v55 = vld [vmem:[#allocation3 + $0x38] sm:$0xff] }
 0x609   : > { %3139 = vmatprep.subr.bf16.mxu0 %v3516_v16  ;;  %3367 = vmatprep.subr.bf16.mxu1 %v3516_v16  ;;  %v1748_v45 = vld [vmem:[#allocation3 + $0x30] sm:$0xff] }
 0x60c   : > { %3140 = vmatpush3.bf16.msra.mxu0 %v3516_v16  ;;  %3375 = vmatpush3.bf16.msra.mxu1 %v3516_v16 }
 0x60d   : > { %3141 = vmatprep.subr.bf16.mxu0 %v3517_v37  ;;  %3368 = vmatprep.subr.bf16.mxu1 %v3517_v37 }
 0x610   : > { %3142 = vmatpush3.bf16.msra.mxu0 %v3517_v37  ;;  %3376 = vmatpush3.bf16.msra.mxu1 %v3517_v37 }
 0x611   : > { %3143 = vmatprep.subr.bf16.mxu0 %v3518_v40  ;;  %3369 = vmatprep.subr.bf16.mxu1 %v3518_v40 }
 0x614   : > { %3144 = vmatpush3.bf16.msra.mxu0 %v3518_v40  ;;  %3377 = vmatpush3.bf16.msra.mxu1 %v3518_v40 }
 0x615   : > { %3145 = vmatprep.subr.bf16.mxu0 %v3519_v57  ;;  %3370 = vmatprep.subr.bf16.mxu1 %v3519_v57 }
 0x618   : > { %3146 = vmatpush3.bf16.msra.mxu0 %v3519_v57  ;;  %3378 = vmatpush3.bf16.msra.mxu1 %v3519_v57 }
 0x619   : > { %3147 = vmatprep.subr.bf16.mxu0 %v3520_v58  ;;  %3371 = vmatprep.subr.bf16.mxu1 %v3520_v58 }
 0x61c   : > { %3148 = vmatpush3.bf16.msra.mxu0 %v3520_v58  ;;  %3379 = vmatpush3.bf16.msra.mxu1 %v3520_v58 }
 0x61d   : > { %3149 = vmatprep.subr.bf16.mxu0 %v3521_v59  ;;  %3372 = vmatprep.subr.bf16.mxu1 %v3521_v59 }
 0x620   : > { %3150 = vmatpush3.bf16.msra.mxu0 %v3521_v59  ;;  %3380 = vmatpush3.bf16.msra.mxu1 %v3521_v59 }
 0x623   : > { %3152 = vmatmul.mubr.bf16.vlgmr.msra.gmra.mrb[0].mxu0 %v1743_v43  ;;  %3160 = vmatmul.mubr.bf16.vlgmr.msra.gmra.mrb[0].mxu1 %v1747_v47 }
 0x624   : > { %3155 = vmatprep.mubr.bf16.mxu0 %v1744_v41  ;;  %3163 = vmatprep.mubr.bf16.mxu1 %v1748_v45 }
 0x62b   : > { %3156 = vmatmul.mubr.bf16.gmra.mrb[4].mxu0 %v1745_v51  ;;  %3164 = vmatmul.mubr.bf16.gmra.mrb[4].mxu1 %v1749_v55 }
 0x6f6   : > { %v3153_v60 = vpop.f32.mrb[0].mxu0  ;;  %v4225_v61 = vpop.f32.mrb[0].mxu1 }
 0x6f7   : > { %v1848_v62 = vpop.f32.mrb[1].mxu0  ;;  %v4227_v44 = vpop.f32.mrb[1].mxu1  ;;  %v1923_v21 = vadd.f32 (!%p2766_p12), %v3153_v60, %v2804_v18  ;;  %v1931_v25 = vadd.f32 (!%p2766_p12), %v4225_v61, %v2804_v18 }
 0x6f8   : > { %v3154_v49 = vpop.f32.mrb[2].mxu0  ;;  %v4229_v53 = vpop.f32.mrb[2].mxu1  ;;  %v1921_v19 = vadd.f32 (!%p2766_p12), %v2804_v18, %v1848_v62  ;;  %v1929_v10 = vadd.f32 (!%p2766_p12), %v2804_v18, %v4227_v44 }
 0x6f9   : > { %v1851_v63 = vpop.f32.mrb[3].mxu0  ;;  %v4231_v42 = vpop.f32.mrb[3].mxu1  ;;  %v1924_v22 = vadd.f32 (!%p2766_p12), %v3154_v49, %v2804_v18  ;;  %1940 = vst [vmem:[#allocation4 + $0x10] sm:$0xff] (!%p2766_p12), %v1923_v21  ;;  %v1932_v26 = vadd.f32 (!%p2766_p12), %v4229_v53, %v2804_v18  ;;  %1948 = vst [vmem:[#allocation4 + $0x50] sm:$0xff] (!%p2766_p12), %v1931_v25 }
 0x6fa   : > { %v1922_v20 = vadd.f32 (!%p2766_p12), %v2804_v18, %v1851_v63  ;;  %1938 = vst [vmem:[#allocation4] sm:$0xff] (!%p2766_p12), %v1921_v19  ;;  %v1930_v24 = vadd.f32 (!%p2766_p12), %v2804_v18, %v4231_v42  ;;  %1946 = vst [vmem:[#allocation4 + $0x40] sm:$0xff] (!%p2766_p12), %v1929_v10 }
 0x6fb   : > { %1913 = sbr.rel (%p2766_p12) target bundleno = 1797 (0x705), region = 124  ;;  %1941 = vst [vmem:[#allocation4 + $0x18] sm:$0xff] (!%p2766_p12), %v1924_v22  ;;  %1949 = vst [vmem:[#allocation4 + $0x58] sm:$0xff] (!%p2766_p12), %v1932_v26 }
 0x6fc   : > { %1939 = vst [vmem:[#allocation4 + $0x8] sm:$0xff] (!%p2766_p12), %v1922_v20  ;;  %1947 = vst [vmem:[#allocation4 + $0x48] sm:$0xff] (!%p2766_p12), %v1930_v24 }
 0x6fe   : > { %v4233_v46 = vpop.f32.mrb[4].mxu0  ;;  %v4235_v48 = vpop.f32.mrb[4].mxu1 }
 0x6ff   : > { %v1864_v50 = vpop.f32.mrb[5].mxu0  ;;  %v4237_v52 = vpop.f32.mrb[5].mxu1  ;;  %v1927_v2 = vadd.f32 (!%p2766_p12), %v4233_v46, %v2804_v18  ;;  %v1935_v3 = vadd.f32 (!%p2766_p12), %v4235_v48, %v2804_v18 }
 0x700   : > { %v3158_v54 = vpop.f32.mrb[6].mxu0  ;;  %v4239_v56 = vpop.f32.mrb[6].mxu1  ;;  %v1925_v23 = vadd.f32 (!%p2766_p12), %v2804_v18, %v1864_v50  ;;  %v1933_v27 = vadd.f32 (!%p2766_p12), %v2804_v18, %v4237_v52 }
 0x701   : > { %v1867_v0 = vpop.f32.mrb[7].mxu0  ;;  %v4241_v17 = vpop.f32.mrb[7].mxu1  ;;  %v1928_v9 = vadd.f32 (!%p2766_p12), %v3158_v54, %v2804_v18  ;;  %1944 = vst [vmem:[#allocation4 + $0x30] sm:$0xff] (!%p2766_p12), %v1927_v2  ;;  %v1936_v4 = vadd.f32 (!%p2766_p12), %v4239_v56, %v2804_v18  ;;  %1952 = vst [vmem:[#allocation4 + $0x70] sm:$0xff] (!%p2766_p12), %v1935_v3 }
 0x702   : > { %v1926_v1 = vadd.f32 %v2804_v18, %v1867_v0  ;;  %1942 = vst [vmem:[#allocation4 + $0x20] sm:$0xff] %v1925_v23  ;;  %v1934_v28 = vadd.f32 %v2804_v18, %v4241_v17  ;;  %1950 = vst [vmem:[#allocation4 + $0x60] sm:$0xff] %v1933_v27 }
 0x703   : > { %1945 = vst [vmem:[#allocation4 + $0x38] sm:$0xff] %v1928_v9  ;;  %1953 = vst [vmem:[#allocation4 + $0x78] sm:$0xff] %v1936_v4 }
 0x704   : > { %1943 = vst [vmem:[#allocation4 + $0x28] sm:$0xff] %v1926_v1  ;;  %1951 = vst [vmem:[#allocation4 + $0x68] sm:$0xff] %v1934_v28 }
 0x705 PF: > { %p2805_p10 = scmp.le.s32.totalorder %s3760_s27, 0 }
 0x706   : > { %v1959_v11 = vld [vmem:[#allocation4] sm:$0xff] (!%p2805_p10)  ;;  %v1960_v12 = vld [vmem:[#allocation4 + $0x8] sm:$0xff] (!%p2805_p10)  ;;  %v1961_v29 = vld [vmem:[#allocation4 + $0x10] sm:$0xff] (!%p2805_p10) }
 0x707   : > { %1957 = sbr.rel (%p2805_p10) target bundleno = 1810 (0x712), region = 128  ;;  %v1975_v5 = vadd.f32 (!%p2805_p10), %v1959_v11, %v1848_v62  ;;  %v1976_v6 = vadd.f32 (!%p2805_p10), %v1960_v12, %v1851_v63  ;;  %v1977_v30 = vadd.f32 (!%p2805_p10), %v3153_v60, %v1961_v29  ;;  %v1962_v13 = vld [vmem:[#allocation4 + $0x18] sm:$0xff] (!%p2805_p10)  ;;  %v1967_v8 = vld [vmem:[#allocation4 + $0x40] sm:$0xff] (!%p2805_p10)  ;;  %v1968_v37 = vld [vmem:[#allocation4 + $0x48] sm:$0xff] (!%p2805_p10) }
 0x708   : > { %v1978_v32 = vadd.f32 (!%p2805_p10), %v3154_v49, %v1962_v13  ;;  %v1983_v16 = vadd.f32 (!%p2805_p10), %v1967_v8, %v4227_v44  ;;  %v1969_v38 = vld [vmem:[#allocation4 + $0x50] sm:$0xff] (!%p2805_p10)  ;;  %v1970_v39 = vld [vmem:[#allocation4 + $0x58] sm:$0xff] (!%p2805_p10)  ;;  %v1984_v40 = vadd.f32 (!%p2805_p10), %v1968_v37, %v4231_v42 }
 0x709   : > { %1991 = vst [vmem:[#allocation4] sm:$0xff] (!%p2805_p10), %v1975_v5  ;;  %1992 = vst [vmem:[#allocation4 + $0x8] sm:$0xff] (!%p2805_p10), %v1976_v6  ;;  %v1985_v57 = vadd.f32 (!%p2805_p10), %v4225_v61, %v1969_v38  ;;  %v1986_v58 = vadd.f32 (!%p2805_p10), %v4229_v53, %v1970_v39 }
 0x70a   : > { %v1966_v7 = vld [vmem:[#allocation4 + $0x38] sm:$0xff] (!%p2805_p10)  ;;  %1993 = vst [vmem:[#allocation4 + $0x10] sm:$0xff] (!%p2805_p10), %v1977_v30  ;;  %1994 = vst [vmem:[#allocation4 + $0x18] sm:$0xff] (!%p2805_p10), %v1978_v32 }
 0x70b   : > { %v1964_v31 = vld [vmem:[#allocation4 + $0x28] sm:$0xff] (!%p2805_p10)  ;;  %v1965_v35 = vld [vmem:[#allocation4 + $0x30] sm:$0xff] (!%p2805_p10)  ;;  %v1982_v15 = vadd.f32 (!%p2805_p10), %v3158_v54, %v1966_v7  ;;  %1999 = vst [vmem:[#allocation4 + $0x40] sm:$0xff] (!%p2805_p10), %v1983_v16  ;;  %v1974_v55 = vld [vmem:[#allocation4 + $0x78] sm:$0xff] (!%p2805_p10) }
 0x70c   : > { %v1963_v14 = vld [vmem:[#allocation4 + $0x20] sm:$0xff] (!%p2805_p10)  ;;  %v1980_v34 = vadd.f32 (!%p2805_p10), %v1964_v31, %v1867_v0  ;;  %v1981_v36 = vadd.f32 (!%p2805_p10), %v4233_v46, %v1965_v35  ;;  %v1972_v43 = vld [vmem:[#allocation4 + $0x68] sm:$0xff] (!%p2805_p10)  ;;  %v1973_v47 = vld [vmem:[#allocation4 + $0x70] sm:$0xff] (!%p2805_p10)  ;;  %2000 = vst [vmem:[#allocation4 + $0x48] sm:$0xff] (!%p2805_p10), %v1984_v40  ;;  %v1990_v60 = vadd.f32 (!%p2805_p10), %v4239_v56, %v1974_v55 }
 0x70d   : > { %v1979_v33 = vadd.f32 (!%p2805_p10), %v1963_v14, %v1864_v50  ;;  %v1971_v59 = vld [vmem:[#allocation4 + $0x60] sm:$0xff] (!%p2805_p10)  ;;  %1998 = vst [vmem:[#allocation4 + $0x38] sm:$0xff] (!%p2805_p10), %v1982_v15  ;;  %v1988_v45 = vadd.f32 (!%p2805_p10), %v1972_v43, %v4241_v17  ;;  %v1989_v51 = vadd.f32 (!%p2805_p10), %v4235_v48, %v1973_v47  ;;  %2001 = vst [vmem:[#allocation4 + $0x50] sm:$0xff] (!%p2805_p10), %v1985_v57 }
 0x70e   : > { %1996 = vst [vmem:[#allocation4 + $0x28] sm:$0xff] %v1980_v34  ;;  %1997 = vst [vmem:[#allocation4 + $0x30] sm:$0xff] %v1981_v36  ;;  %v1987_v41 = vadd.f32 %v1971_v59, %v4237_v52 }
 0x70f   : > { %1995 = vst [vmem:[#allocation4 + $0x20] sm:$0xff] %v1979_v33  ;;  %2002 = vst [vmem:[#allocation4 + $0x58] sm:$0xff] %v1986_v58 }
 0x710   : > { %2003 = vst [vmem:[#allocation4 + $0x60] sm:$0xff] %v1987_v41  ;;  %2004 = vst [vmem:[#allocation4 + $0x68] sm:$0xff] %v1988_v45 }
 0x711   : > { %2005 = vst [vmem:[#allocation4 + $0x70] sm:$0xff] %v1989_v51  ;;  %2006 = vst [vmem:[#allocation4 + $0x78] sm:$0xff] %v1990_v60 }
 0x712 PF: > { %p2007_p13 = scmp.eq.s32.totalorder %s3760_s27, 4 }
 0x714   : > { %p2008_p1 = pnand %p2007_p13, %p382_p0 }
 0x715   : > { %v4270_v61 = vld [vmem:[#allocation4] sm:$0xff] (!%p2008_p1)  ;;  %v4272_v62 = vld [vmem:[#allocation4 + $0x8] sm:$0xff] (!%p2008_p1)  ;;  %v4274_v44 = vld [vmem:[#allocation4 + $0x10] sm:$0xff] (!%p2008_p1) }
 0x716   : > { %2011 = sbr.rel (%p2008_p1) target bundleno = 1856 (0x740), region = 132  ;;  %v2045_v49 = vmin.f32 (!%p2008_p1), %v4270_v61, 0.0  ;;  %v2046_v53 = vmin.f32 (!%p2008_p1), %v4272_v62, 0.0  ;;  %v4278_v63 = vld [vmem:[#allocation4 + $0x18] sm:$0xff] (!%p2008_p1)  ;;  %v4280_v42 = vld [vmem:[#allocation4 + $0x20] sm:$0xff] (!%p2008_p1)  ;;  %v2047_v46 = vmin.f32 (!%p2008_p1), %v4274_v44, 0.0 }
 0x717   : > { %v2048_v48 = vmin.f32 (!%p2008_p1), %v4278_v63, 0.0  ;;  %v2049_v18 = vmin.f32 (!%p2008_p1), %v4280_v42, 0.0  ;;  %v4293_v22 = vld [vmem:[#allocation4 + $0x40] sm:$0xff] (!%p2008_p1)  ;;  %v4295_v23 = vld [vmem:[#allocation4 + $0x48] sm:$0xff] (!%p2008_p1)  ;;  %v4302_v27 = vld [vmem:[#allocation4 + $0x58] sm:$0xff] (!%p2008_p1)  ;;  %vm2029_vm0 = vcmp.gt.f32.partialorder (!%p2008_p1), %v4270_v61, 0.0 }
 0x718   : > { %v2061_v54 = vmul.f32 (!%p2008_p1), 1.442695, %v2045_v49  ;;  %v2063_v56 = vmul.f32 (!%p2008_p1), 1.442695, %v2046_v53  ;;  %v2065_v0 = vmul.f32 (!%p2008_p1), 1.442695, %v2047_v46 }
 0x719   : > { %v4284_v50 = vld [vmem:[#allocation4 + $0x28] sm:$0xff] (!%p2008_p1)  ;;  %v4286_v52 = vld [vmem:[#allocation4 + $0x30] sm:$0xff] (!%p2008_p1)  ;;  %v2067_v17 = vmul.f32 (!%p2008_p1), 1.442695, %v2048_v48  ;;  %v4290_v20 = vld [vmem:[#allocation4 + $0x38] sm:$0xff] (!%p2008_p1)  ;;  %v2053_v25 = vmin.f32 (!%p2008_p1), %v4293_v22, 0.0 }
 0x71a   : > { %v2050_v19 = vmin.f32 (!%p2008_p1), %v4284_v50, 0.0  ;;  %3522 = vpow2.f32 (!%p2008_p1), %v2061_v54  ;;  %v2051_v21 = vmin.f32 (!%p2008_p1), %v4286_v52, 0.0  ;;  %v2069_v1 = vmul.f32 (!%p2008_p1), 1.442695, %v2049_v18  ;;  %v4298_v24 = vld [vmem:[#allocation4 + $0x50] sm:$0xff] (!%p2008_p1)  ;;  %v4304_v3 = vld [vmem:[#allocation4 + $0x60] sm:$0xff] (!%p2008_p1) }
 0x71b   : > { %3524 = vpow2.f32 (!%p2008_p1), %v2063_v56  ;;  %v2052_v9 = vmin.f32 (!%p2008_p1), %v4290_v20, 0.0  ;;  %v2054_v26 = vmin.f32 (!%p2008_p1), %v4295_v23, 0.0  ;;  %v4306_v4 = vld [vmem:[#allocation4 + $0x68] sm:$0xff] (!%p2008_p1)  ;;  %v2077_v11 = vmul.f32 (!%p2008_p1), 1.442695, %v2053_v25  ;;  %v4312_v6 = vld [vmem:[#allocation4 + $0x70] sm:$0xff] (!%p2008_p1) }
 0x71c   : > { %v2071_v2 = vmul.f32 (!%p2008_p1), 1.442695, %v2050_v19  ;;  %3526 = vpow2.f32 (!%p2008_p1), %v2065_v0  ;;  %v2073_v10 = vmul.f32 (!%p2008_p1), 1.442695, %v2051_v21  ;;  %v2055_v29 = vmin.f32 (!%p2008_p1), %v4298_v24, 0.0  ;;  %v4316_v31 = vld [vmem:[#allocation4 + $0x78] sm:$0xff] (!%p2008_p1) }
 0x71d   : > { %3528 = vpow2.f32 %v2067_v17  ;;  %v2075_v28 = vmul.f32 1.442695, %v2052_v9  ;;  %v2079_v12 = vmul.f32 1.442695, %v2054_v26  ;;  %vm2030_vm1 = vcmp.gt.f32.partialorder %v4272_v62, 0.0 }
 0x71e   : > { %3530 = vpow2.f32 %v2069_v1  ;;  %v2056_v5 = vmin.f32 %v4302_v27, 0.0  ;;  %v2081_v30 = vmul.f32 1.442695, %v2055_v29  ;;  %v2057_v13 = vmin.f32 %v4304_v3, 0.0 }
 0x71f   : > { %3532 = vpow2.f32 %v2071_v2  ;;  %v2058_v14 = vmin.f32 %v4306_v4, 0.0  ;;  %vm2031_vm2 = vcmp.gt.f32.partialorder %v4274_v44, 0.0  ;;  %vm2032_vm3 = vcmp.gt.f32.partialorder %v4278_v63, 0.0 }
 0x720   : > { %3534 = vpow2.f32 %v2073_v10  ;;  %v2083_v32 = vmul.f32 1.442695, %v2056_v5  ;;  %v2085_v33 = vmul.f32 1.442695, %v2057_v13  ;;  %v2059_v35 = vmin.f32 %v4312_v6, 0.0 }
 0x721   : > { %3536 = vpow2.f32 %v2075_v28  ;;  %v2087_v34 = vmul.f32 1.442695, %v2058_v14  ;;  %vm2033_vm4 = vcmp.gt.f32.partialorder %v4280_v42, 0.0  ;;  %vm2034_vm5 = vcmp.gt.f32.partialorder %v4284_v50, 0.0 }
 0x722   : > { %3538 = vpow2.f32 %v2077_v11  ;;  %v2060_v8 = vmin.f32 %v4316_v31, 0.0  ;;  %vm2035_vm6 = vcmp.gt.f32.partialorder %v4286_v52, 0.0  ;;  %v2089_v16 = vmul.f32 1.442695, %v2059_v35 }
 0x723   : > { %3540 = vpow2.f32 %v2079_v12  ;;  %vm2036_vm7 = vcmp.gt.f32.partialorder %v4290_v20, 0.0  ;;  %vm2037_vm8 = vcmp.gt.f32.partialorder %v4293_v22, 0.0  ;;  %vm2038_vm9 = vcmp.gt.f32.partialorder %v4295_v23, 0.0 }
 0x724   : > { %v3523_v7 = vpop.eup %3522  ;;  %3542 = vpow2.f32 %v2081_v30  ;;  %v2091_v39 = vmul.f32 1.442695, %v2060_v8  ;;  %vm2039_vm10 = vcmp.gt.f32.partialorder %v4298_v24, 0.0  ;;  %vm2040_vm11 = vcmp.gt.f32.partialorder %v4302_v27, 0.0 }
 0x725   : > { %v3525_v36 = vpop.eup %3524  ;;  %v2806_v15 = vadd.f32 -1.0, %v3523_v7  ;;  %3544 = vpow2.f32 %v2083_v32  ;;  %vm2041_vm12 = vcmp.gt.f32.partialorder %v4304_v3, 0.0  ;;  %vm2042_vm13 = vcmp.gt.f32.partialorder %v4306_v4, 0.0 }
 0x726   : > { %v3527_v37 = vpop.eup %3526  ;;  %v2807_v38 = vadd.f32 -1.0, %v3525_v36  ;;  %3546 = vpow2.f32 %v2085_v33  ;;  %vm2043_vm14 = vcmp.gt.f32.partialorder %v4312_v6, 0.0  ;;  %vm2044_vm15 = vcmp.gt.f32.partialorder %v4316_v31, 0.0 }
 0x727   : > { %v3529_v40 = vpop.eup %3528  ;;  %v2109_v57 = vmul.f32 1.6732632, %v2806_v15  ;;  %v2808_v58 = vadd.f32 -1.0, %v3527_v37  ;;  %3548 = vpow2.f32 %v2087_v34 }
 0x728   : > { %v3531_v59 = vpop.eup %3530  ;;  %v2110_v43 = vmul.f32 1.6732632, %v2807_v38  ;;  %v2809_v47 = vadd.f32 -1.0, %v3529_v40  ;;  %3550 = vpow2.f32 %v2089_v16 }
 0x729   : > { %v3533_v41 = vpop.eup %3532  ;;  %v2125_v45 = vsel %vm2029_vm0, %v4270_v61, %v2109_v57  ;;  %v2111_v51 = vmul.f32 1.6732632, %v2808_v58  ;;  %v2810_v55 = vadd.f32 -1.0, %v3531_v59  ;;  %3552 = vpow2.f32 %v2091_v39 }
 0x72a   : > { %v3535_v60 = vpop.eup %3534  ;;  %v2126_v49 = vsel %vm2030_vm1, %v4272_v62, %v2110_v43  ;;  %v2141_v53 = vmul.f32 1.050701, %v2125_v45  ;;  %v2112_v46 = vmul.f32 1.6732632, %v2809_v47  ;;  %v2811_v48 = vadd.f32 -1.0, %v3533_v41 }
 0x72b   : > { %v3537_v54 = vpop.eup %3536  ;;  %v2142_v56 = vmul.f32 1.050701, %v2126_v49  ;;  %v2127_v61 = vsel %vm2031_vm2, %v4274_v44, %v2111_v51  ;;  %v2113_v0 = vmul.f32 1.6732632, %v2810_v55  ;;  %v2812_v17 = vadd.f32 -1.0, %v3535_v60 }
 0x72c   : > { %v3539_v18 = vpop.eup %3538  ;;  %v2128_v62 = vsel %vm2032_vm3, %v4278_v63, %v2112_v46  ;;  %v2143_v19 = vmul.f32 1.050701, %v2127_v61  ;;  %v2114_v21 = vmul.f32 1.6732632, %v2811_v48  ;;  %v2813_v1 = vadd.f32 -1.0, %v3537_v54 }
 0x72d   : > { %v3541_v2 = vpop.eup %3540  ;;  %v2157_v9 = vpack.c.bf16 %v2142_v56, %v2141_v53  ;;  %v2144_v10 = vmul.f32 1.050701, %v2128_v62  ;;  %v2129_v44 = vsel %vm2033_vm4, %v4280_v42, %v2113_v0  ;;  %v2115_v25 = vmul.f32 1.6732632, %v2812_v17 }
 0x72e   : > { %v3543_v26 = vpop.eup %3542  ;;  %v2130_v28 = vsel %vm2034_vm5, %v4284_v50, %v2114_v21  ;;  %v2145_v11 = vmul.f32 1.050701, %v2129_v44  ;;  %v2116_v12 = vmul.f32 1.6732632, %v2813_v1  ;;  %v2814_v29 = vadd.f32 -1.0, %v3539_v18 }
 0x72f   : > { %v3545_v63 = vpop.eup %3544  ;;  %2169 = vst [vmem:[#allocation5] sm:$0xff] %v2157_v9  ;;  %v2158_v5 = vpack.c.bf16 %v2144_v10, %v2143_v19  ;;  %v2146_v30 = vmul.f32 1.050701, %v2130_v28  ;;  %v2131_v13 = vsel %vm2035_vm6, %v4286_v52, %v2115_v25  ;;  %v2815_v42 = vadd.f32 -1.0, %v3541_v2 }
 0x730   : > { %v3547_v14 = vpop.eup %3546  ;;  %v2132_v50 = vsel %vm2036_vm7, %v4290_v20, %v2116_v12  ;;  %v2147_v32 = vmul.f32 1.050701, %v2131_v13  ;;  %v2117_v33 = vmul.f32 1.6732632, %v2814_v29  ;;  %v2816_v34 = vadd.f32 -1.0, %v3543_v26 }
 0x731   : > { %v3549_v35 = vpop.eup %3548  ;;  %2170 = vst [vmem:[#allocation5 + $0x8] sm:$0xff] %v2158_v5  ;;  %v2159_v7 = vpack.c.bf16 %v2146_v30, %v2145_v11  ;;  %v2148_v8 = vmul.f32 1.050701, %v2132_v50  ;;  %v2118_v36 = vmul.f32 1.6732632, %v2815_v42  ;;  %v2817_v15 = vadd.f32 -1.0, %v3545_v63 }
 0x732   : > { %v3551_v16 = vpop.eup %3550  ;;  %v2133_v52 = vsel %vm2037_vm8, %v4293_v22, %v2117_v33  ;;  %v2119_v37 = vmul.f32 1.6732632, %v2816_v34  ;;  %v2818_v38 = vadd.f32 -1.0, %v3547_v14  ;;  %v2819_v39 = vadd.f32 -1.0, %v3549_v35 }
 0x733   : > { %v3553_v40 = vpop.eup %3552  ;;  %2171 = vst [vmem:[#allocation5 + $0x10] sm:$0xff] %v2159_v7  ;;  %v2160_v20 = vpack.c.bf16 %v2148_v8, %v2147_v32  ;;  %v2134_v57 = vsel %vm2038_vm9, %v4295_v23, %v2118_v36  ;;  %v2149_v58 = vmul.f32 1.050701, %v2133_v52  ;;  %v2120_v59 = vmul.f32 1.6732632, %v2817_v15 }
 0x734   : > { %v2150_v43 = vmul.f32 1.050701, %v2134_v57  ;;  %v2135_v47 = vsel %vm2039_vm10, %v4298_v24, %v2119_v37  ;;  %v2121_v41 = vmul.f32 1.6732632, %v2818_v38  ;;  %v2122_v45 = vmul.f32 1.6732632, %v2819_v39 }
 0x735   : > { %2172 = vst [vmem:[#allocation5 + $0x18] sm:$0xff] %v2160_v20  ;;  %v2136_v22 = vsel %vm2040_vm11, %v4302_v27, %v2120_v59  ;;  %v2151_v51 = vmul.f32 1.050701, %v2135_v47  ;;  %v2820_v55 = vadd.f32 -1.0, %v3551_v16  ;;  %v2821_v60 = vadd.f32 -1.0, %v3553_v40 }
 0x736   : > { %v2161_v49 = vpack.c.bf16 %v2150_v43, %v2149_v58  ;;  %v2152_v53 = vmul.f32 1.050701, %v2136_v22  ;;  %v2137_v23 = vsel %vm2041_vm12, %v4304_v3, %v2121_v41  ;;  %v2138_v24 = vsel %vm2042_vm13, %v4306_v4, %v2122_v45 }
 0x737   : > { %v2153_v46 = vmul.f32 1.050701, %v2137_v23  ;;  %v2154_v48 = vmul.f32 1.050701, %v2138_v24  ;;  %v2123_v54 = vmul.f32 1.6732632, %v2820_v55 }
 0x738   : > { %2173 = vst [vmem:[#allocation5 + $0x20] sm:$0xff] %v2161_v49  ;;  %v2162_v56 = vpack.c.bf16 %v2152_v53, %v2151_v51  ;;  %v2124_v61 = vmul.f32 1.6732632, %v2821_v60 }
 0x739   : > { %v2163_v27 = vpack.c.bf16 %v2154_v48, %v2153_v46  ;;  %v2139_v0 = vsel %vm2043_vm14, %v4312_v6, %v2123_v54 }
 0x73a   : > { %2174 = vst [vmem:[#allocation5 + $0x28] sm:$0xff] %v2162_v56  ;;  %v2140_v3 = vsel %vm2044_vm15, %v4316_v31, %v2124_v61  ;;  %v2155_v17 = vmul.f32 1.050701, %v2139_v0 }
 0x73b   : > { %2175 = vst [vmem:[#allocation5 + $0x30] sm:$0xff] %v2163_v27  ;;  %v2156_v18 = vmul.f32 1.050701, %v2140_v3 }
 0x73d   : > { %v2164_v4 = vpack.c.bf16 %v2156_v18, %v2155_v17 }
 0x73f   : > { %2176 = vst [vmem:[#allocation5 + $0x38] sm:$0xff] %v2164_v4 }
 0x740 PF: > { %p2177_p0 = scmp.eq.s32.totalorder %s3764_s28, 1 }
 0x742   : > { %p4385_p5 = pnand %p2177_p0, %p2007_p13 }
 0x743   : > { %v2327_v6 = vld [vmem:[%s4647_s4] sm:$0xff] (!%p4385_p5)  ;;  %v3784_v31 = vmov (!%p4385_p5), 0.0|0.0   ;;  %v2328_v62 = vld [vmem:[%s4647_s4 + $0x8] sm:$0xff] (!%p4385_p5)  ;;  %vm3785_vm0 = vmmov (!%p4385_p5), 0   ;;  %v3786_v19 = vmov (!%p4385_p5), 0.0   ;;  %v2329_v2 = vld [vmem:[%s4647_s4 + $0x10] sm:$0xff] (!%p4385_p5) }
 0x744   : > { %2181 = sbr.rel (%p4385_p5) target bundleno = 2204 (0x89c), region = 136  ;;  %2344 = vxpose.xlu0.b32.start [1/16] (narrow) (!%p4385_p5), %v2327_v6, 8  ;;  %3237 = vmatprep.subr.bf16.mxu0 (!%p4385_p5), %v3784_v31  ;;  %v4398_v21 = vld [vmem:[#allocation4] sm:$0xff] (!%p4385_p5)  ;;  %v4400_v1 = vld [vmem:[#allocation4 + $0x8] sm:$0xff] (!%p4385_p5)  ;;  %v4407_v44 = vld [vmem:[#allocation4 + $0x10] sm:$0xff] (!%p4385_p5) }
 0x745   : > { %3199 = vmatprep.mubr.msk.f32.mxu0 (!%p4385_p5), %vm3785_vm0, %v3786_v19  ;;  %v2215_v9 = vmin.f32 (!%p4385_p5), %v4398_v21, 0.0  ;;  %v2216_v10 = vmin.f32 (!%p4385_p5), %v4400_v1, 0.0  ;;  %v4409_v25 = vld [vmem:[#allocation4 + $0x18] sm:$0xff] (!%p4385_p5)  ;;  %v2217_v26 = vmin.f32 (!%p4385_p5), %v4407_v44, 0.0  ;;  %v4413_v11 = vld [vmem:[#allocation4 + $0x20] sm:$0xff] (!%p4385_p5)  ;;  %v4415_v12 = vld [vmem:[#allocation4 + $0x28] sm:$0xff] (!%p4385_p5) }
 0x746   : > { %v2218_v28 = vmin.f32 (!%p4385_p5), %v4409_v25, 0.0  ;;  %v2330_v29 = vld [vmem:[%s4647_s4 + $0x18] sm:$0xff] (!%p4385_p5)  ;;  %v2219_v42 = vmin.f32 (!%p4385_p5), %v4413_v11, 0.0  ;;  %v2220_v14 = vmin.f32 (!%p4385_p5), %v4415_v12, 0.0  ;;  %v4422_v50 = vld [vmem:[#allocation4 + $0x30] sm:$0xff] (!%p4385_p5)  ;;  %v4426_v33 = vld [vmem:[#allocation4 + $0x40] sm:$0xff] (!%p4385_p5) }
 0x747   : > { %v2231_v63 = vmul.f32 (!%p4385_p5), 1.442695, %v2215_v9  ;;  %v2233_v5 = vmul.f32 (!%p4385_p5), 1.442695, %v2216_v10  ;;  %v2235_v30 = vmul.f32 (!%p4385_p5), 1.442695, %v2217_v26 }
 0x748   : > { %2345 = vxpose.xlu0.b32.cont [2/16] (narrow) (!%p4385_p5), %v2328_v62, 8  ;;  %v2237_v13 = vmul.f32 (!%p4385_p5), 1.442695, %v2218_v28  ;;  %v4424_v32 = vld [vmem:[#allocation4 + $0x38] sm:$0xff] (!%p4385_p5)  ;;  %v2239_v34 = vmul.f32 (!%p4385_p5), 1.442695, %v2219_v42 }
 0x749   : > { %3554 = vpow2.f32 (!%p4385_p5), %v2231_v63  ;;  %v4428_v35 = vld [vmem:[#allocation4 + $0x48] sm:$0xff] (!%p4385_p5)  ;;  %v2241_v7 = vmul.f32 (!%p4385_p5), 1.442695, %v2220_v14  ;;  %v2221_v8 = vmin.f32 (!%p4385_p5), %v4422_v50, 0.0  ;;  %v2222_v36 = vmin.f32 (!%p4385_p5), %v4424_v32, 0.0  ;;  %v2331_v15 = vld [vmem:[%s4647_s4 + $0x20] sm:$0xff] (!%p4385_p5) }
 0x74a   : > { %3556 = vpow2.f32 (!%p4385_p5), %v2233_v5  ;;  %v2223_v16 = vmin.f32 (!%p4385_p5), %v4426_v33, 0.0  ;;  %v4436_v52 = vld [vmem:[#allocation4 + $0x50] sm:$0xff] (!%p4385_p5)  ;;  %v4438_v37 = vld [vmem:[#allocation4 + $0x58] sm:$0xff] (!%p4385_p5)  ;;  %v2224_v40 = vmin.f32 (!%p4385_p5), %v4428_v35, 0.0  ;;  %v4441_v20 = vld [vmem:[#allocation4 + $0x60] sm:$0xff] (!%p4385_p5)  ;;  %vm2199_vm1 = vcmp.gt.f32.partialorder (!%p4385_p5), %v4398_v21, 0.0 }
 0x74b   : > { %3558 = vpow2.f32 %v2235_v30  ;;  %v2243_v38 = vmul.f32 1.442695, %v2221_v8  ;;  %v2245_v39 = vmul.f32 1.442695, %v2222_v36  ;;  %v4443_v58 = vld [vmem:[#allocation4 + $0x68] sm:$0xff]  ;;  %v2225_v43 = vmin.f32 %v4436_v52, 0.0 }
 0x74c   : > { %2346 = vxpose.xlu0.b32.cont [3/16] (narrow) %v2329_v2, 8  ;;  %3560 = vpow2.f32 %v2237_v13  ;;  %v2247_v57 = vmul.f32 1.442695, %v2223_v16  ;;  %v2249_v59 = vmul.f32 1.442695, %v2224_v40  ;;  %v2226_v47 = vmin.f32 %v4438_v37, 0.0 }
 0x74d   : > { %3562 = vpow2.f32 %v2239_v34  ;;  %vm2200_vm2 = vcmp.gt.f32.partialorder %v4400_v1, 0.0  ;;  %v2227_v41 = vmin.f32 %v4441_v20, 0.0  ;;  %v4450_v45 = vld [vmem:[#allocation4 + $0x70] sm:$0xff]  ;;  %v4452_v22 = vld [vmem:[#allocation4 + $0x78] sm:$0xff]  ;;  %v2332_v51 = vld [vmem:[%s4647_s4 + $0x28] sm:$0xff]  ;;  %v2228_v49 = vmin.f32 %v4443_v58, 0.0 }
 0x74e   : > { %3564 = vpow2.f32 %v2241_v7  ;;  %v2251_v55 = vmul.f32 1.442695, %v2225_v43  ;;  %v2253_v60 = vmul.f32 1.442695, %v2226_v47  ;;  %vm2201_vm3 = vcmp.gt.f32.partialorder %v4407_v44, 0.0  ;;  %v2333_v27 = vld [vmem:[%s4647_s4 + $0x30] sm:$0xff] }
 0x74f   : > { %3566 = vpow2.f32 %v2243_v38  ;;  %vm2202_vm4 = vcmp.gt.f32.partialorder %v4409_v25, 0.0  ;;  %v2255_v53 = vmul.f32 1.442695, %v2227_v41  ;;  %v2257_v24 = vmul.f32 1.442695, %v2228_v49  ;;  %v2334_v63 = vld [vmem:[%s4647_s4 + $0x38] sm:$0xff] }
 0x750   : > { %2347 = vxpose.xlu0.b32.cont [4/16] (narrow) %v2330_v29, 8  ;;  %3568 = vpow2.f32 %v2245_v39  ;;  %v2229_v46 = vmin.f32 %v4450_v45, 0.0  ;;  %v2230_v48 = vmin.f32 %v4452_v22, 0.0  ;;  %vm2203_vm5 = vcmp.gt.f32.partialorder %v4413_v11, 0.0  ;;  %v2335_v47 = vld [vmem:[%s4647_s4 + $0x40] sm:$0xff] }
 0x751   : > { %3570 = vpow2.f32 %v2247_v57  ;;  %vm2204_vm6 = vcmp.gt.f32.partialorder %v4415_v12, 0.0  ;;  %vm2205_vm7 = vcmp.gt.f32.partialorder %v4422_v50, 0.0  ;;  %vm2206_vm8 = vcmp.gt.f32.partialorder %v4424_v32, 0.0 }
 0x752   : > { %3572 = vpow2.f32 %v2249_v59  ;;  %v2259_v3 = vmul.f32 1.442695, %v2229_v46  ;;  %v2261_v17 = vmul.f32 1.442695, %v2230_v48  ;;  %vm2207_vm9 = vcmp.gt.f32.partialorder %v4426_v33, 0.0 }
 0x753   : > { %v3555_v23 = vpop.eup %3554  ;;  %3574 = vpow2.f32 %v2251_v55  ;;  %vm2208_vm10 = vcmp.gt.f32.partialorder %v4428_v35, 0.0  ;;  %vm2209_vm11 = vcmp.gt.f32.partialorder %v4436_v52, 0.0  ;;  %vm2210_vm12 = vcmp.gt.f32.partialorder %v4438_v37, 0.0 }
 0x754   : > { %2348 = vxpose.xlu0.b32.cont [5/16] (narrow) %v2331_v15, 8  ;;  %v3557_v54 = vpop.eup %3556  ;;  %v2822_v56 = vadd.f32 -1.0, %v3555_v23  ;;  %3576 = vpow2.f32 %v2253_v60  ;;  %vm2211_vm13 = vcmp.gt.f32.partialorder %v4441_v20, 0.0  ;;  %vm2212_vm14 = vcmp.gt.f32.partialorder %v4443_v58, 0.0 }
 0x755   : > { %v3559_v61 = vpop.eup %3558  ;;  %v2823_v0 = vadd.f32 -1.0, %v3557_v54  ;;  %3578 = vpow2.f32 %v2255_v53  ;;  %vm2213_vm15 = vcmp.gt.f32.partialorder %v4450_v45, 0.0  ;;  %vm2214_vm0 = vcmp.gt.f32.partialorder %v4452_v22, 0.0 }
 0x756   : > { %v3561_v18 = vpop.eup %3560  ;;  %v2279_v4 = vmul.f32 1.6732632, %v2822_v56  ;;  %v2824_v6 = vadd.f32 -1.0, %v3559_v61  ;;  %3580 = vpow2.f32 %v2257_v24 }
 0x757   : > { %v3563_v62 = vpop.eup %3562  ;;  %v2280_v19 = vmul.f32 1.6732632, %v2823_v0  ;;  %v2825_v2 = vadd.f32 -1.0, %v3561_v18  ;;  %3582 = vpow2.f32 %v2259_v3 }
 0x758   : > { %2349 = vxpose.xlu0.b32.cont [6/16] (narrow) %v2332_v51, 8  ;;  %v3565_v9 = vpop.eup %3564  ;;  %v2295_v10 = vsel %vm2199_vm1, %v4398_v21, %v2279_v4  ;;  %v2281_v26 = vmul.f32 1.6732632, %v2824_v6  ;;  %v2826_v28 = vadd.f32 -1.0, %v3563_v62  ;;  %3584 = vpow2.f32 %v2261_v17 }
 0x759   : > { %v3567_v29 = vpop.eup %3566  ;;  %v2296_v5 = vsel %vm2200_vm2, %v4400_v1, %v2280_v19  ;;  %v2311_v30 = vmul.f32 1.050701, %v2295_v10  ;;  %v2282_v13 = vmul.f32 1.6732632, %v2825_v2  ;;  %v2827_v42 = vadd.f32 -1.0, %v3565_v9  ;;  %v2337_v9 = vld [vmem:[%s4647_s4 + $0x50] sm:$0xff] }
 0x75a   : > { %v3569_v14 = vpop.eup %3568  ;;  %v2312_v34 = vmul.f32 1.050701, %v2296_v5  ;;  %v2297_v21 = vsel %vm2201_vm3, %v4407_v44, %v2281_v26  ;;  %v2283_v7 = vmul.f32 1.6732632, %v2826_v28  ;;  %v2828_v8 = vadd.f32 -1.0, %v3567_v29 }
 0x75b   : > { %v3571_v36 = vpop.eup %3570  ;;  %v2298_v15 = vsel %vm2202_vm4, %v4409_v25, %v2282_v13  ;;  %v2313_v16 = vmul.f32 1.050701, %v2297_v21  ;;  %v2284_v38 = vmul.f32 1.6732632, %v2827_v42  ;;  %v2829_v39 = vadd.f32 -1.0, %v3569_v14  ;;  %v2338_v13 = vld [vmem:[%s4647_s4 + $0x58] sm:$0xff] }
 0x75c   : > { %2350 = vxpose.xlu0.b32.cont [7/16] (narrow) %v2333_v27, 8  ;;  %v3573_v1 = vpop.eup %3572  ;;  %v3238_v40 = vpack.c.bf16 %v2312_v34, %v2311_v30  ;;  %v2314_v57 = vmul.f32 1.050701, %v2298_v15  ;;  %v2299_v59 = vsel %vm2203_vm5, %v4413_v11, %v2283_v7  ;;  %v2285_v43 = vmul.f32 1.6732632, %v2828_v8  ;;  %v2339_v8 = vld [vmem:[%s4647_s4 + $0x60] sm:$0xff] }
 0x75d   : > { %v3575_v44 = vpop.eup %3574  ;;  %v2300_v25 = vsel %vm2204_vm6, %v4415_v12, %v2284_v38  ;;  %v2315_v41 = vmul.f32 1.050701, %v2299_v59  ;;  %v2286_v51 = vmul.f32 1.6732632, %v2829_v39  ;;  %v2830_v55 = vadd.f32 -1.0, %v3571_v36  ;;  %v2340_v38 = vld [vmem:[%s4647_s4 + $0x68] sm:$0xff] }
 0x75e   : > { %v3577_v60 = vpop.eup %3576  ;;  %3239 = vmatpush3.bf16.msra.mxu0 %v3238_v40  ;;  %v3241_v49 = vpack.c.bf16 %v2314_v57, %v2313_v16  ;;  %v2316_v53 = vmul.f32 1.050701, %v2300_v25  ;;  %v2301_v11 = vsel %vm2205_vm7, %v4422_v50, %v2285_v43  ;;  %v2831_v23 = vadd.f32 -1.0, %v3573_v1  ;;  %v2336_v50 = vld [vmem:[%s4647_s4 + $0x48] sm:$0xff]  ;;  %v2341_v57 = vld [vmem:[%s4647_s4 + $0x70] sm:$0xff]  ;;  %v2343_v43 = vld [vmem:[#allocation6] sm:$0xff] }
 0x75f   : > { %v3579_v24 = vpop.eup %3578  ;;  %3240 = vmatprep.subr.bf16.mxu0 %v3784_v31  ;;  %v2302_v46 = vsel %vm2206_vm8, %v4424_v32, %v2286_v51  ;;  %v2287_v12 = vmul.f32 1.6732632, %v2830_v55  ;;  %v2832_v48 = vadd.f32 -1.0, %v3575_v44  ;;  %v2833_v61 = vadd.f32 -1.0, %v3577_v60 }
 0x760   : > { %2351 = vxpose.xlu0.b32.cont [8/16] (narrow) %v2334_v63, 8  ;;  %v3581_v54 = vpop.eup %3580  ;;  %v2288_v56 = vmul.f32 1.6732632, %v2831_v23  ;;  %v2317_v0 = vmul.f32 1.050701, %v2301_v11  ;;  %v3244_v32 = vpack.c.bf16 %v2316_v53, %v2315_v41  ;;  %v2834_v4 = vadd.f32 -1.0, %v3579_v24 }
 0x761   : > { %v3583_v27 = vpop.eup %3582  ;;  %v2318_v3 = vmul.f32 1.050701, %v2302_v46  ;;  %v2289_v18 = vmul.f32 1.6732632, %v2832_v48  ;;  %v2303_v6 = vsel %vm2207_vm9, %v4426_v33, %v2287_v12  ;;  %v2290_v19 = vmul.f32 1.6732632, %v2833_v61 }
 0x762   : > { %v3585_v17 = vpop.eup %3584  ;;  %3242 = vmatpush3.bf16.msra.mxu0 %v3241_v49  ;;  %v2304_v62 = vsel %vm2208_vm10, %v4428_v35, %v2288_v56  ;;  %v2835_v2 = vadd.f32 -1.0, %v3581_v54  ;;  %v2319_v26 = vmul.f32 1.050701, %v2303_v6  ;;  %v2291_v63 = vmul.f32 1.6732632, %v2834_v4 }
 0x763   : > { %3243 = vmatprep.subr.bf16.mxu0 %v3784_v31  ;;  %v3247_v10 = vpack.c.bf16 %v2318_v3, %v2317_v0  ;;  %v2320_v28 = vmul.f32 1.050701, %v2304_v62  ;;  %v2305_v29 = vsel %vm2209_vm11, %v4436_v52, %v2289_v18  ;;  %v2306_v33 = vsel %vm2210_vm12, %v4438_v37, %v2290_v19 }
 0x764   : > { %2352 = vxpose.xlu0.b32.cont [9/16] (narrow) %v2335_v47, 8  ;;  %v2292_v35 = vmul.f32 1.6732632, %v2835_v2  ;;  %v2836_v5 = vadd.f32 -1.0, %v3583_v27  ;;  %v2837_v30 = vadd.f32 -1.0, %v3585_v17  ;;  %v2307_v37 = vsel %vm2211_vm13, %v4441_v20, %v2291_v63 }
 0x765   : > { %v3250_v42 = vpack.c.bf16 %v2320_v28, %v2319_v26  ;;  %v2321_v52 = vmul.f32 1.050701, %v2305_v29  ;;  %v2322_v14 = vmul.f32 1.050701, %v2306_v33  ;;  %v2323_v15 = vmul.f32 1.050701, %v2307_v37 }
 0x766   : > { %3245 = vmatpush3.bf16.msra.mxu0 %v3244_v32  ;;  %v2308_v34 = vsel %vm2212_vm14, %v4443_v58, %v2292_v35  ;;  %v2293_v21 = vmul.f32 1.6732632, %v2836_v5  ;;  %v2294_v7 = vmul.f32 1.6732632, %v2837_v30 }
 0x767   : > { %3246 = vmatprep.subr.bf16.mxu0 %v3784_v31  ;;  %v3253_v36 = vpack.c.bf16 %v2322_v14, %v2321_v52  ;;  %v2324_v16 = vmul.f32 1.050701, %v2308_v34 }
 0x768   : > { %2353 = vxpose.xlu0.b32.cont [10/16] (narrow) %v2336_v50, 8  ;;  %v2309_v20 = vsel %vm2213_vm15, %v4450_v45, %v2293_v21  ;;  %v2310_v58 = vsel %vm2214_vm0, %v4452_v22, %v2294_v7  ;;  %v2342_v22 = vld [vmem:[%s4647_s4 + $0x78] sm:$0xff] }
 0x769   : > { %v3256_v39 = vpack.c.bf16 %v2324_v16, %v2323_v15  ;;  %v2325_v1 = vmul.f32 1.050701, %v2309_v20  ;;  %v2326_v40 = vmul.f32 1.050701, %v2310_v58 }
 0x76a   : > { %3248 = vmatpush3.bf16.msra.mxu0 %v3247_v10 }
 0x76b   : > { %3249 = vmatprep.subr.bf16.mxu0 %v3784_v31  ;;  %v3259_v45 = vpack.c.bf16 %v2326_v40, %v2325_v1 }
 0x76c   : > { %2354 = vxpose.xlu0.b32.cont [11/16] (narrow) %v2337_v9, 8 }
 0x76e   : > { %3251 = vmatpush3.bf16.msra.mxu0 %v3250_v42 }
 0x76f   : > { %3252 = vmatprep.subr.bf16.mxu0 %v3784_v31 }
 0x770   : > { %2355 = vxpose.xlu0.b32.cont [12/16] (narrow) %v2338_v13, 8 }
 0x772   : > { %3254 = vmatpush3.bf16.msra.mxu0 %v3253_v36 }
 0x773   : > { %3255 = vmatprep.subr.bf16.mxu0 %v3784_v31 }
 0x774   : > { %2356 = vxpose.xlu0.b32.cont [13/16] (narrow) %v2339_v8, 8 }
 0x776   : > { %3257 = vmatpush3.bf16.msra.mxu0 %v3256_v39 }
 0x777   : > { %3258 = vmatprep.subr.bf16.mxu0 %v3784_v31 }
 0x778   : > { %2357 = vxpose.xlu0.b32.cont [14/16] (narrow) %v2340_v38, 8 }
 0x77a   : > { %3260 = vmatpush3.bf16.msra.mxu0 %v3259_v45 }
 0x77c   : > { %2358 = vxpose.xlu0.b32.cont [15/16] (narrow) %v2341_v57, 8 }
 0x780   : > { %2359 = vxpose.xlu0.b32.end [16/16] (narrow) %v2342_v22, 8 }
 0x7c4   : > { %v2360_v59 = vpop.trf.xlu0 }
 0x7c5   : > { %3200 = vmatmul.mubr.f32.vlgmr.msra.gmra.mrb[0].mxu0 %v2360_v59 }
 0x898   : > { %v2442_v44 = vpop.f32.mrb[0].mxu0 }
 0x899   : > { %v2446_v47 = vadd.f32 %v2442_v44, %v2343_v43  ;;  %v3201_v25 = vpop.f32.mrb[1].mxu0 }
 0x89b   : > { %2447 = vst [vmem:[#allocation6] sm:$0xff] %v2446_v47 }
 0x89c PF: > { %2451 = sbr.rel (%p4385_p5) target bundleno = 2453 (0x995), region = 140  ;;  %v2453_v31 = vld [vmem:[%s4648_s5] sm:$0xff] (!%p4385_p5)  ;;  %v2454_v41 = vld [vmem:[%s4648_s5 + $0x8] sm:$0xff] (!%p4385_p5)  ;;  %v2455_v51 = vld [vmem:[%s4648_s5 + $0x10] sm:$0xff] (!%p4385_p5)  ;;  %v3787_v55 = vmov (!%p4385_p5), 0.0|0.0   ;;  %vm3788_vm1 = vmmov (!%p4385_p5), 0  }
 0x89d   : > { %3261 = vmatprep.subr.bf16.mxu0 (!%p4385_p5), %v3787_v55  ;;  %v3262_v60 = vpack.c.bf16 (!%p4385_p5), %v2454_v41, %v2453_v31  ;;  %v2456_v49 = vld [vmem:[%s4648_s5 + $0x18] sm:$0xff] (!%p4385_p5)  ;;  %v3789_v53 = vmov (!%p4385_p5), 0.0   ;;  %v2457_v23 = vld [vmem:[%s4648_s5 + $0x20] sm:$0xff] (!%p4385_p5)  ;;  %v2458_v24 = vld [vmem:[%s4648_s5 + $0x28] sm:$0xff] (!%p4385_p5)  ;;  %s4679_s22 = sld [smem:[#allocation22_spill]] (!%p4385_p5) }
 0x89e   : > { %3234 = vmatprep.mubr.msk.f32.mxu0 (!%p4385_p5), %vm3788_vm1, %v3789_v53  ;;  %v3265_v11 = vpack.c.bf16 (!%p4385_p5), %v2456_v49, %v2455_v51  ;;  %v3268_v46 = vpack.c.bf16 (!%p4385_p5), %v2458_v24, %v2457_v23  ;;  %v2459_v12 = vld [vmem:[%s4648_s5 + $0x30] sm:$0xff] (!%p4385_p5)  ;;  %v2460_v48 = vld [vmem:[%s4648_s5 + $0x38] sm:$0xff] (!%p4385_p5)  ;;  %v2461_v56 = vld [vmem:[%s4648_s5 + $0x40] sm:$0xff] (!%p4385_p5) }
 0x89f   : > { %3263 = vmatpush3.bf16.msra.mxu0 (!%p4385_p5), %v3262_v60  ;;  %v3271_v54 = vpack.c.bf16 (!%p4385_p5), %v2460_v48, %v2459_v12  ;;  %v2462_v61 = vld [vmem:[%s4648_s5 + $0x48] sm:$0xff] (!%p4385_p5)  ;;  %v2463_v50 = vld [vmem:[%s4648_s5 + $0x50] sm:$0xff] (!%p4385_p5)  ;;  %v2464_v0 = vld [vmem:[%s4648_s5 + $0x58] sm:$0xff] (!%p4385_p5) }
 0x8a0   : > { %3264 = vmatprep.subr.bf16.mxu0 (!%p4385_p5), %v3787_v55  ;;  %v3274_v27 = vpack.c.bf16 (!%p4385_p5), %v2462_v61, %v2461_v56  ;;  %v3277_v3 = vpack.c.bf16 (!%p4385_p5), %v2464_v0, %v2463_v50  ;;  %v2465_v17 = vld [vmem:[%s4648_s5 + $0x60] sm:$0xff] (!%p4385_p5)  ;;  %v2466_v32 = vld [vmem:[%s4648_s5 + $0x68] sm:$0xff] (!%p4385_p5)  ;;  %v2467_v4 = vld [vmem:[%s4648_s5 + $0x70] sm:$0xff] (!%p4385_p5) }
 0x8a1   : > { %v3280_v18 = vpack.c.bf16 (!%p4385_p5), %v2466_v32, %v2465_v17  ;;  %v2468_v6 = vld [vmem:[%s4648_s5 + $0x78] sm:$0xff] (!%p4385_p5) }
 0x8a2   : > { %v3283_v62 = vpack.c.bf16 (!%p4385_p5), %v2468_v6, %v2467_v4  ;;  %v2452_v19 = vld [vmem:[#allocation6] sm:$0xff] (!%p4385_p5) }
 0x8a3   : > { %3266 = vmatpush3.bf16.msra.mxu0 %v3265_v11  ;;  %v2839_v2 = vld [vmem:[%s4679_s22] ss:$0 sm:$0xff] }
 0x8a4   : > { %3267 = vmatprep.subr.bf16.mxu0 %v3787_v55 }
 0x8a7   : > { %3269 = vmatpush3.bf16.msra.mxu0 %v3268_v46 }
 0x8a8   : > { %3270 = vmatprep.subr.bf16.mxu0 %v3787_v55 }
 0x8ab   : > { %3272 = vmatpush3.bf16.msra.mxu0 %v3271_v54 }
 0x8ac   : > { %3273 = vmatprep.subr.bf16.mxu0 %v3787_v55 }
 0x8af   : > { %3275 = vmatpush3.bf16.msra.mxu0 %v3274_v27 }
 0x8b0   : > { %3276 = vmatprep.subr.bf16.mxu0 %v3787_v55 }
 0x8b3   : > { %3278 = vmatpush3.bf16.msra.mxu0 %v3277_v3 }
 0x8b4   : > { %3279 = vmatprep.subr.bf16.mxu0 %v3787_v55 }
 0x8b7   : > { %3281 = vmatpush3.bf16.msra.mxu0 %v3280_v18 }
 0x8b8   : > { %3282 = vmatprep.subr.bf16.mxu0 %v3787_v55 }
 0x8bb   : > { %3284 = vmatpush3.bf16.msra.mxu0 %v3283_v62 }
 0x8be   : > { %3235 = vmatmul.mubr.f32.vlgmr.msra.gmra.mrb[0].mxu0 %v2452_v19 }
 0x991   : > { %v2542_v9 = vpop.f32.mrb[0].mxu0 }
 0x992   : > { %v2543_v10 = vadd.f32 %v2839_v2, %v2542_v9  ;;  %v3236_v26 = vpop.f32.mrb[1].mxu0 }
 0x994   : > { %2546 = vst [vmem:[#allocation13] sm:$0xff] %v2543_v10 }
 0x995 PF: > { %p3412_p9 = scmp.eq.s32.totalorder %s3870_s9, 9  ;;  %s3790_s12 = smov [#allocation13]  }
 0x996   : > { %s2554_s24 = sshll.u32 %s3790_s12, 4  ;;  %s2555_s24 = int_to_ptr.vmem [resolvable:$true] %s2554_s24 }
 0x997   : > { %s3672_s17 = scalar_lea.vmem %s2555_s24, 128  ;;  %p3679_p12 = scmp.lt.s32.totalorder %s2555_s24, %s2555_s24 }
 0x998   : > { %p3673_p3 = scmp.ne.s32.totalorder %s2555_s24, %s3672_s17  ;;  %p3680_p2 = scmp.lt.s32.totalorder %s3672_s17, %s3672_s17 }
 0x99a   : > { %p3674_p6 = pnand %p3673_p3, %p3412_p9  ;;  %p3681_p11 = por %p3680_p2, %p3679_p12 }
 0x99c   : > { %p3675_p8 = pneg %p3674_p6 }
 0x99e   : > { %p3682_p4 = pnand %p3681_p11, %p3675_p8 }
 0x9a0   : > { %3685 = shalt.err (!%p3682_p4)
}
 0x9a1   : > { %s4680_s19 = sld [smem:[#allocation23_spill]] }
 0x9a7   : > { %s3686_s11 = scalar_lea.hbm %s4680_s19, 128 }
 0x9a8   : > { %p3687_p7 = scmp.ne.s32.totalorder %s4680_s19, %s3686_s11  ;;  %p3692_p1 = scmp.lt.u32.totalorder %s3686_s11, %s4680_s19 }
 0x9aa   : > { %p3688_p10 = pnand %p3687_p7, %p3412_p9 }
 0x9ac   : > { %p3689_p13 = pneg %p3688_p10 }
 0x9ae   : > { %p3694_p0 = pnand %p3692_p1, %p3689_p13 }
 0x9b0   : > { %3697 = shalt.err (!%p3694_p0)
}
 0x9b1   : > { %3393 = dma.vmem_to_hbm [thread:$0]  (%p3412_p9), %s2555_s24, 128, %s4680_s19, [#allocation9]  }
 0x9b2   : > { %3743 = dma.done.wait (%p3412_p9), [#allocation9], 128  }
 0x9b3   : > { %3745 = vsyncadd (%p3412_p9), [#allocation9], 4294967168 }
 0x9b4 PF: > { %s20_s8 = sadd.s32 1, %s3776_s8   ;;  %s4681_s27 = sld [smem:[#allocation18_spill]] }
 0x9b5   : > { %p17_p5 = scmp.ge.s32.totalorder %s20_s8, 12   ;;  %s4682_s13 = sld [smem:[#allocation19_spill]] }
 0x9b6   : > { %s4683_s24 = smov %s3752_s25  ;;  %s4684_s25 = smov %s3756_s26 }
 0x9b7   : > { %s4685_s26 = smov %s3990_s29  ;;  %s4686_s28 = smov %s3772_s30 }
 0x9b8   : > { %s4688_s30 = smov %s4694_s15  ;;  %19 = sbr.rel (!%p17_p5) target bundleno = 11 (0xb), region = 199 }
 0x9bb   : > { %s4687_s29 = smov %s4682_s13 }
 0x9bf   :  { %2567 = vsyncpa [#allocation8], 1 }
 0x9c0   :  { %2569 = vsyncpa [#allocation8 + $0x1], 1 }
 0x9c1   :  { %2570 = vsyncpa [#allocation11], 1 }
 0x9c2   :  { %2571 = vsyncpa [#allocation9], 1 }
 0x9c3   :  { %2573 = vsyncpa [#allocation9 + $0x1], 1 }

</bundles_post_ra>
